<compile_context>
chip_gen: v5e
topology: v5e:2x2
jax: 0.10.0
libtpu: 0.0.40
codegen_flags: <defaults>
</compile_context>

<pallas_src>
import jax
import jax.numpy as jnp
from jax.experimental import pallas as pl
from jax.experimental.pallas import tpu as pltpu

EPS = 1e-5        # BatchNorm1d default eps
LATENT = 2048     # tr2 / dec0 latent width (from the reference module)


# ------------------------------ fused kernel ------------------------------- #

def _graph_pooling_kernel(
    # data
    x_ref, a_ref, eps_ref,
    # encoder SAGE (stacked [Wl; Wr]) + bias
    s1w_ref, s1b_ref, s2w_ref, s2b_ref, s3w_ref, s3b_ref, s4w_ref, s4b_ref,
    # encoder linears
    tr1w_ref, tr1b_ref, tr2w_ref, tr2b_ref,
    # decoder linears
    d0w_ref, d0b_ref, d1w_ref, d1b_ref,
    # decoder SAGE (stacked) + bias
    d2w_ref, d2b_ref, d3w_ref, d3b_ref, d4w_ref, d4b_ref, d5w_ref, d5b_ref,
    # batch norms (gamma, beta) x5
    g1_ref, bt1_ref, g2_ref, bt2_ref, g3_ref, bt3_ref, g4_ref, bt4_ref,
    g5_ref, bt5_ref,
    # outputs
    z2_ref, mu_ref,
):
    x = x_ref[...]
    a = a_ref[...]

    # Row-normalize the adjacency ONCE (mean aggregation; 0 for isolated nodes).
    deg = jnp.sum(a, axis=1, keepdims=True)
    a_norm = a / jnp.maximum(deg, 1.0)

    def sage(h, w_ref, b_ref):
        # mean_agg(h) @ Wl + h @ Wr + b, as a single wider MXU matmul:
        # [agg, h] @ [Wl; Wr] + b
        agg = jnp.dot(a_norm, h, preferred_element_type=jnp.float32)
        hc = jnp.concatenate([agg, h], axis=1)
        return jnp.dot(hc, w_ref[...], preferred_element_type=jnp.float32) + b_ref[...]

    def lin(h, w_ref, b_ref):
        return jnp.dot(h, w_ref[...], preferred_element_type=jnp.float32) + b_ref[...]

    def bn_relu(h, g_ref, bt_ref):
        # One-pass batch statistics (training-mode, biased variance) with
        # folded scale/shift -> normalization is a single FMA.
        mean = jnp.mean(h, axis=0, keepdims=True)
        var = jnp.mean(h * h, axis=0, keepdims=True) - mean * mean
        scale = g_ref[...] * jax.lax.rsqrt(var + EPS)
        shift = bt_ref[...] - mean * scale
        return jnp.maximum(h * scale + shift, 0.0)

    # ---- encode ----
    h = bn_relu(sage(x, s1w_ref, s1b_ref), g1_ref, bt1_ref)   # -> oc1
    # edge1 pool: identity (see TODO at top)
    h = bn_relu(sage(h, s2w_ref, s2b_ref), g2_ref, bt2_ref)   # -> oc2
    # edge2 pool: identity
    h = bn_relu(sage(h, s3w_ref, s3b_ref), g3_ref, bt3_ref)   # -> oc3
    # edge3 pool: identity
    h = bn_relu(sage(h, s4w_ref, s4b_ref), g4_ref, bt4_ref)   # -> oc4
    h = bn_relu(lin(h, tr1w_ref, tr1b_ref), g5_ref, bt5_ref)  # -> oc5
    mu = lin(h, tr2w_ref, tr2b_ref)                           # -> 2048
    mu_ref[...] = mu
    # logvar == mu (reference applies self.tr2 twice to the same hidden1)

    # ---- reparametrize (training path): z = mu + eps * exp(logvar) ----
    z = mu + eps_ref[...] * jnp.exp(mu)

    # ---- decode ----
    o = bn_relu(lin(z, d0w_ref, d0b_ref), g5_ref, bt5_ref)    # -> oc5
    o = bn_relu(lin(o, d1w_ref, d1b_ref), g4_ref, bt4_ref)    # -> oc4
    o = bn_relu(sage(o, d2w_ref, d2b_ref), g3_ref, bt3_ref)   # -> oc3
    # edge3 unpool: identity
    o = bn_relu(sage(o, d3w_ref, d3b_ref), g2_ref, bt2_ref)   # -> oc2
    # edge2 unpool: identity
    o = bn_relu(sage(o, d4w_ref, d4b_ref), g1_ref, bt1_ref)   # -> oc1
    # edge1 unpool: identity
    z2_ref[...] = sage(o, d5w_ref, d5b_ref)                   # -> in_channels


# ------------------------------ call wrapper ------------------------------- #

def graph_pooling_forward(params, x, adj, noise_key):
    n, c_in = x.shape

    # Deterministic Gaussian noise for the reparametrization (training path).
    eps = jax.random.normal(noise_key, (n, LATENT), jnp.float32)

    args = [
        x, adj, eps,
        params["sage1"]["w"], params["sage1"]["b"],
        params["sage2"]["w"], params["sage2"]["b"],
        params["sage3"]["w"], params["sage3"]["b"],
        params["sage4"]["w"], params["sage4"]["b"],
        params["tr1"]["w"], params["tr1"]["b"],
        params["tr2"]["w"], params["tr2"]["b"],
        params["dec0"]["w"], params["dec0"]["b"],
        params["dec1"]["w"], params["dec1"]["b"],
        params["dec2"]["w"], params["dec2"]["b"],
        params["dec3"]["w"], params["dec3"]["b"],
        params["dec4"]["w"], params["dec4"]["b"],
        params["dec5"]["w"], params["dec5"]["b"],
        params["bano1"]["gamma"], params["bano1"]["beta"],
        params["bano2"]["gamma"], params["bano2"]["beta"],
        params["bano3"]["gamma"], params["bano3"]["beta"],
        params["bano4"]["gamma"], params["bano4"]["beta"],
        params["bano5"]["gamma"], params["bano5"]["beta"],
    ]

    vmem_spec = pl.BlockSpec(memory_space=pltpu.MemorySpace.VMEM)
    z2, mu = pl.pallas_call(
        _graph_pooling_kernel,
        out_shape=(
            jax.ShapeDtypeStruct((n, c_in), jnp.float32),
            jax.ShapeDtypeStruct((n, LATENT), jnp.float32),
        ),
        in_specs=[vmem_spec] * len(args),
        out_specs=(vmem_spec, vmem_spec),
    )(*args)

    logvar = mu  # reference: tr2(hidden1) returned twice -> logvar == mu
    return z2, mu, logvar


# --------------------------- parameter construction ------------------------ #

def _make_sage(key, c_in, c_out):
    # Store the SAGE weights pre-stacked as [Wl; Wr] so the kernel can do
    # [agg, x] @ W in a single MXU matmul.
    k1, k2 = jax.random.split(key)
    wl = 0.05 * jax.random.normal(k1, (c_in, c_out), jnp.float32)
    wr = 0.05 * jax.random.normal(k2, (c_in, c_out), jnp.float32)
    return {
        "w": jnp.concatenate([wl, wr], axis=0),       # (2*c_in, c_out)
        "b": jnp.zeros((1, c_out), jnp.float32),
    }


def _make_linear(key, c_in, c_out):
    return {
        "w": 0.05 * jax.random.normal(key, (c_in, c_out), jnp.float32),
        "b": jnp.zeros((1, c_out), jnp.float32),
    }


def _make_bn(c):
    return {"gamma": jnp.ones((1, c), jnp.float32),
            "beta": jnp.zeros((1, c), jnp.float32)}


def make_params(key, in_channels, oc1, oc2, oc3, oc4, oc5):
    keys = jax.random.split(key, 12)
    return {
        "sage1": _make_sage(keys[0], in_channels, oc1),
        "sage2": _make_sage(keys[1], oc1, oc2),
        "sage3": _make_sage(keys[2], oc2, oc3),
        "sage4": _make_sage(keys[3], oc3, oc4),
        "tr1": _make_linear(keys[4], oc4, oc5),
        "tr2": _make_linear(keys[5], oc5, LATENT),
        "dec0": _make_linear(keys[6], LATENT, oc5),
        "dec1": _make_linear(keys[7], oc5, oc4),
        "dec2": _make_sage(keys[8], oc4, oc3),
        "dec3": _make_sage(keys[9], oc3, oc2),
        "dec4": _make_sage(keys[10], oc2, oc1),
        "dec5": _make_sage(keys[11], oc1, in_channels),
        "bano1": _make_bn(oc1),
        "bano2": _make_bn(oc2),
        "bano3": _make_bn(oc3),
        "bano4": _make_bn(oc4),
        "bano5": _make_bn(oc5),
    }


# ----------------------------------- main ----------------------------------- #

if __name__ == "__main__":
    key = jax.random.PRNGKey(0)
    k_x, k_adj, k_params, k_noise = jax.random.split(key, 4)

    N = 32            # number of graph nodes
    in_channels = 8
    oc1, oc2, oc3, oc4, oc5 = 32, 24, 16, 12, 16

    x = jax.random.normal(k_x, (N, in_channels), jnp.float32)

    # Random symmetric adjacency (no self loops), dense [N, N] float mask.
    upper = (jax.random.uniform(k_adj, (N, N)) < 0.3).astype(jnp.float32)
    adj = jnp.triu(upper, k=1)
    adj = adj + adj.T

    params = make_params(k_params, in_channels, oc1, oc2, oc3, oc4, oc5)

    z2, mu, logvar = graph_pooling_forward(params, x, adj, k_noise)
    jax.block_until_ready((z2, mu, logvar))

    assert z2.shape == (N, in_channels)
    assert mu.shape == (N, LATENT) and logvar.shape == (N, LATENT)
    assert bool(jnp.all(jnp.isfinite(z2))) and bool(jnp.all(jnp.isfinite(mu)))
    print("KERNEL_OK")
</pallas_src>

<mosaic_0001>
module attributes {stable_mosaic.version = 11 : i64} {
  func.func @_graph_pooling_kernel(%arg0: memref<32x8xf32, #tpu.memory_space<vmem>>, %arg1: memref<32x32xf32, #tpu.memory_space<vmem>>, %arg2: memref<32x2048xf32, #tpu.memory_space<vmem>>, %arg3: memref<16x32xf32, #tpu.memory_space<vmem>>, %arg4: memref<1x32xf32, #tpu.memory_space<vmem>>, %arg5: memref<64x24xf32, #tpu.memory_space<vmem>>, %arg6: memref<1x24xf32, #tpu.memory_space<vmem>>, %arg7: memref<48x16xf32, #tpu.memory_space<vmem>>, %arg8: memref<1x16xf32, #tpu.memory_space<vmem>>, %arg9: memref<32x12xf32, #tpu.memory_space<vmem>>, %arg10: memref<1x12xf32, #tpu.memory_space<vmem>>, %arg11: memref<12x16xf32, #tpu.memory_space<vmem>>, %arg12: memref<1x16xf32, #tpu.memory_space<vmem>>, %arg13: memref<16x2048xf32, #tpu.memory_space<vmem>>, %arg14: memref<1x2048xf32, #tpu.memory_space<vmem>>, %arg15: memref<2048x16xf32, #tpu.memory_space<vmem>>, %arg16: memref<1x16xf32, #tpu.memory_space<vmem>>, %arg17: memref<16x12xf32, #tpu.memory_space<vmem>>, %arg18: memref<1x12xf32, #tpu.memory_space<vmem>>, %arg19: memref<24x16xf32, #tpu.memory_space<vmem>>, %arg20: memref<1x16xf32, #tpu.memory_space<vmem>>, %arg21: memref<32x24xf32, #tpu.memory_space<vmem>>, %arg22: memref<1x24xf32, #tpu.memory_space<vmem>>, %arg23: memref<48x32xf32, #tpu.memory_space<vmem>>, %arg24: memref<1x32xf32, #tpu.memory_space<vmem>>, %arg25: memref<64x8xf32, #tpu.memory_space<vmem>>, %arg26: memref<1x8xf32, #tpu.memory_space<vmem>>, %arg27: memref<1x32xf32, #tpu.memory_space<vmem>>, %arg28: memref<1x32xf32, #tpu.memory_space<vmem>>, %arg29: memref<1x24xf32, #tpu.memory_space<vmem>>, %arg30: memref<1x24xf32, #tpu.memory_space<vmem>>, %arg31: memref<1x16xf32, #tpu.memory_space<vmem>>, %arg32: memref<1x16xf32, #tpu.memory_space<vmem>>, %arg33: memref<1x12xf32, #tpu.memory_space<vmem>>, %arg34: memref<1x12xf32, #tpu.memory_space<vmem>>, %arg35: memref<1x16xf32, #tpu.memory_space<vmem>>, %arg36: memref<1x16xf32, #tpu.memory_space<vmem>>, %arg37: memref<32x8xf32, #tpu.memory_space<vmem>>, %arg38: memref<32x2048xf32, #tpu.memory_space<vmem>>) attributes {dimension_semantics = [], scalar_prefetch = 0 : i64, scratch_operands = 0 : i64, tpu.core_type = #tpu.core_type<tc>} {
    %c0 = arith.constant 0 : index
    %c0_0 = arith.constant 0 : index
    %0 = vector.load %arg0[%c0, %c0_0] : memref<32x8xf32, #tpu.memory_space<vmem>>, vector<32x8xf32>
    %c0_1 = arith.constant 0 : index
    %c0_2 = arith.constant 0 : index
    %1 = vector.load %arg1[%c0_1, %c0_2] : memref<32x32xf32, #tpu.memory_space<vmem>>, vector<32x32xf32>
    %cst = arith.constant dense<0.000000e+00> : vector<32xf32>
    %2 = vector.multi_reduction <add>, %1, %cst [1] : vector<32x32xf32> to vector<32xf32>
    %3 = vector.shape_cast %2 : vector<32xf32> to vector<32x1xf32>
    %cst_3 = arith.constant 1.000000e+00 : f32
    %4 = vector.broadcast %cst_3 : f32 to vector<32x1xf32>
    %5 = arith.maximumf %3, %4 : vector<32x1xf32>
    %6 = vector.broadcast %5 : vector<32x1xf32> to vector<32x32xf32>
    %7 = arith.divf %1, %6 : vector<32x32xf32>
    %cst_4 = arith.constant dense<0.000000e+00> : vector<32x8xf32>
    %8 = tpu.matmul %7, %0, %cst_4 {dimension_numbers = #tpu.dot_dimension_numbers<[1], [0], [0], [1], [0, 0, 1, 1], [], []>} : vector<32x32xf32>, vector<32x8xf32>, vector<32x8xf32> -> vector<32x8xf32>
    %9 = tpu.concatenate %8, %0 in 1 : vector<32x8xf32>, vector<32x8xf32> -> vector<32x16xf32>
    %c0_5 = arith.constant 0 : index
    %c0_6 = arith.constant 0 : index
    %10 = vector.load %arg3[%c0_5, %c0_6] : memref<16x32xf32, #tpu.memory_space<vmem>>, vector<16x32xf32>
    %cst_7 = arith.constant dense<0.000000e+00> : vector<32x32xf32>
    %11 = tpu.matmul %9, %10, %cst_7 {dimension_numbers = #tpu.dot_dimension_numbers<[1], [0], [0], [1], [0, 0, 1, 1], [], []>} : vector<32x16xf32>, vector<16x32xf32>, vector<32x32xf32> -> vector<32x32xf32>
    %c0_8 = arith.constant 0 : index
    %c0_9 = arith.constant 0 : index
    %12 = vector.load %arg4[%c0_8, %c0_9] : memref<1x32xf32, #tpu.memory_space<vmem>>, vector<1x32xf32>
    %13 = vector.broadcast %12 : vector<1x32xf32> to vector<32x32xf32>
    %14 = arith.addf %11, %13 : vector<32x32xf32>
    %cst_10 = arith.constant dense<0.000000e+00> : vector<32xf32>
    %15 = vector.multi_reduction <add>, %14, %cst_10 [0] : vector<32x32xf32> to vector<32xf32>
    %16 = vector.shape_cast %15 : vector<32xf32> to vector<1x32xf32>
    %cst_11 = arith.constant 3.200000e+01 : f32
    %17 = vector.broadcast %cst_11 : f32 to vector<1x32xf32>
    %18 = arith.divf %16, %17 : vector<1x32xf32>
    %19 = arith.mulf %14, %14 : vector<32x32xf32>
    %cst_12 = arith.constant dense<0.000000e+00> : vector<32xf32>
    %20 = vector.multi_reduction <add>, %19, %cst_12 [0] : vector<32x32xf32> to vector<32xf32>
    %21 = vector.shape_cast %20 : vector<32xf32> to vector<1x32xf32>
    %cst_13 = arith.constant 3.200000e+01 : f32
    %22 = vector.broadcast %cst_13 : f32 to vector<1x32xf32>
    %23 = arith.divf %21, %22 : vector<1x32xf32>
    %24 = arith.mulf %18, %18 : vector<1x32xf32>
    %25 = arith.subf %23, %24 : vector<1x32xf32>
    %c0_14 = arith.constant 0 : index
    %c0_15 = arith.constant 0 : index
    %26 = vector.load %arg27[%c0_14, %c0_15] : memref<1x32xf32, #tpu.memory_space<vmem>>, vector<1x32xf32>
    %cst_16 = arith.constant 9.99999974E-6 : f32
    %27 = vector.broadcast %cst_16 : f32 to vector<1x32xf32>
    %28 = arith.addf %25, %27 : vector<1x32xf32>
    %29 = math.rsqrt %28 : vector<1x32xf32>
    %30 = arith.mulf %26, %29 : vector<1x32xf32>
    %c0_17 = arith.constant 0 : index
    %c0_18 = arith.constant 0 : index
    %31 = vector.load %arg28[%c0_17, %c0_18] : memref<1x32xf32, #tpu.memory_space<vmem>>, vector<1x32xf32>
    %32 = arith.mulf %18, %30 : vector<1x32xf32>
    %33 = arith.subf %31, %32 : vector<1x32xf32>
    %34 = vector.broadcast %30 : vector<1x32xf32> to vector<32x32xf32>
    %35 = arith.mulf %14, %34 : vector<32x32xf32>
    %36 = vector.broadcast %33 : vector<1x32xf32> to vector<32x32xf32>
    %37 = arith.addf %35, %36 : vector<32x32xf32>
    %cst_19 = arith.constant 0.000000e+00 : f32
    %38 = vector.broadcast %cst_19 : f32 to vector<32x32xf32>
    %39 = arith.maximumf %37, %38 : vector<32x32xf32>
    %cst_20 = arith.constant dense<0.000000e+00> : vector<32x32xf32>
    %40 = tpu.matmul %7, %39, %cst_20 {dimension_numbers = #tpu.dot_dimension_numbers<[1], [0], [0], [1], [0, 0, 1, 1], [], []>} : vector<32x32xf32>, vector<32x32xf32>, vector<32x32xf32> -> vector<32x32xf32>
    %41 = tpu.concatenate %40, %39 in 1 : vector<32x32xf32>, vector<32x32xf32> -> vector<32x64xf32>
    %c0_21 = arith.constant 0 : index
    %c0_22 = arith.constant 0 : index
    %42 = vector.load %arg5[%c0_21, %c0_22] : memref<64x24xf32, #tpu.memory_space<vmem>>, vector<64x24xf32>
    %cst_23 = arith.constant dense<0.000000e+00> : vector<32x24xf32>
    %43 = tpu.matmul %41, %42, %cst_23 {dimension_numbers = #tpu.dot_dimension_numbers<[1], [0], [0], [1], [0, 0, 1, 1], [], []>} : vector<32x64xf32>, vector<64x24xf32>, vector<32x24xf32> -> vector<32x24xf32>
    %c0_24 = arith.constant 0 : index
    %c0_25 = arith.constant 0 : index
    %44 = vector.load %arg6[%c0_24, %c0_25] : memref<1x24xf32, #tpu.memory_space<vmem>>, vector<1x24xf32>
    %45 = vector.broadcast %44 : vector<1x24xf32> to vector<32x24xf32>
    %46 = arith.addf %43, %45 : vector<32x24xf32>
    %cst_26 = arith.constant dense<0.000000e+00> : vector<24xf32>
    %47 = vector.multi_reduction <add>, %46, %cst_26 [0] : vector<32x24xf32> to vector<24xf32>
    %48 = vector.shape_cast %47 : vector<24xf32> to vector<1x24xf32>
    %cst_27 = arith.constant 3.200000e+01 : f32
    %49 = vector.broadcast %cst_27 : f32 to vector<1x24xf32>
    %50 = arith.divf %48, %49 : vector<1x24xf32>
    %51 = arith.mulf %46, %46 : vector<32x24xf32>
    %cst_28 = arith.constant dense<0.000000e+00> : vector<24xf32>
    %52 = vector.multi_reduction <add>, %51, %cst_28 [0] : vector<32x24xf32> to vector<24xf32>
    %53 = vector.shape_cast %52 : vector<24xf32> to vector<1x24xf32>
    %cst_29 = arith.constant 3.200000e+01 : f32
    %54 = vector.broadcast %cst_29 : f32 to vector<1x24xf32>
    %55 = arith.divf %53, %54 : vector<1x24xf32>
    %56 = arith.mulf %50, %50 : vector<1x24xf32>
    %57 = arith.subf %55, %56 : vector<1x24xf32>
    %c0_30 = arith.constant 0 : index
    %c0_31 = arith.constant 0 : index
    %58 = vector.load %arg29[%c0_30, %c0_31] : memref<1x24xf32, #tpu.memory_space<vmem>>, vector<1x24xf32>
    %cst_32 = arith.constant 9.99999974E-6 : f32
    %59 = vector.broadcast %cst_32 : f32 to vector<1x24xf32>
    %60 = arith.addf %57, %59 : vector<1x24xf32>
    %61 = math.rsqrt %60 : vector<1x24xf32>
    %62 = arith.mulf %58, %61 : vector<1x24xf32>
    %c0_33 = arith.constant 0 : index
    %c0_34 = arith.constant 0 : index
    %63 = vector.load %arg30[%c0_33, %c0_34] : memref<1x24xf32, #tpu.memory_space<vmem>>, vector<1x24xf32>
    %64 = arith.mulf %50, %62 : vector<1x24xf32>
    %65 = arith.subf %63, %64 : vector<1x24xf32>
    %66 = vector.broadcast %62 : vector<1x24xf32> to vector<32x24xf32>
    %67 = arith.mulf %46, %66 : vector<32x24xf32>
    %68 = vector.broadcast %65 : vector<1x24xf32> to vector<32x24xf32>
    %69 = arith.addf %67, %68 : vector<32x24xf32>
    %cst_35 = arith.constant 0.000000e+00 : f32
    %70 = vector.broadcast %cst_35 : f32 to vector<32x24xf32>
    %71 = arith.maximumf %69, %70 : vector<32x24xf32>
    %cst_36 = arith.constant dense<0.000000e+00> : vector<32x24xf32>
    %72 = tpu.matmul %7, %71, %cst_36 {dimension_numbers = #tpu.dot_dimension_numbers<[1], [0], [0], [1], [0, 0, 1, 1], [], []>} : vector<32x32xf32>, vector<32x24xf32>, vector<32x24xf32> -> vector<32x24xf32>
    %73 = tpu.concatenate %72, %71 in 1 : vector<32x24xf32>, vector<32x24xf32> -> vector<32x48xf32>
    %c0_37 = arith.constant 0 : index
    %c0_38 = arith.constant 0 : index
    %74 = vector.load %arg7[%c0_37, %c0_38] : memref<48x16xf32, #tpu.memory_space<vmem>>, vector<48x16xf32>
    %cst_39 = arith.constant dense<0.000000e+00> : vector<32x16xf32>
    %75 = tpu.matmul %73, %74, %cst_39 {dimension_numbers = #tpu.dot_dimension_numbers<[1], [0], [0], [1], [0, 0, 1, 1], [], []>} : vector<32x48xf32>, vector<48x16xf32>, vector<32x16xf32> -> vector<32x16xf32>
    %c0_40 = arith.constant 0 : index
    %c0_41 = arith.constant 0 : index
    %76 = vector.load %arg8[%c0_40, %c0_41] : memref<1x16xf32, #tpu.memory_space<vmem>>, vector<1x16xf32>
    %77 = vector.broadcast %76 : vector<1x16xf32> to vector<32x16xf32>
    %78 = arith.addf %75, %77 : vector<32x16xf32>
    %cst_42 = arith.constant dense<0.000000e+00> : vector<16xf32>
    %79 = vector.multi_reduction <add>, %78, %cst_42 [0] : vector<32x16xf32> to vector<16xf32>
    %80 = vector.shape_cast %79 : vector<16xf32> to vector<1x16xf32>
    %cst_43 = arith.constant 3.200000e+01 : f32
    %81 = vector.broadcast %cst_43 : f32 to vector<1x16xf32>
    %82 = arith.divf %80, %81 : vector<1x16xf32>
    %83 = arith.mulf %78, %78 : vector<32x16xf32>
    %cst_44 = arith.constant dense<0.000000e+00> : vector<16xf32>
    %84 = vector.multi_reduction <add>, %83, %cst_44 [0] : vector<32x16xf32> to vector<16xf32>
    %85 = vector.shape_cast %84 : vector<16xf32> to vector<1x16xf32>
    %cst_45 = arith.constant 3.200000e+01 : f32
    %86 = vector.broadcast %cst_45 : f32 to vector<1x16xf32>
    %87 = arith.divf %85, %86 : vector<1x16xf32>
    %88 = arith.mulf %82, %82 : vector<1x16xf32>
    %89 = arith.subf %87, %88 : vector<1x16xf32>
    %c0_46 = arith.constant 0 : index
    %c0_47 = arith.constant 0 : index
    %90 = vector.load %arg31[%c0_46, %c0_47] : memref<1x16xf32, #tpu.memory_space<vmem>>, vector<1x16xf32>
    %cst_48 = arith.constant 9.99999974E-6 : f32
    %91 = vector.broadcast %cst_48 : f32 to vector<1x16xf32>
    %92 = arith.addf %89, %91 : vector<1x16xf32>
    %93 = math.rsqrt %92 : vector<1x16xf32>
    %94 = arith.mulf %90, %93 : vector<1x16xf32>
    %c0_49 = arith.constant 0 : index
    %c0_50 = arith.constant 0 : index
    %95 = vector.load %arg32[%c0_49, %c0_50] : memref<1x16xf32, #tpu.memory_space<vmem>>, vector<1x16xf32>
    %96 = arith.mulf %82, %94 : vector<1x16xf32>
    %97 = arith.subf %95, %96 : vector<1x16xf32>
    %98 = vector.broadcast %94 : vector<1x16xf32> to vector<32x16xf32>
    %99 = arith.mulf %78, %98 : vector<32x16xf32>
    %100 = vector.broadcast %97 : vector<1x16xf32> to vector<32x16xf32>
    %101 = arith.addf %99, %100 : vector<32x16xf32>
    %cst_51 = arith.constant 0.000000e+00 : f32
    %102 = vector.broadcast %cst_51 : f32 to vector<32x16xf32>
    %103 = arith.maximumf %101, %102 : vector<32x16xf32>
    %cst_52 = arith.constant dense<0.000000e+00> : vector<32x16xf32>
    %104 = tpu.matmul %7, %103, %cst_52 {dimension_numbers = #tpu.dot_dimension_numbers<[1], [0], [0], [1], [0, 0, 1, 1], [], []>} : vector<32x32xf32>, vector<32x16xf32>, vector<32x16xf32> -> vector<32x16xf32>
    %105 = tpu.concatenate %104, %103 in 1 : vector<32x16xf32>, vector<32x16xf32> -> vector<32x32xf32>
    %c0_53 = arith.constant 0 : index
    %c0_54 = arith.constant 0 : index
    %106 = vector.load %arg9[%c0_53, %c0_54] : memref<32x12xf32, #tpu.memory_space<vmem>>, vector<32x12xf32>
    %cst_55 = arith.constant dense<0.000000e+00> : vector<32x12xf32>
    %107 = tpu.matmul %105, %106, %cst_55 {dimension_numbers = #tpu.dot_dimension_numbers<[1], [0], [0], [1], [0, 0, 1, 1], [], []>} : vector<32x32xf32>, vector<32x12xf32>, vector<32x12xf32> -> vector<32x12xf32>
    %c0_56 = arith.constant 0 : index
    %c0_57 = arith.constant 0 : index
    %108 = vector.load %arg10[%c0_56, %c0_57] : memref<1x12xf32, #tpu.memory_space<vmem>>, vector<1x12xf32>
    %109 = vector.broadcast %108 : vector<1x12xf32> to vector<32x12xf32>
    %110 = arith.addf %107, %109 : vector<32x12xf32>
    %cst_58 = arith.constant dense<0.000000e+00> : vector<12xf32>
    %111 = vector.multi_reduction <add>, %110, %cst_58 [0] : vector<32x12xf32> to vector<12xf32>
    %112 = vector.shape_cast %111 : vector<12xf32> to vector<1x12xf32>
    %cst_59 = arith.constant 3.200000e+01 : f32
    %113 = vector.broadcast %cst_59 : f32 to vector<1x12xf32>
    %114 = arith.divf %112, %113 : vector<1x12xf32>
    %115 = arith.mulf %110, %110 : vector<32x12xf32>
    %cst_60 = arith.constant dense<0.000000e+00> : vector<12xf32>
    %116 = vector.multi_reduction <add>, %115, %cst_60 [0] : vector<32x12xf32> to vector<12xf32>
    %117 = vector.shape_cast %116 : vector<12xf32> to vector<1x12xf32>
    %cst_61 = arith.constant 3.200000e+01 : f32
    %118 = vector.broadcast %cst_61 : f32 to vector<1x12xf32>
    %119 = arith.divf %117, %118 : vector<1x12xf32>
    %120 = arith.mulf %114, %114 : vector<1x12xf32>
    %121 = arith.subf %119, %120 : vector<1x12xf32>
    %c0_62 = arith.constant 0 : index
    %c0_63 = arith.constant 0 : index
    %122 = vector.load %arg33[%c0_62, %c0_63] : memref<1x12xf32, #tpu.memory_space<vmem>>, vector<1x12xf32>
    %cst_64 = arith.constant 9.99999974E-6 : f32
    %123 = vector.broadcast %cst_64 : f32 to vector<1x12xf32>
    %124 = arith.addf %121, %123 : vector<1x12xf32>
    %125 = math.rsqrt %124 : vector<1x12xf32>
    %126 = arith.mulf %122, %125 : vector<1x12xf32>
    %c0_65 = arith.constant 0 : index
    %c0_66 = arith.constant 0 : index
    %127 = vector.load %arg34[%c0_65, %c0_66] : memref<1x12xf32, #tpu.memory_space<vmem>>, vector<1x12xf32>
    %128 = arith.mulf %114, %126 : vector<1x12xf32>
    %129 = arith.subf %127, %128 : vector<1x12xf32>
    %130 = vector.broadcast %126 : vector<1x12xf32> to vector<32x12xf32>
    %131 = arith.mulf %110, %130 : vector<32x12xf32>
    %132 = vector.broadcast %129 : vector<1x12xf32> to vector<32x12xf32>
    %133 = arith.addf %131, %132 : vector<32x12xf32>
    %cst_67 = arith.constant 0.000000e+00 : f32
    %134 = vector.broadcast %cst_67 : f32 to vector<32x12xf32>
    %135 = arith.maximumf %133, %134 : vector<32x12xf32>
    %c0_68 = arith.constant 0 : index
    %c0_69 = arith.constant 0 : index
    %136 = vector.load %arg11[%c0_68, %c0_69] : memref<12x16xf32, #tpu.memory_space<vmem>>, vector<12x16xf32>
    %cst_70 = arith.constant dense<0.000000e+00> : vector<32x16xf32>
    %137 = tpu.matmul %135, %136, %cst_70 {dimension_numbers = #tpu.dot_dimension_numbers<[1], [0], [0], [1], [0, 0, 1, 1], [], []>} : vector<32x12xf32>, vector<12x16xf32>, vector<32x16xf32> -> vector<32x16xf32>
    %c0_71 = arith.constant 0 : index
    %c0_72 = arith.constant 0 : index
    %138 = vector.load %arg12[%c0_71, %c0_72] : memref<1x16xf32, #tpu.memory_space<vmem>>, vector<1x16xf32>
    %139 = vector.broadcast %138 : vector<1x16xf32> to vector<32x16xf32>
    %140 = arith.addf %137, %139 : vector<32x16xf32>
    %cst_73 = arith.constant dense<0.000000e+00> : vector<16xf32>
    %141 = vector.multi_reduction <add>, %140, %cst_73 [0] : vector<32x16xf32> to vector<16xf32>
    %142 = vector.shape_cast %141 : vector<16xf32> to vector<1x16xf32>
    %cst_74 = arith.constant 3.200000e+01 : f32
    %143 = vector.broadcast %cst_74 : f32 to vector<1x16xf32>
    %144 = arith.divf %142, %143 : vector<1x16xf32>
    %145 = arith.mulf %140, %140 : vector<32x16xf32>
    %cst_75 = arith.constant dense<0.000000e+00> : vector<16xf32>
    %146 = vector.multi_reduction <add>, %145, %cst_75 [0] : vector<32x16xf32> to vector<16xf32>
    %147 = vector.shape_cast %146 : vector<16xf32> to vector<1x16xf32>
    %cst_76 = arith.constant 3.200000e+01 : f32
    %148 = vector.broadcast %cst_76 : f32 to vector<1x16xf32>
    %149 = arith.divf %147, %148 : vector<1x16xf32>
    %150 = arith.mulf %144, %144 : vector<1x16xf32>
    %151 = arith.subf %149, %150 : vector<1x16xf32>
    %c0_77 = arith.constant 0 : index
    %c0_78 = arith.constant 0 : index
    %152 = vector.load %arg35[%c0_77, %c0_78] : memref<1x16xf32, #tpu.memory_space<vmem>>, vector<1x16xf32>
    %cst_79 = arith.constant 9.99999974E-6 : f32
    %153 = vector.broadcast %cst_79 : f32 to vector<1x16xf32>
    %154 = arith.addf %151, %153 : vector<1x16xf32>
    %155 = math.rsqrt %154 : vector<1x16xf32>
    %156 = arith.mulf %152, %155 : vector<1x16xf32>
    %c0_80 = arith.constant 0 : index
    %c0_81 = arith.constant 0 : index
    %157 = vector.load %arg36[%c0_80, %c0_81] : memref<1x16xf32, #tpu.memory_space<vmem>>, vector<1x16xf32>
    %158 = arith.mulf %144, %156 : vector<1x16xf32>
    %159 = arith.subf %157, %158 : vector<1x16xf32>
    %160 = vector.broadcast %156 : vector<1x16xf32> to vector<32x16xf32>
    %161 = arith.mulf %140, %160 : vector<32x16xf32>
    %162 = vector.broadcast %159 : vector<1x16xf32> to vector<32x16xf32>
    %163 = arith.addf %161, %162 : vector<32x16xf32>
    %cst_82 = arith.constant 0.000000e+00 : f32
    %164 = vector.broadcast %cst_82 : f32 to vector<32x16xf32>
    %165 = arith.maximumf %163, %164 : vector<32x16xf32>
    %c0_83 = arith.constant 0 : index
    %c0_84 = arith.constant 0 : index
    %166 = vector.load %arg13[%c0_83, %c0_84] : memref<16x2048xf32, #tpu.memory_space<vmem>>, vector<16x2048xf32>
    %cst_85 = arith.constant dense<0.000000e+00> : vector<32x2048xf32>
    %167 = tpu.matmul %165, %166, %cst_85 {dimension_numbers = #tpu.dot_dimension_numbers<[1], [0], [0], [1], [0, 0, 1, 1], [], []>} : vector<32x16xf32>, vector<16x2048xf32>, vector<32x2048xf32> -> vector<32x2048xf32>
    %c0_86 = arith.constant 0 : index
    %c0_87 = arith.constant 0 : index
    %168 = vector.load %arg14[%c0_86, %c0_87] : memref<1x2048xf32, #tpu.memory_space<vmem>>, vector<1x2048xf32>
    %169 = vector.broadcast %168 : vector<1x2048xf32> to vector<32x2048xf32>
    %170 = arith.addf %167, %169 : vector<32x2048xf32>
    %c0_88 = arith.constant 0 : index
    %c0_89 = arith.constant 0 : index
    %171 = vector.load %arg38[%c0_88, %c0_89] : memref<32x2048xf32, #tpu.memory_space<vmem>>, vector<32x2048xf32>
    tpu.vector_store %arg38[%c0_88, %c0_89], %170 {strides = array<i32>} : memref<32x2048xf32, #tpu.memory_space<vmem>>, vector<32x2048xf32>,
    %c0_90 = arith.constant 0 : index
    %c0_91 = arith.constant 0 : index
    %172 = vector.load %arg2[%c0_90, %c0_91] : memref<32x2048xf32, #tpu.memory_space<vmem>>, vector<32x2048xf32>
    %173 = math.exp %170 : vector<32x2048xf32>
    %174 = arith.mulf %172, %173 : vector<32x2048xf32>
    %175 = arith.addf %170, %174 : vector<32x2048xf32>
    %c0_92 = arith.constant 0 : index
    %c0_93 = arith.constant 0 : index
    %176 = vector.load %arg15[%c0_92, %c0_93] : memref<2048x16xf32, #tpu.memory_space<vmem>>, vector<2048x16xf32>
    %cst_94 = arith.constant dense<0.000000e+00> : vector<32x16xf32>
    %177 = tpu.matmul %175, %176, %cst_94 {dimension_numbers = #tpu.dot_dimension_numbers<[1], [0], [0], [1], [0, 0, 1, 1], [], []>} : vector<32x2048xf32>, vector<2048x16xf32>, vector<32x16xf32> -> vector<32x16xf32>
    %c0_95 = arith.constant 0 : index
    %c0_96 = arith.constant 0 : index
    %178 = vector.load %arg16[%c0_95, %c0_96] : memref<1x16xf32, #tpu.memory_space<vmem>>, vector<1x16xf32>
    %179 = vector.broadcast %178 : vector<1x16xf32> to vector<32x16xf32>
    %180 = arith.addf %177, %179 : vector<32x16xf32>
    %cst_97 = arith.constant dense<0.000000e+00> : vector<16xf32>
    %181 = vector.multi_reduction <add>, %180, %cst_97 [0] : vector<32x16xf32> to vector<16xf32>
    %182 = vector.shape_cast %181 : vector<16xf32> to vector<1x16xf32>
    %cst_98 = arith.constant 3.200000e+01 : f32
    %183 = vector.broadcast %cst_98 : f32 to vector<1x16xf32>
    %184 = arith.divf %182, %183 : vector<1x16xf32>
    %185 = arith.mulf %180, %180 : vector<32x16xf32>
    %cst_99 = arith.constant dense<0.000000e+00> : vector<16xf32>
    %186 = vector.multi_reduction <add>, %185, %cst_99 [0] : vector<32x16xf32> to vector<16xf32>
    %187 = vector.shape_cast %186 : vector<16xf32> to vector<1x16xf32>
    %cst_100 = arith.constant 3.200000e+01 : f32
    %188 = vector.broadcast %cst_100 : f32 to vector<1x16xf32>
    %189 = arith.divf %187, %188 : vector<1x16xf32>
    %190 = arith.mulf %184, %184 : vector<1x16xf32>
    %191 = arith.subf %189, %190 : vector<1x16xf32>
    %c0_101 = arith.constant 0 : index
    %c0_102 = arith.constant 0 : index
    %192 = vector.load %arg35[%c0_101, %c0_102] : memref<1x16xf32, #tpu.memory_space<vmem>>, vector<1x16xf32>
    %cst_103 = arith.constant 9.99999974E-6 : f32
    %193 = vector.broadcast %cst_103 : f32 to vector<1x16xf32>
    %194 = arith.addf %191, %193 : vector<1x16xf32>
    %195 = math.rsqrt %194 : vector<1x16xf32>
    %196 = arith.mulf %192, %195 : vector<1x16xf32>
    %c0_104 = arith.constant 0 : index
    %c0_105 = arith.constant 0 : index
    %197 = vector.load %arg36[%c0_104, %c0_105] : memref<1x16xf32, #tpu.memory_space<vmem>>, vector<1x16xf32>
    %198 = arith.mulf %184, %196 : vector<1x16xf32>
    %199 = arith.subf %197, %198 : vector<1x16xf32>
    %200 = vector.broadcast %196 : vector<1x16xf32> to vector<32x16xf32>
    %201 = arith.mulf %180, %200 : vector<32x16xf32>
    %202 = vector.broadcast %199 : vector<1x16xf32> to vector<32x16xf32>
    %203 = arith.addf %201, %202 : vector<32x16xf32>
    %cst_106 = arith.constant 0.000000e+00 : f32
    %204 = vector.broadcast %cst_106 : f32 to vector<32x16xf32>
    %205 = arith.maximumf %203, %204 : vector<32x16xf32>
    %c0_107 = arith.constant 0 : index
    %c0_108 = arith.constant 0 : index
    %206 = vector.load %arg17[%c0_107, %c0_108] : memref<16x12xf32, #tpu.memory_space<vmem>>, vector<16x12xf32>
    %cst_109 = arith.constant dense<0.000000e+00> : vector<32x12xf32>
    %207 = tpu.matmul %205, %206, %cst_109 {dimension_numbers = #tpu.dot_dimension_numbers<[1], [0], [0], [1], [0, 0, 1, 1], [], []>} : vector<32x16xf32>, vector<16x12xf32>, vector<32x12xf32> -> vector<32x12xf32>
    %c0_110 = arith.constant 0 : index
    %c0_111 = arith.constant 0 : index
    %208 = vector.load %arg18[%c0_110, %c0_111] : memref<1x12xf32, #tpu.memory_space<vmem>>, vector<1x12xf32>
    %209 = vector.broadcast %208 : vector<1x12xf32> to vector<32x12xf32>
    %210 = arith.addf %207, %209 : vector<32x12xf32>
    %cst_112 = arith.constant dense<0.000000e+00> : vector<12xf32>
    %211 = vector.multi_reduction <add>, %210, %cst_112 [0] : vector<32x12xf32> to vector<12xf32>
    %212 = vector.shape_cast %211 : vector<12xf32> to vector<1x12xf32>
    %cst_113 = arith.constant 3.200000e+01 : f32
    %213 = vector.broadcast %cst_113 : f32 to vector<1x12xf32>
    %214 = arith.divf %212, %213 : vector<1x12xf32>
    %215 = arith.mulf %210, %210 : vector<32x12xf32>
    %cst_114 = arith.constant dense<0.000000e+00> : vector<12xf32>
    %216 = vector.multi_reduction <add>, %215, %cst_114 [0] : vector<32x12xf32> to vector<12xf32>
    %217 = vector.shape_cast %216 : vector<12xf32> to vector<1x12xf32>
    %cst_115 = arith.constant 3.200000e+01 : f32
    %218 = vector.broadcast %cst_115 : f32 to vector<1x12xf32>
    %219 = arith.divf %217, %218 : vector<1x12xf32>
    %220 = arith.mulf %214, %214 : vector<1x12xf32>
    %221 = arith.subf %219, %220 : vector<1x12xf32>
    %c0_116 = arith.constant 0 : index
    %c0_117 = arith.constant 0 : index
    %222 = vector.load %arg33[%c0_116, %c0_117] : memref<1x12xf32, #tpu.memory_space<vmem>>, vector<1x12xf32>
    %cst_118 = arith.constant 9.99999974E-6 : f32
    %223 = vector.broadcast %cst_118 : f32 to vector<1x12xf32>
    %224 = arith.addf %221, %223 : vector<1x12xf32>
    %225 = math.rsqrt %224 : vector<1x12xf32>
    %226 = arith.mulf %222, %225 : vector<1x12xf32>
    %c0_119 = arith.constant 0 : index
    %c0_120 = arith.constant 0 : index
    %227 = vector.load %arg34[%c0_119, %c0_120] : memref<1x12xf32, #tpu.memory_space<vmem>>, vector<1x12xf32>
    %228 = arith.mulf %214, %226 : vector<1x12xf32>
    %229 = arith.subf %227, %228 : vector<1x12xf32>
    %230 = vector.broadcast %226 : vector<1x12xf32> to vector<32x12xf32>
    %231 = arith.mulf %210, %230 : vector<32x12xf32>
    %232 = vector.broadcast %229 : vector<1x12xf32> to vector<32x12xf32>
    %233 = arith.addf %231, %232 : vector<32x12xf32>
    %cst_121 = arith.constant 0.000000e+00 : f32
    %234 = vector.broadcast %cst_121 : f32 to vector<32x12xf32>
    %235 = arith.maximumf %233, %234 : vector<32x12xf32>
    %cst_122 = arith.constant dense<0.000000e+00> : vector<32x12xf32>
    %236 = tpu.matmul %7, %235, %cst_122 {dimension_numbers = #tpu.dot_dimension_numbers<[1], [0], [0], [1], [0, 0, 1, 1], [], []>} : vector<32x32xf32>, vector<32x12xf32>, vector<32x12xf32> -> vector<32x12xf32>
    %237 = tpu.concatenate %236, %235 in 1 : vector<32x12xf32>, vector<32x12xf32> -> vector<32x24xf32>
    %c0_123 = arith.constant 0 : index
    %c0_124 = arith.constant 0 : index
    %238 = vector.load %arg19[%c0_123, %c0_124] : memref<24x16xf32, #tpu.memory_space<vmem>>, vector<24x16xf32>
    %cst_125 = arith.constant dense<0.000000e+00> : vector<32x16xf32>
    %239 = tpu.matmul %237, %238, %cst_125 {dimension_numbers = #tpu.dot_dimension_numbers<[1], [0], [0], [1], [0, 0, 1, 1], [], []>} : vector<32x24xf32>, vector<24x16xf32>, vector<32x16xf32> -> vector<32x16xf32>
    %c0_126 = arith.constant 0 : index
    %c0_127 = arith.constant 0 : index
    %240 = vector.load %arg20[%c0_126, %c0_127] : memref<1x16xf32, #tpu.memory_space<vmem>>, vector<1x16xf32>
    %241 = vector.broadcast %240 : vector<1x16xf32> to vector<32x16xf32>
    %242 = arith.addf %239, %241 : vector<32x16xf32>
    %cst_128 = arith.constant dense<0.000000e+00> : vector<16xf32>
    %243 = vector.multi_reduction <add>, %242, %cst_128 [0] : vector<32x16xf32> to vector<16xf32>
    %244 = vector.shape_cast %243 : vector<16xf32> to vector<1x16xf32>
    %cst_129 = arith.constant 3.200000e+01 : f32
    %245 = vector.broadcast %cst_129 : f32 to vector<1x16xf32>
    %246 = arith.divf %244, %245 : vector<1x16xf32>
    %247 = arith.mulf %242, %242 : vector<32x16xf32>
    %cst_130 = arith.constant dense<0.000000e+00> : vector<16xf32>
    %248 = vector.multi_reduction <add>, %247, %cst_130 [0] : vector<32x16xf32> to vector<16xf32>
    %249 = vector.shape_cast %248 : vector<16xf32> to vector<1x16xf32>
    %cst_131 = arith.constant 3.200000e+01 : f32
    %250 = vector.broadcast %cst_131 : f32 to vector<1x16xf32>
    %251 = arith.divf %249, %250 : vector<1x16xf32>
    %252 = arith.mulf %246, %246 : vector<1x16xf32>
    %253 = arith.subf %251, %252 : vector<1x16xf32>
    %c0_132 = arith.constant 0 : index
    %c0_133 = arith.constant 0 : index
    %254 = vector.load %arg31[%c0_132, %c0_133] : memref<1x16xf32, #tpu.memory_space<vmem>>, vector<1x16xf32>
    %cst_134 = arith.constant 9.99999974E-6 : f32
    %255 = vector.broadcast %cst_134 : f32 to vector<1x16xf32>
    %256 = arith.addf %253, %255 : vector<1x16xf32>
    %257 = math.rsqrt %256 : vector<1x16xf32>
    %258 = arith.mulf %254, %257 : vector<1x16xf32>
    %c0_135 = arith.constant 0 : index
    %c0_136 = arith.constant 0 : index
    %259 = vector.load %arg32[%c0_135, %c0_136] : memref<1x16xf32, #tpu.memory_space<vmem>>, vector<1x16xf32>
    %260 = arith.mulf %246, %258 : vector<1x16xf32>
    %261 = arith.subf %259, %260 : vector<1x16xf32>
    %262 = vector.broadcast %258 : vector<1x16xf32> to vector<32x16xf32>
    %263 = arith.mulf %242, %262 : vector<32x16xf32>
    %264 = vector.broadcast %261 : vector<1x16xf32> to vector<32x16xf32>
    %265 = arith.addf %263, %264 : vector<32x16xf32>
    %cst_137 = arith.constant 0.000000e+00 : f32
    %266 = vector.broadcast %cst_137 : f32 to vector<32x16xf32>
    %267 = arith.maximumf %265, %266 : vector<32x16xf32>
    %cst_138 = arith.constant dense<0.000000e+00> : vector<32x16xf32>
    %268 = tpu.matmul %7, %267, %cst_138 {dimension_numbers = #tpu.dot_dimension_numbers<[1], [0], [0], [1], [0, 0, 1, 1], [], []>} : vector<32x32xf32>, vector<32x16xf32>, vector<32x16xf32> -> vector<32x16xf32>
    %269 = tpu.concatenate %268, %267 in 1 : vector<32x16xf32>, vector<32x16xf32> -> vector<32x32xf32>
    %c0_139 = arith.constant 0 : index
    %c0_140 = arith.constant 0 : index
    %270 = vector.load %arg21[%c0_139, %c0_140] : memref<32x24xf32, #tpu.memory_space<vmem>>, vector<32x24xf32>
    %cst_141 = arith.constant dense<0.000000e+00> : vector<32x24xf32>
    %271 = tpu.matmul %269, %270, %cst_141 {dimension_numbers = #tpu.dot_dimension_numbers<[1], [0], [0], [1], [0, 0, 1, 1], [], []>} : vector<32x32xf32>, vector<32x24xf32>, vector<32x24xf32> -> vector<32x24xf32>
    %c0_142 = arith.constant 0 : index
    %c0_143 = arith.constant 0 : index
    %272 = vector.load %arg22[%c0_142, %c0_143] : memref<1x24xf32, #tpu.memory_space<vmem>>, vector<1x24xf32>
    %273 = vector.broadcast %272 : vector<1x24xf32> to vector<32x24xf32>
    %274 = arith.addf %271, %273 : vector<32x24xf32>
    %cst_144 = arith.constant dense<0.000000e+00> : vector<24xf32>
    %275 = vector.multi_reduction <add>, %274, %cst_144 [0] : vector<32x24xf32> to vector<24xf32>
    %276 = vector.shape_cast %275 : vector<24xf32> to vector<1x24xf32>
    %cst_145 = arith.constant 3.200000e+01 : f32
    %277 = vector.broadcast %cst_145 : f32 to vector<1x24xf32>
    %278 = arith.divf %276, %277 : vector<1x24xf32>
    %279 = arith.mulf %274, %274 : vector<32x24xf32>
    %cst_146 = arith.constant dense<0.000000e+00> : vector<24xf32>
    %280 = vector.multi_reduction <add>, %279, %cst_146 [0] : vector<32x24xf32> to vector<24xf32>
    %281 = vector.shape_cast %280 : vector<24xf32> to vector<1x24xf32>
    %cst_147 = arith.constant 3.200000e+01 : f32
    %282 = vector.broadcast %cst_147 : f32 to vector<1x24xf32>
    %283 = arith.divf %281, %282 : vector<1x24xf32>
    %284 = arith.mulf %278, %278 : vector<1x24xf32>
    %285 = arith.subf %283, %284 : vector<1x24xf32>
    %c0_148 = arith.constant 0 : index
    %c0_149 = arith.constant 0 : index
    %286 = vector.load %arg29[%c0_148, %c0_149] : memref<1x24xf32, #tpu.memory_space<vmem>>, vector<1x24xf32>
    %cst_150 = arith.constant 9.99999974E-6 : f32
    %287 = vector.broadcast %cst_150 : f32 to vector<1x24xf32>
    %288 = arith.addf %285, %287 : vector<1x24xf32>
    %289 = math.rsqrt %288 : vector<1x24xf32>
    %290 = arith.mulf %286, %289 : vector<1x24xf32>
    %c0_151 = arith.constant 0 : index
    %c0_152 = arith.constant 0 : index
    %291 = vector.load %arg30[%c0_151, %c0_152] : memref<1x24xf32, #tpu.memory_space<vmem>>, vector<1x24xf32>
    %292 = arith.mulf %278, %290 : vector<1x24xf32>
    %293 = arith.subf %291, %292 : vector<1x24xf32>
    %294 = vector.broadcast %290 : vector<1x24xf32> to vector<32x24xf32>
    %295 = arith.mulf %274, %294 : vector<32x24xf32>
    %296 = vector.broadcast %293 : vector<1x24xf32> to vector<32x24xf32>
    %297 = arith.addf %295, %296 : vector<32x24xf32>
    %cst_153 = arith.constant 0.000000e+00 : f32
    %298 = vector.broadcast %cst_153 : f32 to vector<32x24xf32>
    %299 = arith.maximumf %297, %298 : vector<32x24xf32>
    %cst_154 = arith.constant dense<0.000000e+00> : vector<32x24xf32>
    %300 = tpu.matmul %7, %299, %cst_154 {dimension_numbers = #tpu.dot_dimension_numbers<[1], [0], [0], [1], [0, 0, 1, 1], [], []>} : vector<32x32xf32>, vector<32x24xf32>, vector<32x24xf32> -> vector<32x24xf32>
    %301 = tpu.concatenate %300, %299 in 1 : vector<32x24xf32>, vector<32x24xf32> -> vector<32x48xf32>
    %c0_155 = arith.constant 0 : index
    %c0_156 = arith.constant 0 : index
    %302 = vector.load %arg23[%c0_155, %c0_156] : memref<48x32xf32, #tpu.memory_space<vmem>>, vector<48x32xf32>
    %cst_157 = arith.constant dense<0.000000e+00> : vector<32x32xf32>
    %303 = tpu.matmul %301, %302, %cst_157 {dimension_numbers = #tpu.dot_dimension_numbers<[1], [0], [0], [1], [0, 0, 1, 1], [], []>} : vector<32x48xf32>, vector<48x32xf32>, vector<32x32xf32> -> vector<32x32xf32>
    %c0_158 = arith.constant 0 : index
    %c0_159 = arith.constant 0 : index
    %304 = vector.load %arg24[%c0_158, %c0_159] : memref<1x32xf32, #tpu.memory_space<vmem>>, vector<1x32xf32>
    %305 = vector.broadcast %304 : vector<1x32xf32> to vector<32x32xf32>
    %306 = arith.addf %303, %305 : vector<32x32xf32>
    %cst_160 = arith.constant dense<0.000000e+00> : vector<32xf32>
    %307 = vector.multi_reduction <add>, %306, %cst_160 [0] : vector<32x32xf32> to vector<32xf32>
    %308 = vector.shape_cast %307 : vector<32xf32> to vector<1x32xf32>
    %cst_161 = arith.constant 3.200000e+01 : f32
    %309 = vector.broadcast %cst_161 : f32 to vector<1x32xf32>
    %310 = arith.divf %308, %309 : vector<1x32xf32>
    %311 = arith.mulf %306, %306 : vector<32x32xf32>
    %cst_162 = arith.constant dense<0.000000e+00> : vector<32xf32>
    %312 = vector.multi_reduction <add>, %311, %cst_162 [0] : vector<32x32xf32> to vector<32xf32>
    %313 = vector.shape_cast %312 : vector<32xf32> to vector<1x32xf32>
    %cst_163 = arith.constant 3.200000e+01 : f32
    %314 = vector.broadcast %cst_163 : f32 to vector<1x32xf32>
    %315 = arith.divf %313, %314 : vector<1x32xf32>
    %316 = arith.mulf %310, %310 : vector<1x32xf32>
    %317 = arith.subf %315, %316 : vector<1x32xf32>
    %c0_164 = arith.constant 0 : index
    %c0_165 = arith.constant 0 : index
    %318 = vector.load %arg27[%c0_164, %c0_165] : memref<1x32xf32, #tpu.memory_space<vmem>>, vector<1x32xf32>
    %cst_166 = arith.constant 9.99999974E-6 : f32
    %319 = vector.broadcast %cst_166 : f32 to vector<1x32xf32>
    %320 = arith.addf %317, %319 : vector<1x32xf32>
    %321 = math.rsqrt %320 : vector<1x32xf32>
    %322 = arith.mulf %318, %321 : vector<1x32xf32>
    %c0_167 = arith.constant 0 : index
    %c0_168 = arith.constant 0 : index
    %323 = vector.load %arg28[%c0_167, %c0_168] : memref<1x32xf32, #tpu.memory_space<vmem>>, vector<1x32xf32>
    %324 = arith.mulf %310, %322 : vector<1x32xf32>
    %325 = arith.subf %323, %324 : vector<1x32xf32>
    %326 = vector.broadcast %322 : vector<1x32xf32> to vector<32x32xf32>
    %327 = arith.mulf %306, %326 : vector<32x32xf32>
    %328 = vector.broadcast %325 : vector<1x32xf32> to vector<32x32xf32>
    %329 = arith.addf %327, %328 : vector<32x32xf32>
    %cst_169 = arith.constant 0.000000e+00 : f32
    %330 = vector.broadcast %cst_169 : f32 to vector<32x32xf32>
    %331 = arith.maximumf %329, %330 : vector<32x32xf32>
    %cst_170 = arith.constant dense<0.000000e+00> : vector<32x32xf32>
    %332 = tpu.matmul %7, %331, %cst_170 {dimension_numbers = #tpu.dot_dimension_numbers<[1], [0], [0], [1], [0, 0, 1, 1], [], []>} : vector<32x32xf32>, vector<32x32xf32>, vector<32x32xf32> -> vector<32x32xf32>
    %333 = tpu.concatenate %332, %331 in 1 : vector<32x32xf32>, vector<32x32xf32> -> vector<32x64xf32>
    %c0_171 = arith.constant 0 : index
    %c0_172 = arith.constant 0 : index
    %334 = vector.load %arg25[%c0_171, %c0_172] : memref<64x8xf32, #tpu.memory_space<vmem>>, vector<64x8xf32>
    %cst_173 = arith.constant dense<0.000000e+00> : vector<32x8xf32>
    %335 = tpu.matmul %333, %334, %cst_173 {dimension_numbers = #tpu.dot_dimension_numbers<[1], [0], [0], [1], [0, 0, 1, 1], [], []>} : vector<32x64xf32>, vector<64x8xf32>, vector<32x8xf32> -> vector<32x8xf32>
    %c0_174 = arith.constant 0 : index
    %c0_175 = arith.constant 0 : index
    %336 = vector.load %arg26[%c0_174, %c0_175] : memref<1x8xf32, #tpu.memory_space<vmem>>, vector<1x8xf32>
    %337 = vector.broadcast %336 : vector<1x8xf32> to vector<32x8xf32>
    %338 = arith.addf %335, %337 : vector<32x8xf32>
    %c0_176 = arith.constant 0 : index
    %c0_177 = arith.constant 0 : index
    %339 = vector.load %arg37[%c0_176, %c0_177] : memref<32x8xf32, #tpu.memory_space<vmem>>, vector<32x8xf32>
    tpu.vector_store %arg37[%c0_176, %c0_177], %338 {strides = array<i32>} : memref<32x8xf32, #tpu.memory_space<vmem>>, vector<32x8xf32>,
    return
  }
}

</mosaic_0001>

<bundles_post_ra>
// kernel: tpu_custom_call.1
= control target key start
LH: loop header
LB: loop body
LE: loop exit
PB: predicated region body
PF: predicated region fallthrough
CT: control target
= control target key end

     0   :  { %s3940_s6 = smov 1   ;;  %s3941_s10 = smov 2   ;;  %s5558_s0 = inlined_call_operand.smem [shape: u32[39], index: -1, kind: input, shape index: {}] }
   0x1   :  { %s3995_s5 = sld [smem:[%s5558_s0]]   ;;  %s3942_s14 = smov 3  }
   0x2   :  { %s4000_s9 = sld [smem:[%s5558_s0 + %s3940_s6]]   ;;  %s3943_s18 = smov 4  }
   0x3   :  { %s4005_s13 = sld [smem:[%s5558_s0 + %s3941_s10]]   ;;  %s3944_s22 = smov 5  }
   0x4   :  { %s4010_s17 = sld [smem:[%s5558_s0 + %s3942_s14]]   ;;  %s3945_s26 = smov 6  }
   0x5   :  { %s4015_s21 = sld [smem:[%s5558_s0 + %s3943_s18]]   ;;  %s3946_s30 = smov 7  }
   0x6   :  { %s4020_s25 = sld [smem:[%s5558_s0 + %s3944_s22]]   ;;  %s3947_s4 = smov 8  }
   0x7   :  { %s4025_s29 = sld [smem:[%s5558_s0 + %s3945_s26]]   ;;  %s3948_s10 = smov 9  }
   0x8   :  { %s4030_s3 = sld [smem:[%s5558_s0 + %s3946_s30]]   ;;  %s3949_s15 = smov 10  }
   0x9   :  { %5572 = sst [smem:[#allocation5_spill]] %s4005_s13  ;;  %s3950_s20 = smov 11  }
   0xa   :  { %s4035_s8 = sld [smem:[%s5558_s0 + %s3947_s4]]   ;;  %s3951_s26 = smov 12  }
   0xb   :  { %s4040_s14 = sld [smem:[%s5558_s0 + %s3948_s10]]   ;;  %s3952_s1 = smov 13  }
   0xc   :  { %s4045_s19 = sld [smem:[%s5558_s0 + %s3949_s15]]   ;;  %s3953_s7 = smov 14  }
   0xd   :  { %s4050_s24 = sld [smem:[%s5558_s0 + %s3950_s20]]   ;;  %s3954_s15 = smov 15  }
   0xe   :  { %s4055_s30 = sld [smem:[%s5558_s0 + %s3951_s26]]   ;;  %s3955_s22 = smov 16  }
   0xf   :  { %s4060_s6 = sld [smem:[%s5558_s0 + %s3952_s1]]   ;;  %s3956_s28 = smov 17  }
  0x10   :  { %s4065_s12 = sld [smem:[%s5558_s0 + %s3953_s7]]   ;;  %s3957_s7 = smov 18  }
  0x11   :  { %5573 = sst [smem:[#allocation6_spill]] %s4040_s14 }
  0x12   :  { %5574 = sst [smem:[#allocation7_spill]] %s4045_s19 }
  0x13   :  { %5575 = sst [smem:[#allocation8_spill]] %s4050_s24 }
  0x14   :  { %5576 = sst [smem:[#allocation9_spill]] %s4055_s30 }
  0x15   :  { %5577 = sst [smem:[#allocation10_spill]] %s4060_s6 }
  0x16   :  { %5578 = sst [smem:[#allocation11_spill]] %s4065_s12 }
  0x17   :  { %s4070_s20 = sld [smem:[%s5558_s0 + %s3954_s15]]   ;;  %s3958_s15 = smov 19  }
  0x18   :  { %s4075_s27 = sld [smem:[%s5558_s0 + %s3955_s22]]   ;;  %s3959_s22 = smov 20  }
  0x19   :  { %s4080_s4 = sld [smem:[%s5558_s0 + %s3956_s28]]   ;;  %s3960_s28 = smov 21  }
  0x1a   :  { %s4085_s13 = sld [smem:[%s5558_s0 + %s3957_s7]]   ;;  %s3961_s7 = smov 22  }
  0x1b   :  { %s4090_s12 = sld [smem:[%s5558_s0 + %s3958_s15]]   ;;  %s3962_s15 = smov 23  }
  0x1d   :  { %5579 = sst [smem:[#allocation12_spill]] %s4070_s20 }
  0x1e   :  { %5580 = sst [smem:[#allocation13_spill]] %s4075_s27 }
  0x1f   :  { %5581 = sst [smem:[#allocation14_spill]] %s4080_s4 }
  0x20   :  { %5582 = sst [smem:[#allocation15_spill]] %s4085_s13 }
  0x21   :  { %5583 = sst [smem:[#allocation16_spill]] %s4090_s12 }
  0x22   :  { %s4095_s27 = sld [smem:[%s5558_s0 + %s3959_s22]]   ;;  %s3963_s22 = smov 24  }
  0x23   :  { %s4100_s4 = sld [smem:[%s5558_s0 + %s3960_s28]]   ;;  %s3964_s28 = smov 25  }
  0x24   :  { %s4105_s13 = sld [smem:[%s5558_s0 + %s3961_s7]]   ;;  %s3965_s7 = smov 26  }
  0x25   :  { %s4110_s12 = sld [smem:[%s5558_s0 + %s3962_s15]]   ;;  %s3966_s15 = smov 27  }
  0x28   :  { %5584 = sst [smem:[#allocation17_spill]] %s4095_s27 }
  0x29   :  { %5585 = sst [smem:[#allocation18_spill]] %s4100_s4 }
  0x2a   :  { %5586 = sst [smem:[#allocation19_spill]] %s4105_s13 }
  0x2b   :  { %5587 = sst [smem:[#allocation20_spill]] %s4110_s12 }
  0x2c   :  { %s4115_s27 = sld [smem:[%s5558_s0 + %s3963_s22]]   ;;  %s3967_s22 = smov 28  }
  0x2d   :  { %s4120_s4 = sld [smem:[%s5558_s0 + %s3964_s28]]   ;;  %s3968_s28 = smov 29  }
  0x2e   :  { %s4125_s13 = sld [smem:[%s5558_s0 + %s3965_s7]]   ;;  %s3969_s7 = smov 30  }
  0x2f   :  { %s4130_s12 = sld [smem:[%s5558_s0 + %s3966_s15]]   ;;  %s3970_s15 = smov 31  }
  0x30   :  { %s4150_s20 = sld [smem:[%s5558_s0 + %s3970_s15]]   ;;  %s3974_s15 = smov 35  }
  0x31   :  { %s4170_s19 = sld [smem:[%s5558_s0 + %s3974_s15]]  }
  0x32   :  { %5588 = sst [smem:[#allocation21_spill]] %s4115_s27 }
  0x33   :  { %5589 = sst [smem:[#allocation22_spill]] %s4120_s4 }
  0x34   :  { %5590 = sst [smem:[#allocation23_spill]] %s4125_s13 }
  0x35   :  { %s4135_s27 = sld [smem:[%s5558_s0 + %s3967_s22]]   ;;  %s3971_s22 = smov 32  }
  0x36   :  { %s4140_s4 = sld [smem:[%s5558_s0 + %s3968_s28]]   ;;  %s3972_s28 = smov 33  }
  0x37   :  { %s4145_s13 = sld [smem:[%s5558_s0 + %s3969_s7]]   ;;  %s3973_s7 = smov 34  }
  0x38   :  { %s4155_s6 = sld [smem:[%s5558_s0 + %s3971_s22]]   ;;  %s3975_s22 = smov 36  }
  0x39   :  { %s4160_s30 = sld [smem:[%s5558_s0 + %s3972_s28]]   ;;  %s3976_s28 = smov 37  }
  0x3a   :  { %s4165_s24 = sld [smem:[%s5558_s0 + %s3973_s7]]   ;;  %s3977_s7 = smov 38  }
  0x3b   :  { %s4175_s14 = sld [smem:[%s5558_s0 + %s3975_s22]]  }
  0x3f   :  { %5591 = sst [smem:[#allocation24_spill]] %s4160_s30 }
  0x40   :  { %5592 = sst [smem:[#allocation25_spill]] %s4165_s24 }
  0x41   :  { %s4180_s30 = sld [smem:[%s5558_s0 + %s3976_s28]]  }
  0x42   :  { %s4185_s24 = sld [smem:[%s5558_s0 + %s3977_s7]]  }
  0x43   :  { %v4188_v0 = vld [vmem:[%s4000_s9 + $0x18] sm:$0xff]  ;;  %vm166_vm0 = vcmask 261120   ;;  %v4191_v1 = vld [vmem:[%s4000_s9 + $0x10] sm:$0xff]  ;;  %v4198_v4 = vld [vmem:[%s4000_s9 + $0x8] sm:$0xff] }
  0x44   :  { %v176_v2 = vsel %vm166_vm0, %v4188_v0, 0.0  ;;  %v173_v3 = vsel %vm166_vm0, %v4191_v1, 0.0  ;;  %v4201_v5 = vld [vmem:[%s4000_s9] sm:$0xff] }
  0x45   :  { %177 = vadd.xlane.f32.xlu1 %v176_v2  ;;  %174 = vadd.xlane.f32.xlu0 %v173_v3 }
  0x46   :  { %83 = vsyncpa [#allocation3], 0  ;;  %v170_v6 = vsel %vm166_vm0, %v4198_v4, 0.0  ;;  %v167_v7 = vsel %vm166_vm0, %v4201_v5, 0.0  ;;  %v161_v8 = vld [vmem:[%s3995_s5 + $0x18] sm:$0xff]  ;;  %v160_v9 = vld [vmem:[%s3995_s5 + $0x10] sm:$0xff] }
  0x47   :  { %3692 = vmatpush.msra.mxu2 %v161_v8  ;;  %267 = vmatpush.msra.mxu0 %v161_v8  ;;  %s3978_s0 = smov 8   ;;  %v159_v10 = vld [vmem:[%s3995_s5 + $0x8] sm:$0xff]  ;;  %v158_v11 = vld [vmem:[%s3995_s5] sm:$0xff]  ;;  %s3980_s5 = smov 32  }
  0x48   :  { %292 = vrot.lane.b32.xlu2 %v160_v9, %s3978_s0  ;;  %s3981_s9 = smov 24   ;;  %s5598_s15 = sld [smem:[#allocation9_spill]] }
  0x49   :  { %3693 = vmatpush.msra.mxu2 %v160_v9  ;;  %268 = vmatpush.msra.mxu0 %v160_v9  ;;  %s5599_s16 = sld [smem:[#allocation10_spill]]  ;;  %s3503_s10 = sshll.u32 %s4185_s24, 4  ;;  %s3504_s10 = int_to_ptr.hbm [resolvable:$true] %s3503_s10 }
  0x4a   :  { %s5600_s18 = sld [smem:[#allocation12_spill]]  ;;  %s3926_s11 = sshra.s32 %s3504_s10, 4  ;;  %s3927_s11 = int_to_ptr.hbm [resolvable:$true] %s3926_s11 }
  0x4b   :  { %3694 = vmatpush.msra.mxu2 %v159_v10  ;;  %269 = vmatpush.msra.mxu0 %v159_v10  ;;  %s5601_s22 = sld [smem:[#allocation11_spill]]  ;;  %p3931_p1 = scmp.lt.s32.totalorder %s3927_s11, %s4185_s24 }
  0x4c   :  { %s5602_s23 = sld [smem:[#allocation5_spill]] }
  0x4d   :  { %171 = vadd.xlane.f32.xlu1 %v170_v6  ;;  %168 = vadd.xlane.f32.xlu0 %v167_v7  ;;  %s5603_s26 = sld [smem:[#allocation13_spill]] }
  0x4e   :  { %3695 = vmatpush.msra.mxu2 %v158_v11  ;;  %270 = vmatpush.msra.mxu0 %v158_v11  ;;  %s5604_s28 = sld [smem:[#allocation14_spill]] }
  0x4f   :  { %s5605_s1 = sld [smem:[#allocation15_spill]] }
  0x50   :  { %288 = vrot.lane.b32.xlu2 %v158_v11, %s3978_s0  ;;  %s5607_s2 = sld [smem:[#allocation17_spill]] }
  0x61   :  { %294 = vrot.lane.b32.xlu0 %v161_v8, %s3978_s0 }
  0x66   :  { %290 = vrot.lane.b32.xlu1 %v159_v10, %s3978_s0  ;;  %s3928_s0 = scalar_lea.hbm %s3927_s11, 512 }
  0x67   :  { %p3929_p0 = scmp.ne.s32.totalorder %s3927_s11, %s3928_s0 }
  0xa2   :  { %v293_v2 = vpop.permute.xlu2 %292 }
  0xb8   :  { %v178_v12 = vpop.xlane.xlu1 %177  ;;  %v175_v13 = vpop.xlane.xlu0 %174 }
  0xb9   :  { %v182_v14 = vmax.f32 %v178_v12, 1.0  ;;  %v181_v15 = vmax.f32 %v175_v13, 1.0 }
  0xbb   :  { %3756 = vrcp.f32 %v182_v14  ;;  %v222_v26 = vand.u32 2147483647, %v181_v15  ;;  %v224_v27 = vand.u32 2147483648, %v181_v15  ;;  %vm218_vm2 = vweird.f32 %v181_v15 }
  0xbc   :  { %3758 = vrcp.f32 %v181_v15  ;;  %vm233_vm3 = vweird.f32 %v182_v14  ;;  %v239_v38 = vand.u32 2147483648, %v182_v14  ;;  %v237_v41 = vand.u32 2147483647, %v182_v14 }
  0xbd   :  { %vm223_vm5 = vcmp.eq.f32.partialorder %v222_v26, 8.507059e+37  ;;  %v225_v33 = vor.u32 1.1754944e-38, %v224_v27 }
  0xbe   :  { %v240_v49 = vor.u32 1.1754944e-38, %v239_v38  ;;  %vm238_vm9 = vcmp.eq.f32.partialorder %v237_v41, 8.507059e+37 }
  0xc0   :  { %v172_v16 = vpop.xlane.xlu1 %171  ;;  %v169_v17 = vpop.xlane.xlu0 %168 }
  0xc1   :  { %v3757_v18 = vpop.eup %3756  ;;  %v4211_v19 = vmax.f32 %v172_v16, 1.0  ;;  %v179_v20 = vmax.f32 %v169_v17, 1.0  ;;  %v3979_v16 = vmov 32.0  }
  0xc2   :  { %v3759_v21 = vpop.eup %3758  ;;  %v229_v22 = vmul.f32 %v3757_v18, %v182_v14  ;;  %vm234_vm6 = vweird.f32 %v3757_v18 }
  0xc3   :  { %v214_v23 = vmul.f32 %v3759_v21, %v181_v15  ;;  %3760 = vrcp.f32 %v4211_v19  ;;  %vm219_vm1 = vweird.f32 %v3759_v21  ;;  %vm235_vm7 = vmor %vm233_vm3, %vm234_vm6  ;;  %v192_v44 = vand.u32 2147483647, %v179_v20  ;;  %v3745_v15 = vld [vmem:[%s4015_s21] ss:$0 sm:$0xff]  ;;  %s3982_s21 = smov 16  }
  0xc4   :  { %v230_v24 = vsub.f32 1.0, %v229_v22  ;;  %3762 = vrcp.f32 %v179_v20  ;;  %vm220_vm4 = vmor %vm218_vm2, %vm219_vm1  ;;  %v194_v45 = vand.u32 2147483648, %v179_v20  ;;  %vm188_vm10 = vweird.f32 %v179_v20 }
  0xc5   :  { %v215_v25 = vsub.f32 1.0, %v214_v23  ;;  %vm203_vm11 = vweird.f32 %v4211_v19  ;;  %vm193_vm14 = vcmp.eq.f32.partialorder %v192_v44, 8.507059e+37  ;;  %v209_v55 = vand.u32 2147483648, %v4211_v19 }
  0xc6   :  { %v231_v28 = vmul.f32 %v3757_v18, %v230_v24  ;;  %v195_v52 = vor.u32 1.1754944e-38, %v194_v45  ;;  %v207_v58 = vand.u32 2147483647, %v4211_v19  ;;  %vm300_vm2 = vcmask 64512  }
  0xc7   :  { %v216_v29 = vmul.f32 %v3759_v21, %v215_v25  ;;  %v210_v61 = vor.u32 1.1754944e-38, %v209_v55  ;;  %vm311_vm3 = vcmask 130048   ;;  %3764 = vrcp.f32 %v3979_v16 }
  0xc8   :  { %v232_v35 = vadd.f32 %v3757_v18, %v231_v28  ;;  %vm208_vm1 = vcmp.eq.f32.partialorder %v207_v58, 8.507059e+37 }
  0xc9   :  { %v3761_v30 = vpop.eup %3760  ;;  %v217_v31 = vadd.f32 %v3759_v21, %v216_v29 }
  0xca   :  { %v3763_v32 = vpop.eup %3762  ;;  %v199_v34 = vmul.f32 %v3761_v30, %v4211_v19  ;;  %v236_v46 = vsel %vm235_vm7, %v3757_v18, %v232_v35  ;;  %vm204_vm13 = vweird.f32 %v3761_v30 }
  0xcb   :  { %v221_v36 = vsel %vm220_vm4, %v3759_v21, %v217_v31  ;;  %v184_v37 = vmul.f32 %v3763_v32, %v179_v20  ;;  %vm189_vm8 = vweird.f32 %v3763_v32  ;;  %v241_v51 = vsel %vm238_vm9, %v240_v49, %v236_v46  ;;  %vm205_vm15 = vmor %vm203_vm11, %vm204_vm13 }
  0xcc   :  { %v226_v39 = vsel %vm223_vm5, %v225_v33, %v221_v36  ;;  %v200_v40 = vsub.f32 1.0, %v199_v34  ;;  %vm190_vm12 = vmor %vm188_vm10, %vm189_vm8  ;;  %v4224_v57 = vmul.f32 %v241_v51, %v4188_v0  ;;  %v306_v0 = vld [vmem:[%s4010_s17 + $0x8] sm:$0xff]  ;;  %vm489_vm8 = vcmask 523264  }
  0xcd   :  { %v4216_v42 = vmul.f32 %v226_v39, %v4191_v1  ;;  %v185_v43 = vsub.f32 1.0, %v184_v37  ;;  %3696 = vmatpush.msra.mxu3 %v306_v0  ;;  %338 = vmatpush.msra.mxu1 %v306_v0  ;;  %v305_v1 = vld [vmem:[%s4010_s17] sm:$0xff]  ;;  %v3765_v19 = vpop.eup %3764  ;;  %vm531_vm9 = vcmask 195584   ;;  %vm659_vm13 = vcmask 392192   ;;  %s5593_s17 = sld [smem:[#allocation6_spill]] }
  0xce   :  { %v201_v47 = vmul.f32 %v3761_v30, %v200_v40  ;;  %v367_v24 = vmul.f32 32.0, %v3765_v19  ;;  %vm371_vm4 = vweird.f32 %v3765_v19 }
  0xcf   :  { %v186_v48 = vmul.f32 %v3763_v32, %v185_v43  ;;  %3557 = vmatmul.msk.f32.vlgmr.msra.gmra.mxu2 %vm166_vm0, %v4216_v42  ;;  %3697 = vmatpush.msra.mxu3 %v305_v1 }
  0xd0   :  { %v202_v53 = vadd.f32 %v3761_v30, %v201_v47  ;;  %339 = vmatpush.msra.mxu1 %v305_v1  ;;  %v368_v39 = vsub.f32 1.0, %v367_v24 }
  0xd1   :  { %v187_v50 = vadd.f32 %v3763_v32, %v186_v48 }
  0xd2   :  { %v206_v60 = vsel %vm205_vm15, %v3761_v30, %v202_v53  ;;  %v369_v47 = vmul.f32 %v3765_v19, %v368_v39 }
  0xd3   :  { %v191_v54 = vsel %vm190_vm12, %v3763_v32, %v187_v50  ;;  %v211_v62 = vsel %vm208_vm1, %v210_v61, %v206_v60  ;;  %v295_v8 = vpop.permute.xlu0 %294 }
  0xd4   :  { %v196_v56 = vsel %vm193_vm14, %v195_v52, %v191_v54  ;;  %v4235_v63 = vmul.f32 %v211_v62, %v4198_v4  ;;  %v370_v52 = vadd.f32 %v3765_v19, %v369_v47 }
  0xd5   :  { %v4228_v59 = vmul.f32 %v196_v56, %v4201_v5  ;;  %v289_v5 = vpop.permute.xlu2 %288 }
  0xd6   :  { %v4273_v58 = vsel %vm371_vm4, %v3765_v19, %v370_v52  ;;  %vm867_vm4 = vcmask 97280  }
  0xd7   :  { %3555 = vmatmul.msk.f32.vlgmr.msra.gmra.mxu0 %vm166_vm0, %v4228_v59  ;;  %3558 = vmatmul.msk.f32.gmra.mxu2 %vm166_vm0, %v4224_v57 }
  0xd8   :  { %v291_v10 = vpop.permute.xlu1 %290 }
  0xdf   :  { %3556 = vmatmul.msk.f32.gmra.mxu0 %vm166_vm0, %v4235_v63 }
 0x152   :  { %v278_v3 = vpop.f32.mrf.mxu2 }
 0x153   :  { %v303_v6 = vsel %vm300_vm2, %v278_v3, %v293_v2 }
 0x154   :  { %v272_v7 = vpop.f32.mrf.mxu0  ;;  %3561 = vmatmul.msk.f32.vlgmr.msra.gmra.mxu3 %vm311_vm3, %v303_v6 }
 0x155   :  { %v301_v4 = vsel %vm300_vm2, %v272_v7, %v289_v5 }
 0x156   :  { %3559 = vmatmul.msk.f32.vlgmr.msra.gmra.mxu1 %vm311_vm3, %v301_v4 }
 0x15a   :  { %v281_v9 = vpop.f32.mrf.mxu2 }
 0x15b   :  { %v304_v11 = vsel %vm300_vm2, %v281_v9, %v295_v8 }
 0x15c   :  { %v275_v12 = vpop.f32.mrf.mxu0  ;;  %3562 = vmatmul.msk.f32.gmra.mxu3 %vm311_vm3, %v304_v11 }
 0x15d   :  { %v302_v13 = vsel %vm300_vm2, %v275_v12, %v291_v10  ;;  %v394_v10 = vld [vmem:[%s4130_s12] sm:$0x1] }
 0x15e   :  { %3560 = vmatmul.msk.f32.gmra.mxu1 %vm311_vm3, %v302_v13 }
 0x1d3   :  { %v341_v14 = vpop.f32.mrf.mxu1 }
 0x1d4   :  { %v4250_v18 = vadd.f32 %v3745_v15, %v341_v14  ;;  %v407_v14 = vld [vmem:[%s4135_s27] sm:$0x1] }
 0x1d6   :  { %v374_v22 = vmul.f32 %v4250_v18, %v4250_v18  ;;  %v353_v25 = vsel %vm166_vm0, %v4250_v18, 0.0 }
 0x1d7   :  { %v347_v17 = vpop.f32.mrf.mxu3 }
 0x1d8   :  { %v4252_v20 = vadd.f32 %v3745_v15, %v347_v17  ;;  %v378_v31 = vsel %vm166_vm0, %v374_v22, 0.0 }
 0x1da   :  { %v376_v26 = vmul.f32 %v4252_v20, %v4252_v20  ;;  %v356_v32 = vsel %vm166_vm0, %v4252_v20, 0.0 }
 0x1db   :  { %v344_v21 = vpop.f32.mrf.mxu1 }
 0x1dc   :  { %v4256_v23 = vadd.f32 %v3745_v15, %v344_v21  ;;  %v381_v37 = vsel %vm166_vm0, %v376_v26, 0.0 }
 0x1de   :  { %v354_v27 = vsel %vm166_vm0, %v4256_v23, 0.0  ;;  %v375_v28 = vmul.f32 %v4256_v23, %v4256_v23 }
 0x1df   :  { %v355_v29 = vadd.f32 %v354_v27, %v353_v25  ;;  %v350_v30 = vpop.f32.mrf.mxu3 }
 0x1e0   :  { %v379_v33 = vsel %vm166_vm0, %v375_v28, 0.0  ;;  %v351_v34 = vadd.f32 %v3745_v15, %v350_v30 }
 0x1e1   :  { %v380_v35 = vadd.f32 %v379_v33, %v378_v31  ;;  %v357_v36 = vadd.f32 %v356_v32, %v355_v29  ;;  %v482_v33 = vld [vmem:[%s4020_s25 + $0x28] sm:$0xff] }
 0x1e2   :  { %v358_v38 = vsel %vm166_vm0, %v351_v34, 0.0  ;;  %v377_v40 = vmul.f32 %v351_v34, %v351_v34 }
 0x1e3   :  { %v359_v41 = vadd.f32 %v358_v38, %v357_v36  ;;  %v382_v43 = vadd.f32 %v381_v37, %v380_v35  ;;  %v480_v35 = vld [vmem:[%s4020_s25 + $0x18] sm:$0xff]  ;;  %v479_v36 = vld [vmem:[%s4020_s25 + $0x10] sm:$0xff]  ;;  %v478_v37 = vld [vmem:[%s4020_s25 + $0x8] sm:$0xff] }
 0x1e4   :  { %v383_v44 = vsel %vm166_vm0, %v377_v40, 0.0  ;;  %v477_v38 = vld [vmem:[%s4020_s25] sm:$0xff] }
 0x1e5   :  { %v360_v45 = vrot.slane %v359_v41, 4  ;;  %v384_v46 = vadd.f32 %v383_v44, %v382_v43 }
 0x1e7   :  { %v361_v48 = vadd.f32 %v360_v45, %v359_v41  ;;  %v385_v49 = vrot.slane %v384_v46, 4 }
 0x1e9   :  { %v362_v50 = vrot.slane %v361_v48, 2  ;;  %v386_v51 = vadd.f32 %v385_v49, %v384_v46 }
 0x1eb   :  { %v363_v53 = vadd.f32 %v362_v50, %v361_v48  ;;  %v387_v54 = vrot.slane %v386_v51, 2 }
 0x1ed   :  { %v364_v55 = vrot.slane %v363_v53, 1  ;;  %v388_v56 = vadd.f32 %v387_v54, %v386_v51  ;;  %v3746_v54 = vld [vmem:[%s4025_s29] ss:$0 sm:$0xff]  ;;  %s5595_s29 = sld [smem:[#allocation8_spill]] }
 0x1ef   :  { %v365_v60 = vadd.f32 %v364_v55, %v363_v53  ;;  %v389_v61 = vrot.slane %v388_v56, 1 }
 0x1f1   :  { %v373_v62 = vmul.f32 %v4273_v58, %v365_v60  ;;  %v390_v0 = vadd.f32 %v389_v61, %v388_v56 }
 0x1f3   :  { %v391_v1 = vmul.f32 %v390_v0, %v4273_v58  ;;  %v392_v2 = vmul.f32 %v373_v62, %v373_v62 }
 0x1f5   :  { %v393_v3 = vsub.f32 %v391_v1, %v392_v2 }
 0x1f7   :  { %v395_v5 = vadd.f32 1e-05, %v393_v3 }
 0x1f9   :  { %3766 = vrsqrt.f32 %v395_v5  ;;  %vm402_vm6 = vweird.f32 %v395_v5 }
 0x1ff   :  { %v3767_v6 = vpop.eup %3766 }
 0x200   :  { %v397_v7 = vmul.f32 %v3767_v6, %v395_v5  ;;  %vm403_vm5 = vweird.f32 %v3767_v6 }
 0x201   :  { %vm404_vm7 = vmor %vm402_vm6, %vm403_vm5  ;;  %vm954_vm5 = vcmask 1043456  }
 0x202   :  { %v398_v4 = vmul.f32 %v3767_v6, %v397_v7 }
 0x204   :  { %v399_v8 = vmul.f32 0.5, %v398_v4 }
 0x206   :  { %v400_v9 = vsub.f32 1.5, %v399_v8 }
 0x208   :  { %v401_v11 = vmul.f32 %v3767_v6, %v400_v9 }
 0x20a   :  { %v405_v12 = vsel %vm404_vm7, %v3767_v6, %v401_v11 }
 0x20b   :  { %v406_v13 = vmul.f32 %v405_v12, %v394_v10 }
 0x20d   :  { %v411_v15 = vperm.slane %v406_v13, 0  ;;  %v408_v16 = vmul.f32 %v406_v13, %v373_v62 }
 0x20f   :  { %v409_v17 = vsub.f32 %v407_v14, %v408_v16  ;;  %v416_v19 = vmul.f32 %v411_v15, %v351_v34  ;;  %v413_v22 = vmul.f32 %v411_v15, %v4250_v18  ;;  %v415_v24 = vmul.f32 %v411_v15, %v4252_v20  ;;  %v484_v20 = vld [vmem:[%s4020_s25 + $0x38] sm:$0xff]  ;;  %v481_v34 = vld [vmem:[%s4020_s25 + $0x20] sm:$0xff] }
 0x210   :  { %v414_v28 = vmul.f32 %v411_v15, %v4256_v23  ;;  %v483_v23 = vld [vmem:[%s4020_s25 + $0x30] sm:$0xff]  ;;  %510 = vmatpush.msrb.mxu3 %v484_v20  ;;  %s5594_s25 = sld [smem:[#allocation7_spill]] }
 0x211   :  { %v418_v21 = vperm.slane %v409_v17, 0 }
 0x212   :  { %511 = vmatpush.msrb.mxu3 %v483_v23 }
 0x213   :  { %v423_v25 = vadd.f32 %v418_v21, %v416_v19  ;;  %v420_v26 = vadd.f32 %v418_v21, %v413_v22  ;;  %v422_v27 = vadd.f32 %v418_v21, %v415_v24  ;;  %v421_v31 = vadd.f32 %v418_v21, %v414_v28 }
 0x214   :  { %512 = vmatpush.msrb.mxu3 %v482_v33 }
 0x215   :  { %v427_v29 = vmax.f32 %v423_v25, 0.0  ;;  %v424_v30 = vmax.f32 %v420_v26, 0.0  ;;  %v426_v32 = vmax.f32 %v422_v27, 0.0  ;;  %v425_v18 = vmax.f32 %v421_v31, 0.0 }
 0x216   :  { %513 = vmatpush.msrb.mxu3 %v481_v34 }
 0x217   :  { %467 = vrot.lane.b32.xlu0 %v427_v29, %s3980_s5  ;;  %440 = vmatpush.msrb.mxu2 %v427_v29 }
 0x218   :  { %461 = vrot.lane.b32.xlu2 %v424_v30, %s3980_s5  ;;  %514 = vmatpush.msrb.mxu3 %v480_v35 }
 0x219   :  { %441 = vmatpush.msrb.mxu2 %v426_v32 }
 0x21a   :  { %515 = vmatpush.msrb.mxu3 %v479_v36 }
 0x21b   :  { %442 = vmatpush.msrb.mxu2 %v425_v18 }
 0x21c   :  { %516 = vmatpush.msrb.mxu3 %v478_v37 }
 0x21d   :  { %443 = vmatpush.msrb.mxu2 %v424_v30 }
 0x21e   :  { %3563 = vmatmul.msk.f32.vlgmr.msrb.gmra.mxu2 %vm166_vm0, %v4228_v59  ;;  %517 = vmatpush.msrb.mxu3 %v477_v38 }
 0x220   :  { %463 = vrot.lane.b32.xlu2 %v425_v18, %s3980_s5 }
 0x226   :  { %3564 = vmatmul.msk.f32.gmra.mxu2 %vm166_vm0, %v4235_v63 }
 0x228   :  { %465 = vrot.lane.b32.xlu2 %v426_v32, %s3980_s5 }
 0x22e   :  { %3565 = vmatmul.msk.f32.gmra.mxu2 %vm166_vm0, %v4216_v42 }
 0x236   :  { %3566 = vmatmul.msk.f32.gmra.mxu2 %vm166_vm0, %v4224_v57 }
 0x272   :  { %v462_v39 = vpop.permute.xlu2 %461 }
 0x27a   :  { %v464_v43 = vpop.permute.xlu2 %463 }
 0x282   :  { %v466_v46 = vpop.permute.xlu2 %465 }
 0x289   :  { %v468_v49 = vpop.permute.xlu0 %467 }
 0x2a1   :  { %v445_v40 = vpop.f32.mrf.mxu2 }
 0x2a2   :  { %v473_v41 = vsel %vm166_vm0, %v445_v40, %v462_v39 }
 0x2a3   :  { %3567 = vmatmul.msk.f32.vlgmr.msrb.gmra.mxu3 %vm489_vm8, %v473_v41  ;;  %v566_v41 = vld [vmem:[%s4140_s4] sm:$0x1] }
 0x2a9   :  { %v448_v44 = vpop.f32.mrf.mxu2 }
 0x2aa   :  { %v474_v45 = vsel %vm166_vm0, %v448_v44, %v464_v43 }
 0x2ab   :  { %3568 = vmatmul.msk.f32.gmra.mxu3 %vm489_vm8, %v474_v45 }
 0x2b1   :  { %v451_v47 = vpop.f32.mrf.mxu2 }
 0x2b2   :  { %v475_v48 = vsel %vm166_vm0, %v451_v47, %v466_v46  ;;  %v579_v46 = vld [vmem:[%s4145_s13] sm:$0x1] }
 0x2b3   :  { %3569 = vmatmul.msk.f32.gmra.mxu3 %vm489_vm8, %v475_v48 }
 0x2b9   :  { %v454_v50 = vpop.f32.mrf.mxu2 }
 0x2ba   :  { %v476_v51 = vsel %vm166_vm0, %v454_v50, %v468_v49 }
 0x2bb   :  { %3570 = vmatmul.msk.f32.gmra.mxu3 %vm489_vm8, %v476_v51 }
 0x326   :  { %v519_v52 = vpop.f32.mrf.mxu3 }
 0x327   :  { %v520_v60 = vadd.f32 %v3746_v54, %v519_v52 }
 0x329   :  { %v546_v0 = vmul.f32 %v520_v60, %v520_v60  ;;  %v532_v3 = vsel %vm531_vm9, %v520_v60, 0.0 }
 0x32b   :  { %v550_v8 = vsel %vm531_vm9, %v546_v0, 0.0 }
 0x32e   :  { %v522_v53 = vpop.f32.mrf.mxu3 }
 0x32f   :  { %v523_v55 = vadd.f32 %v3746_v54, %v522_v53 }
 0x331   :  { %v547_v62 = vmul.f32 %v523_v55, %v523_v55  ;;  %v533_v1 = vsel %vm531_vm9, %v523_v55, 0.0 }
 0x332   :  { %v534_v7 = vadd.f32 %v533_v1, %v532_v3 }
 0x333   :  { %v551_v5 = vsel %vm531_vm9, %v547_v62, 0.0 }
 0x334   :  { %v552_v11 = vadd.f32 %v551_v5, %v550_v8  ;;  %v649_v8 = vld [vmem:[%s4030_s3] sm:$0xff] }
 0x336   :  { %v525_v56 = vpop.f32.mrf.mxu3 }
 0x337   :  { %v526_v61 = vadd.f32 %v3746_v54, %v525_v56 }
 0x339   :  { %v548_v2 = vmul.f32 %v526_v61, %v526_v61  ;;  %v535_v6 = vsel %vm531_vm9, %v526_v61, 0.0 }
 0x33a   :  { %v536_v12 = vadd.f32 %v535_v6, %v534_v7  ;;  %v651_v7 = vld [vmem:[%s4030_s3 + $0x10] sm:$0xff] }
 0x33b   :  { %v553_v9 = vsel %vm531_vm9, %v548_v2, 0.0 }
 0x33c   :  { %v554_v15 = vadd.f32 %v553_v9, %v552_v11 }
 0x33e   :  { %v528_v4 = vpop.f32.mrf.mxu3 }
 0x33f   :  { %v529_v10 = vadd.f32 %v3746_v54, %v528_v4  ;;  %v650_v4 = vld [vmem:[%s4030_s3 + $0x8] sm:$0xff] }
 0x341   :  { %v537_v13 = vsel %vm531_vm9, %v529_v10, 0.0  ;;  %v549_v14 = vmul.f32 %v529_v10, %v529_v10 }
 0x342   :  { %v538_v16 = vadd.f32 %v537_v13, %v536_v12 }
 0x343   :  { %v555_v17 = vsel %vm531_vm9, %v549_v14, 0.0 }
 0x344   :  { %v539_v19 = vrot.slane %v538_v16, 4  ;;  %v556_v21 = vadd.f32 %v555_v17, %v554_v15 }
 0x346   :  { %v540_v22 = vadd.f32 %v539_v19, %v538_v16  ;;  %v557_v24 = vrot.slane %v556_v21, 4 }
 0x348   :  { %v541_v25 = vrot.slane %v540_v22, 2  ;;  %v558_v26 = vadd.f32 %v557_v24, %v556_v21 }
 0x34a   :  { %v542_v27 = vadd.f32 %v541_v25, %v540_v22  ;;  %v559_v28 = vrot.slane %v558_v26, 2 }
 0x34c   :  { %v543_v29 = vrot.slane %v542_v27, 1  ;;  %v560_v30 = vadd.f32 %v559_v28, %v558_v26  ;;  %v3747_v26 = vld [vmem:[%s4035_s8] ss:$0 sm:$0xff]  ;;  %s5597_s8 = sld [smem:[#allocation25_spill]] }
 0x34e   :  { %v544_v31 = vadd.f32 %v543_v29, %v542_v27  ;;  %v561_v32 = vrot.slane %v560_v30, 1 }
 0x350   :  { %v562_v18 = vadd.f32 %v561_v32, %v560_v30  ;;  %v545_v20 = vmul.f32 %v544_v31, %v4273_v58 }
 0x352   :  { %v563_v23 = vmul.f32 %v562_v18, %v4273_v58  ;;  %v564_v33 = vmul.f32 %v545_v20, %v545_v20 }
 0x354   :  { %v565_v34 = vsub.f32 %v563_v23, %v564_v33 }
 0x356   :  { %v567_v35 = vadd.f32 1e-05, %v565_v34 }
 0x358   :  { %3768 = vrsqrt.f32 %v567_v35  ;;  %vm574_vm11 = vweird.f32 %v567_v35 }
 0x35e   :  { %v3769_v36 = vpop.eup %3768 }
 0x35f   :  { %v569_v37 = vmul.f32 %v3769_v36, %v567_v35  ;;  %vm575_vm10 = vweird.f32 %v3769_v36 }
 0x360   :  { %vm576_vm12 = vmor %vm574_vm11, %vm575_vm10 }
 0x361   :  { %v570_v38 = vmul.f32 %v3769_v36, %v569_v37 }
 0x363   :  { %v571_v39 = vmul.f32 0.5, %v570_v38 }
 0x365   :  { %v572_v40 = vsub.f32 1.5, %v571_v39 }
 0x367   :  { %v573_v43 = vmul.f32 %v3769_v36, %v572_v40 }
 0x369   :  { %v577_v44 = vsel %vm576_vm12, %v3769_v36, %v573_v43 }
 0x36a   :  { %v578_v45 = vmul.f32 %v577_v44, %v566_v41 }
 0x36c   :  { %v580_v47 = vmul.f32 %v578_v45, %v545_v20  ;;  %v583_v48 = vperm.slane %v578_v45, 0 }
 0x36e   :  { %v581_v49 = vsub.f32 %v579_v46, %v580_v47  ;;  %v588_v50 = vmul.f32 %v583_v48, %v529_v10  ;;  %v587_v52 = vmul.f32 %v583_v48, %v526_v61  ;;  %v586_v53 = vmul.f32 %v583_v48, %v523_v55  ;;  %v654_v55 = vld [vmem:[%s4030_s3 + $0x28] sm:$0xff]  ;;  %v652_v61 = vld [vmem:[%s4030_s3 + $0x18] sm:$0xff] }
 0x36f   :  { %v585_v54 = vmul.f32 %v583_v48, %v520_v60  ;;  %v653_v60 = vld [vmem:[%s4030_s3 + $0x20] sm:$0xff]  ;;  %682 = vmatpush.msrb.mxu0 %v654_v55  ;;  %s5596_s3 = sld [smem:[#allocation24_spill]] }
 0x370   :  { %v590_v51 = vperm.slane %v581_v49, 0 }
 0x371   :  { %683 = vmatpush.msrb.mxu0 %v653_v60 }
 0x372   :  { %v595_v56 = vadd.f32 %v590_v51, %v588_v50  ;;  %v594_v62 = vadd.f32 %v590_v51, %v587_v52  ;;  %v593_v0 = vadd.f32 %v590_v51, %v586_v53  ;;  %v592_v1 = vadd.f32 %v590_v51, %v585_v54 }
 0x373   :  { %684 = vmatpush.msrb.mxu0 %v652_v61 }
 0x374   :  { %v599_v2 = vmax.f32 %v595_v56, 0.0  ;;  %v598_v3 = vmax.f32 %v594_v62, 0.0  ;;  %v597_v5 = vmax.f32 %v593_v0, 0.0  ;;  %v596_v6 = vmax.f32 %v592_v1, 0.0 }
 0x375   :  { %685 = vmatpush.msrb.mxu0 %v651_v7 }
 0x376   :  { %612 = vmatpush.msrb.mxu1 %v599_v2  ;;  %637 = vrot.lane.b32.xlu0 %v598_v3, %s3981_s9 }
 0x377   :  { %635 = vrot.lane.b32.xlu1 %v597_v5, %s3981_s9  ;;  %633 = vrot.lane.b32.xlu2 %v596_v6, %s3981_s9 }
 0x378   :  { %613 = vmatpush.msrb.mxu1 %v598_v3  ;;  %686 = vmatpush.msrb.mxu0 %v650_v4 }
 0x37a   :  { %614 = vmatpush.msrb.mxu1 %v597_v5  ;;  %687 = vmatpush.msrb.mxu0 %v649_v8 }
 0x37c   :  { %615 = vmatpush.msrb.mxu1 %v596_v6 }
 0x37d   :  { %3571 = vmatmul.msk.f32.vlgmr.msrb.gmra.mxu1 %vm166_vm0, %v4228_v59 }
 0x37f   :  { %639 = vrot.lane.b32.xlu2 %v599_v2, %s3981_s9 }
 0x385   :  { %3572 = vmatmul.msk.f32.gmra.mxu1 %vm166_vm0, %v4235_v63 }
 0x38d   :  { %3573 = vmatmul.msk.f32.gmra.mxu1 %vm166_vm0, %v4216_v42 }
 0x395   :  { %3574 = vmatmul.msk.f32.gmra.mxu1 %vm166_vm0, %v4224_v57 }
 0x3d1   :  { %v634_v9 = vpop.permute.xlu2 %633 }
 0x3d9   :  { %v640_v19 = vpop.permute.xlu2 %639 }
 0x3e8   :  { %v638_v15 = vpop.permute.xlu0 %637 }
 0x3e9   :  { %v636_v12 = vpop.permute.xlu1 %635 }
 0x3fa   :  { %v617_v10 = vpop.f32.mrf.mxu1 }
 0x3fb   :  { %v645_v11 = vsel %vm531_vm9, %v617_v10, %v634_v9 }
 0x3fc   :  { %3575 = vmatmul.msk.f32.vlgmr.msrb.gmra.mxu0 %vm659_vm13, %v645_v11  ;;  %v735_v11 = vld [vmem:[%s4150_s20] sm:$0x1] }
 0x402   :  { %v620_v13 = vpop.f32.mrf.mxu1 }
 0x403   :  { %v646_v14 = vsel %vm531_vm9, %v620_v13, %v636_v12 }
 0x404   :  { %3576 = vmatmul.msk.f32.gmra.mxu0 %vm659_vm13, %v646_v14 }
 0x40a   :  { %v623_v16 = vpop.f32.mrf.mxu1 }
 0x40b   :  { %v647_v17 = vsel %vm531_vm9, %v623_v16, %v638_v15  ;;  %v748_v15 = vld [vmem:[%s4155_s6] sm:$0x1] }
 0x40c   :  { %3577 = vmatmul.msk.f32.gmra.mxu0 %vm659_vm13, %v647_v17 }
 0x412   :  { %v626_v21 = vpop.f32.mrf.mxu1 }
 0x413   :  { %v648_v22 = vsel %vm531_vm9, %v626_v21, %v640_v19 }
 0x414   :  { %3578 = vmatmul.msk.f32.gmra.mxu0 %vm659_vm13, %v648_v22 }
 0x479   :  { %v689_v24 = vpop.f32.mrf.mxu0 }
 0x47a   :  { %v690_v29 = vadd.f32 %v3747_v26, %v689_v24 }
 0x47c   :  { %v715_v32 = vmul.f32 %v690_v29, %v690_v29  ;;  %v701_v23 = vsel %vm311_vm3, %v690_v29, 0.0 }
 0x47e   :  { %v719_v37 = vsel %vm311_vm3, %v715_v32, 0.0 }
 0x481   :  { %v692_v25 = vpop.f32.mrf.mxu0 }
 0x482   :  { %v693_v27 = vadd.f32 %v3747_v26, %v692_v25 }
 0x484   :  { %v716_v31 = vmul.f32 %v693_v27, %v693_v27  ;;  %v702_v18 = vsel %vm311_vm3, %v693_v27, 0.0 }
 0x485   :  { %v703_v35 = vadd.f32 %v702_v18, %v701_v23 }
 0x486   :  { %v720_v33 = vsel %vm311_vm3, %v716_v31, 0.0 }
 0x487   :  { %v721_v40 = vadd.f32 %v720_v33, %v719_v37 }
 0x489   :  { %v695_v28 = vpop.f32.mrf.mxu0 }
 0x48a   :  { %v696_v30 = vadd.f32 %v3747_v26, %v695_v28 }
 0x48c   :  { %v717_v20 = vmul.f32 %v696_v30, %v696_v30  ;;  %v704_v34 = vsel %vm311_vm3, %v696_v30, 0.0 }
 0x48d   :  { %v705_v41 = vadd.f32 %v704_v34, %v703_v35  ;;  %v818_v35 = vld [vmem:[%s5593_s17] sm:$0xff] }
 0x48e   :  { %v722_v38 = vsel %vm311_vm3, %v717_v20, 0.0 }
 0x48f   :  { %v723_v45 = vadd.f32 %v722_v38, %v721_v40 }
 0x491   :  { %v698_v36 = vpop.f32.mrf.mxu0 }
 0x492   :  { %v699_v39 = vadd.f32 %v3747_v26, %v698_v36 }
 0x494   :  { %v706_v43 = vsel %vm311_vm3, %v699_v39, 0.0  ;;  %v718_v44 = vmul.f32 %v699_v39, %v699_v39 }
 0x495   :  { %v707_v46 = vadd.f32 %v706_v43, %v705_v41 }
 0x496   :  { %v724_v47 = vsel %vm311_vm3, %v718_v44, 0.0 }
 0x497   :  { %v708_v48 = vrot.slane %v707_v46, 4  ;;  %v725_v49 = vadd.f32 %v724_v47, %v723_v45 }
 0x499   :  { %v709_v50 = vadd.f32 %v708_v48, %v707_v46  ;;  %v726_v51 = vrot.slane %v725_v49, 4 }
 0x49b   :  { %v710_v52 = vrot.slane %v709_v50, 2  ;;  %v727_v53 = vadd.f32 %v726_v51, %v725_v49  ;;  %v3748_v51 = vld [vmem:[%s5594_s25] ss:$0 sm:$0xff] }
 0x49d   :  { %v711_v54 = vadd.f32 %v710_v52, %v709_v50  ;;  %v728_v56 = vrot.slane %v727_v53, 2 }
 0x49f   :  { %v712_v62 = vrot.slane %v711_v54, 1  ;;  %v729_v0 = vadd.f32 %v728_v56, %v727_v53 }
 0x4a1   :  { %v713_v1 = vadd.f32 %v712_v62, %v711_v54  ;;  %v730_v2 = vrot.slane %v729_v0, 1 }
 0x4a3   :  { %v714_v3 = vmul.f32 %v713_v1, %v4273_v58  ;;  %v731_v5 = vadd.f32 %v730_v2, %v729_v0 }
 0x4a5   :  { %v732_v6 = vmul.f32 %v731_v5, %v4273_v58  ;;  %v733_v55 = vmul.f32 %v714_v3, %v714_v3 }
 0x4a7   :  { %v734_v60 = vsub.f32 %v732_v6, %v733_v55 }
 0x4a9   :  { %v736_v61 = vadd.f32 1e-05, %v734_v60 }
 0x4ab   :  { %3770 = vrsqrt.f32 %v736_v61  ;;  %vm743_vm15 = vweird.f32 %v736_v61 }
 0x4b1   :  { %v3771_v7 = vpop.eup %3770 }
 0x4b2   :  { %v738_v4 = vmul.f32 %v3771_v7, %v736_v61  ;;  %vm744_vm14 = vweird.f32 %v3771_v7 }
 0x4b3   :  { %vm745_vm1 = vmor %vm743_vm15, %vm744_vm14 }
 0x4b4   :  { %v739_v8 = vmul.f32 %v3771_v7, %v738_v4 }
 0x4b6   :  { %v740_v9 = vmul.f32 0.5, %v739_v8 }
 0x4b8   :  { %v741_v10 = vsub.f32 1.5, %v740_v9 }
 0x4ba   :  { %v742_v12 = vmul.f32 %v3771_v7, %v741_v10 }
 0x4bc   :  { %v746_v13 = vsel %vm745_vm1, %v3771_v7, %v742_v12 }
 0x4bd   :  { %v747_v14 = vmul.f32 %v746_v13, %v735_v11 }
 0x4bf   :  { %v749_v16 = vmul.f32 %v747_v14, %v714_v3  ;;  %v752_v17 = vperm.slane %v747_v14, 0 }
 0x4c1   :  { %v750_v19 = vsub.f32 %v748_v15, %v749_v16  ;;  %v757_v21 = vmul.f32 %v752_v17, %v699_v39  ;;  %v756_v24 = vmul.f32 %v752_v17, %v696_v30  ;;  %v755_v25 = vmul.f32 %v752_v17, %v693_v27  ;;  %v821_v27 = vld [vmem:[%s5593_s17 + $0x18] sm:$0xff]  ;;  %v819_v30 = vld [vmem:[%s5593_s17 + $0x8] sm:$0xff] }
 0x4c2   :  { %v754_v26 = vmul.f32 %v752_v17, %v690_v29  ;;  %v820_v29 = vld [vmem:[%s5593_s17 + $0x10] sm:$0xff]  ;;  %850 = vmatpush.msra.mxu3 %v821_v27 }
 0x4c3   :  { %v759_v22 = vperm.slane %v750_v19, 0 }
 0x4c4   :  { %851 = vmatpush.msra.mxu3 %v820_v29 }
 0x4c5   :  { %v764_v28 = vadd.f32 %v759_v22, %v757_v21  ;;  %v763_v31 = vadd.f32 %v759_v22, %v756_v24  ;;  %v762_v32 = vadd.f32 %v759_v22, %v755_v25  ;;  %v761_v18 = vadd.f32 %v759_v22, %v754_v26 }
 0x4c6   :  { %852 = vmatpush.msra.mxu3 %v819_v30 }
 0x4c7   :  { %v768_v20 = vmax.f32 %v764_v28, 0.0  ;;  %v767_v23 = vmax.f32 %v763_v31, 0.0  ;;  %v766_v33 = vmax.f32 %v762_v32, 0.0  ;;  %v765_v34 = vmax.f32 %v761_v18, 0.0 }
 0x4c8   :  { %853 = vmatpush.msra.mxu3 %v818_v35 }
 0x4c9   :  { %781 = vmatpush.msra.mxu2 %v768_v20  ;;  %806 = vrot.lane.b32.xlu2 %v767_v23, %s3982_s21 }
 0x4ca   :  { %804 = vrot.lane.b32.xlu0 %v766_v33, %s3982_s21  ;;  %802 = vrot.lane.b32.xlu1 %v765_v34, %s3982_s21 }
 0x4cb   :  { %782 = vmatpush.msra.mxu2 %v767_v23  ;;  %v937_v23 = vld [vmem:[%s5595_s29 + $0x8] sm:$0xf] }
 0x4cc   :  { %3587 = vmatpush.msk.msra.mxu1 %vm954_vm5, %v937_v23 }
 0x4cd   :  { %783 = vmatpush.msra.mxu2 %v766_v33  ;;  %v936_v33 = vld [vmem:[%s5595_s29] sm:$0xff] }
 0x4ce   :  { %973 = vmatpush.msra.mxu1 %v936_v33 }
 0x4cf   :  { %784 = vmatpush.msra.mxu2 %v765_v34 }
 0x4d0   :  { %3579 = vmatmul.msk.f32.vlgmr.msra.gmra.mxu2 %vm166_vm0, %v4228_v59 }
 0x4d2   :  { %808 = vrot.lane.b32.xlu1 %v768_v20, %s3982_s21 }
 0x4d8   :  { %3580 = vmatmul.msk.f32.gmra.mxu2 %vm166_vm0, %v4235_v63 }
 0x4e0   :  { %3581 = vmatmul.msk.f32.gmra.mxu2 %vm166_vm0, %v4216_v42 }
 0x4e8   :  { %3582 = vmatmul.msk.f32.gmra.mxu2 %vm166_vm0, %v4224_v57 }
 0x523   :  { %v807_v43 = vpop.permute.xlu2 %806 }
 0x53c   :  { %v803_v36 = vpop.permute.xlu1 %802  ;;  %v805_v39 = vpop.permute.xlu0 %804 }
 0x544   :  { %v809_v46 = vpop.permute.xlu1 %808 }
 0x553   :  { %v786_v37 = vpop.f32.mrf.mxu2 }
 0x554   :  { %v814_v38 = vsel %vm311_vm3, %v786_v37, %v803_v36 }
 0x555   :  { %3583 = vmatmul.msk.f32.vlgmr.msra.gmra.mxu3 %vm166_vm0, %v814_v38 }
 0x55b   :  { %v789_v40 = vpop.f32.mrf.mxu2 }
 0x55c   :  { %v815_v41 = vsel %vm311_vm3, %v789_v40, %v805_v39  ;;  %v902_v40 = vld [vmem:[%s5596_s3] sm:$0x1] }
 0x55d   :  { %3584 = vmatmul.msk.f32.gmra.mxu3 %vm166_vm0, %v815_v41 }
 0x563   :  { %v792_v44 = vpop.f32.mrf.mxu2 }
 0x564   :  { %v816_v45 = vsel %vm311_vm3, %v792_v44, %v807_v43 }
 0x565   :  { %3585 = vmatmul.msk.f32.gmra.mxu3 %vm166_vm0, %v816_v45  ;;  %v915_v45 = vld [vmem:[%s5597_s8] sm:$0x1] }
 0x56b   :  { %v795_v47 = vpop.f32.mrf.mxu2 }
 0x56c   :  { %v817_v48 = vsel %vm311_vm3, %v795_v47, %v809_v46 }
 0x56d   :  { %3586 = vmatmul.msk.f32.gmra.mxu3 %vm166_vm0, %v817_v48 }
 0x5d8   :  { %v855_v49 = vpop.f32.mrf.mxu3 }
 0x5d9   :  { %v4389_v54 = vadd.f32 %v3748_v51, %v855_v49 }
 0x5db   :  { %v882_v0 = vmul.f32 %v4389_v54, %v4389_v54  ;;  %v868_v3 = vsel %vm867_vm4, %v4389_v54, 0.0 }
 0x5dd   :  { %v886_v61 = vsel %vm867_vm4, %v882_v0, 0.0 }
 0x5e0   :  { %v858_v50 = vpop.f32.mrf.mxu3 }
 0x5e1   :  { %v4387_v52 = vadd.f32 %v3748_v51, %v858_v50 }
 0x5e3   :  { %v883_v62 = vmul.f32 %v4387_v52, %v4387_v52  ;;  %v869_v1 = vsel %vm867_vm4, %v4387_v52, 0.0 }
 0x5e4   :  { %v870_v55 = vadd.f32 %v869_v1, %v868_v3 }
 0x5e5   :  { %v887_v5 = vsel %vm867_vm4, %v883_v62, 0.0 }
 0x5e6   :  { %v888_v8 = vadd.f32 %v887_v5, %v886_v61 }
 0x5e8   :  { %v861_v53 = vpop.f32.mrf.mxu3 }
 0x5e9   :  { %v4391_v56 = vadd.f32 %v3748_v51, %v861_v53 }
 0x5eb   :  { %v884_v2 = vmul.f32 %v4391_v56, %v4391_v56  ;;  %v871_v6 = vsel %vm867_vm4, %v4391_v56, 0.0 }
 0x5ec   :  { %v872_v9 = vadd.f32 %v871_v6, %v870_v55 }
 0x5ed   :  { %v889_v7 = vsel %vm867_vm4, %v884_v2, 0.0 }
 0x5ee   :  { %v890_v12 = vadd.f32 %v889_v7, %v888_v8  ;;  %v3749_v7 = vld [vmem:[%s5598_s15] ss:$0 sm:$0xff] }
 0x5f0   :  { %v864_v60 = vpop.f32.mrf.mxu3 }
 0x5f1   :  { %v865_v4 = vadd.f32 %v3748_v51, %v864_v60 }
 0x5f3   :  { %v873_v10 = vsel %vm867_vm4, %v865_v4, 0.0  ;;  %v885_v11 = vmul.f32 %v865_v4, %v865_v4 }
 0x5f4   :  { %v874_v13 = vadd.f32 %v873_v10, %v872_v9 }
 0x5f5   :  { %v891_v14 = vsel %vm867_vm4, %v885_v11, 0.0 }
 0x5f6   :  { %v875_v15 = vrot.slane %v874_v13, 4  ;;  %v892_v16 = vadd.f32 %v891_v14, %v890_v12 }
 0x5f8   :  { %v876_v17 = vadd.f32 %v875_v15, %v874_v13  ;;  %v893_v19 = vrot.slane %v892_v16, 4 }
 0x5fa   :  { %v877_v21 = vrot.slane %v876_v17, 2  ;;  %v894_v22 = vadd.f32 %v893_v19, %v892_v16 }
 0x5fc   :  { %v878_v24 = vadd.f32 %v877_v21, %v876_v17  ;;  %v895_v25 = vrot.slane %v894_v22, 2 }
 0x5fe   :  { %v879_v26 = vrot.slane %v878_v24, 1  ;;  %v896_v28 = vadd.f32 %v895_v25, %v894_v22 }
 0x600   :  { %v880_v31 = vadd.f32 %v879_v26, %v878_v24  ;;  %v897_v32 = vrot.slane %v896_v28, 1 }
 0x602   :  { %v881_v18 = vmul.f32 %v880_v31, %v4273_v58  ;;  %v898_v20 = vadd.f32 %v897_v32, %v896_v28 }
 0x604   :  { %v899_v34 = vmul.f32 %v898_v20, %v4273_v58  ;;  %v900_v27 = vmul.f32 %v881_v18, %v881_v18 }
 0x606   :  { %v901_v29 = vsub.f32 %v899_v34, %v900_v27 }
 0x608   :  { %v903_v30 = vadd.f32 1e-05, %v901_v29 }
 0x60a   :  { %3772 = vrsqrt.f32 %v903_v30  ;;  %vm910_vm7 = vweird.f32 %v903_v30 }
 0x610   :  { %v3773_v35 = vpop.eup %3772 }
 0x611   :  { %v905_v36 = vmul.f32 %v3773_v35, %v903_v30  ;;  %vm911_vm6 = vweird.f32 %v3773_v35 }
 0x612   :  { %vm912_vm10 = vmor %vm910_vm7, %vm911_vm6 }
 0x613   :  { %v906_v37 = vmul.f32 %v3773_v35, %v905_v36 }
 0x615   :  { %v907_v38 = vmul.f32 0.5, %v906_v37 }
 0x617   :  { %v908_v39 = vsub.f32 1.5, %v907_v38 }
 0x619   :  { %v909_v41 = vmul.f32 %v3773_v35, %v908_v39 }
 0x61b   :  { %v913_v43 = vsel %vm912_vm10, %v3773_v35, %v909_v41 }
 0x61c   :  { %v914_v44 = vmul.f32 %v913_v43, %v902_v40 }
 0x61e   :  { %v916_v46 = vmul.f32 %v914_v44, %v881_v18  ;;  %v919_v47 = vperm.slane %v914_v44, 0 }
 0x620   :  { %v917_v48 = vsub.f32 %v915_v45, %v916_v46  ;;  %v921_v50 = vmul.f32 %v919_v47, %v4389_v54  ;;  %v922_v62 = vmul.f32 %v919_v47, %v4387_v52  ;;  %v923_v2 = vmul.f32 %v919_v47, %v4391_v56  ;;  %v1072_v45 = vld [vmem:[%s5599_s16 + $0x88] sm:$0xff]  ;;  %v1073_v46 = vld [vmem:[%s5599_s16 + $0x90] sm:$0xff] }
 0x621   :  { %v924_v6 = vmul.f32 %v919_v47, %v865_v4  ;;  %v1071_v47 = vld [vmem:[%s5599_s16 + $0x80] sm:$0xff]  ;;  %1178 = vmatpush.msrb.mxu2 %v1072_v45  ;;  %1207 = vmatpush.msrb.mxu3 %v1073_v46  ;;  %v1070_v45 = vld [vmem:[%s5599_s16 + $0x78] sm:$0xff] }
 0x622   :  { %v926_v49 = vperm.slane %v917_v48, 0  ;;  %1149 = vmatpush.msra.mxu0 %v1071_v47  ;;  %v1998_v46 = vld [vmem:[%s5600_s18 + $0x78] sm:$0xff] }
 0x623   :  { %v2046_v47 = vld [vmem:[%s5600_s18 + $0x1f8] sm:$0xff] }
 0x624   :  { %v928_v51 = vadd.f32 %v926_v49, %v921_v50  ;;  %v929_v0 = vadd.f32 %v926_v49, %v922_v62  ;;  %v930_v3 = vadd.f32 %v926_v49, %v923_v2  ;;  %v931_v55 = vadd.f32 %v926_v49, %v924_v6  ;;  %v1074_v49 = vld [vmem:[%s5599_s16 + $0x98] sm:$0xff]  ;;  %v1055_v50 = vld [vmem:[%s5599_s16] sm:$0xff] }
 0x625   :  { %1236 = vmatpush.msrb.mxu1 %v1074_v49  ;;  %v1058_v62 = vld [vmem:[%s5599_s16 + $0x18] sm:$0xff]  ;;  %1150 = vmatpush.msra.mxu0 %v1055_v50  ;;  %v2045_v49 = vld [vmem:[%s5600_s18 + $0x1f0] sm:$0xff]  ;;  %v1996_v50 = vld [vmem:[%s5600_s18 + $0x68] sm:$0xff] }
 0x626   :  { %v932_v53 = vmax.f32 %v928_v51, 0.0  ;;  %v933_v1 = vmax.f32 %v929_v0, 0.0  ;;  %v934_v5 = vmax.f32 %v930_v3, 0.0  ;;  %v935_v54 = vmax.f32 %v931_v55, 0.0  ;;  %v1056_v51 = vld [vmem:[%s5599_s16 + $0x8] sm:$0xff] }
 0x627   :  { %1179 = vmatpush.msrb.mxu2 %v1056_v51  ;;  %1237 = vmatpush.msrb.mxu1 %v1058_v62  ;;  %v1021_v55 = vld [vmem:[%s4170_s19] sm:$0x1]  ;;  %v2044_v51 = vld [vmem:[%s5600_s18 + $0x1e8] sm:$0xff]  ;;  %v2014_v62 = vld [vmem:[%s5600_s18 + $0xf8] sm:$0xff] }
 0x628   :  { %3588 = vmatmul.msk.f32.vlgmr.msra.gmra.mxu1 %vm867_vm4, %v932_v53  ;;  %v1057_v53 = vld [vmem:[%s5599_s16 + $0x10] sm:$0xff] }
 0x629   :  { %1208 = vmatpush.msrb.mxu3 %v1057_v53  ;;  %v1995_v53 = vld [vmem:[%s5600_s18 + $0x60] sm:$0xff] }
 0x630   :  { %3589 = vmatmul.msk.f32.gmra.mxu1 %vm867_vm4, %v933_v1 }
 0x638   :  { %3590 = vmatmul.msk.f32.gmra.mxu1 %vm867_vm4, %v934_v5 }
 0x640   :  { %3591 = vmatmul.msk.f32.gmra.mxu1 %vm867_vm4, %v935_v54 }
 0x6a5   :  { %v975_v60 = vpop.f32.mrf.mxu1 }
 0x6a6   :  { %v4426_v9 = vadd.f32 %v3749_v7, %v975_v60 }
 0x6a8   :  { %v1001_v4 = vmul.f32 %v4426_v9, %v4426_v9  ;;  %v987_v13 = vsel %vm311_vm3, %v4426_v9, 0.0 }
 0x6aa   :  { %v1005_v19 = vsel %vm311_vm3, %v1001_v4, 0.0 }
 0x6ad   :  { %v978_v61 = vpop.f32.mrf.mxu1 }
 0x6ae   :  { %v4424_v8 = vadd.f32 %v3749_v7, %v978_v61 }
 0x6b0   :  { %v1002_v56 = vmul.f32 %v4424_v8, %v4424_v8  ;;  %v988_v11 = vsel %vm311_vm3, %v4424_v8, 0.0 }
 0x6b1   :  { %v989_v16 = vadd.f32 %v988_v11, %v987_v13  ;;  %v1076_v11 = vld [vmem:[%s5599_s16 + $0xa8] sm:$0xff]  ;;  %v1075_v13 = vld [vmem:[%s5599_s16 + $0xa0] sm:$0xff] }
 0x6b2   :  { %v1006_v14 = vsel %vm311_vm3, %v1002_v56, 0.0  ;;  %1294 = vmatpush.msra.mxu2 %v1076_v11  ;;  %1265 = vmatpush.msrb.mxu0 %v1075_v13  ;;  %v2010_v11 = vld [vmem:[%s5600_s18 + $0xd8] sm:$0xff]  ;;  %v1991_v13 = vld [vmem:[%s5600_s18 + $0x40] sm:$0xff] }
 0x6b3   :  { %v1007_v24 = vadd.f32 %v1006_v14, %v1005_v19  ;;  %v1060_v19 = vld [vmem:[%s5599_s16 + $0x28] sm:$0xff] }
 0x6b4   :  { %1295 = vmatpush.msra.mxu2 %v1060_v19  ;;  %v2038_v19 = vld [vmem:[%s5600_s18 + $0x1b8] sm:$0xff] }
 0x6b5   :  { %v981_v52 = vpop.f32.mrf.mxu1 }
 0x6b6   :  { %v4428_v10 = vadd.f32 %v3749_v7, %v981_v52 }
 0x6b8   :  { %v1003_v12 = vmul.f32 %v4428_v10, %v4428_v10  ;;  %v990_v15 = vsel %vm311_vm3, %v4428_v10, 0.0 }
 0x6b9   :  { %v991_v25 = vadd.f32 %v990_v15, %v989_v16  ;;  %v1078_v16 = vld [vmem:[%s5599_s16 + $0xb8] sm:$0xff] }
 0x6ba   :  { %v1008_v21 = vsel %vm311_vm3, %v1003_v12, 0.0  ;;  %v1077_v12 = vld [vmem:[%s5599_s16 + $0xb0] sm:$0xff]  ;;  %1352 = vmatpush.msra.mxu1 %v1078_v16 }
 0x6bb   :  { %v1009_v31 = vadd.f32 %v1008_v21, %v1007_v24  ;;  %1323 = vmatpush.msra.mxu3 %v1077_v12  ;;  %v1061_v21 = vld [vmem:[%s5599_s16 + $0x30] sm:$0xff]  ;;  %v1062_v24 = vld [vmem:[%s5599_s16 + $0x38] sm:$0xff] }
 0x6bc   :  { %1353 = vmatpush.msra.mxu1 %v1062_v24  ;;  %v2026_v12 = vld [vmem:[%s5600_s18 + $0x158] sm:$0xff]  ;;  %v2025_v16 = vld [vmem:[%s5600_s18 + $0x150] sm:$0xff]  ;;  %v2024_v24 = vld [vmem:[%s5600_s18 + $0x148] sm:$0xff] }
 0x6bd   :  { %v984_v17 = vpop.f32.mrf.mxu1  ;;  %1324 = vmatpush.msra.mxu3 %v1061_v21  ;;  %v2008_v21 = vld [vmem:[%s5600_s18 + $0xc8] sm:$0xff] }
 0x6be   :  { %v4445_v22 = vadd.f32 %v3749_v7, %v984_v17  ;;  %v1034_v7 = vld [vmem:[%s4175_s14] sm:$0x1] }
 0x6bf   :  { %v1059_v17 = vld [vmem:[%s5599_s16 + $0x20] sm:$0xff] }
 0x6c0   :  { %v992_v26 = vsel %vm311_vm3, %v4445_v22, 0.0  ;;  %v1004_v28 = vmul.f32 %v4445_v22, %v4445_v22  ;;  %1266 = vmatpush.msrb.mxu0 %v1059_v17  ;;  %v1990_v17 = vld [vmem:[%s5600_s18 + $0x38] sm:$0xff] }
 0x6c1   :  { %v993_v32 = vadd.f32 %v992_v26, %v991_v25 }
 0x6c2   :  { %v1010_v18 = vsel %vm311_vm3, %v1004_v28, 0.0 }
 0x6c3   :  { %v994_v20 = vrot.slane %v993_v32, 4  ;;  %v1011_v23 = vadd.f32 %v1010_v18, %v1009_v31 }
 0x6c5   :  { %v995_v33 = vadd.f32 %v994_v20, %v993_v32  ;;  %v1012_v34 = vrot.slane %v1011_v23, 4 }
 0x6c7   :  { %v996_v27 = vrot.slane %v995_v33, 2  ;;  %v1013_v29 = vadd.f32 %v1012_v34, %v1011_v23  ;;  %v1079_v34 = vld [vmem:[%s5599_s16 + $0xc0] sm:$0xff] }
 0x6c9   :  { %v997_v30 = vadd.f32 %v996_v27, %v995_v33  ;;  %v1014_v35 = vrot.slane %v1013_v29, 2  ;;  %v1081_v33 = vld [vmem:[%s5599_s16 + $0xd0] sm:$0xff]  ;;  %v1082_v27 = vld [vmem:[%s5599_s16 + $0xd8] sm:$0xff] }
 0x6cb   :  { %v998_v36 = vrot.slane %v997_v30, 1  ;;  %v1015_v37 = vadd.f32 %v1014_v35, %v1013_v29  ;;  %v1063_v29 = vld [vmem:[%s5599_s16 + $0x40] sm:$0xff]  ;;  %v1065_v35 = vld [vmem:[%s5599_s16 + $0x50] sm:$0xff] }
 0x6cd   :  { %v999_v38 = vadd.f32 %v998_v36, %v997_v30  ;;  %v1016_v39 = vrot.slane %v1015_v37, 1  ;;  %v1064_v30 = vld [vmem:[%s5599_s16 + $0x48] sm:$0xff]  ;;  %v1066_v36 = vld [vmem:[%s5599_s16 + $0x58] sm:$0xff] }
 0x6cf   :  { %v1000_v40 = vmul.f32 %v999_v38, %v4273_v58  ;;  %v1017_v41 = vadd.f32 %v1016_v39, %v1015_v37  ;;  %v1084_v37 = vld [vmem:[%s5599_s16 + $0xe8] sm:$0xff]  ;;  %v1085_v38 = vld [vmem:[%s5599_s16 + $0xf0] sm:$0xff]  ;;  %v1083_v39 = vld [vmem:[%s5599_s16 + $0xe0] sm:$0xff] }
 0x6d1   :  { %v1018_v43 = vmul.f32 %v1017_v41, %v4273_v58  ;;  %v1019_v44 = vmul.f32 %v1000_v40, %v1000_v40  ;;  %v1067_v41 = vld [vmem:[%s5599_s16 + $0x60] sm:$0xff] }
 0x6d3   :  { %v1020_v48 = vsub.f32 %v1018_v43, %v1019_v44  ;;  %v1068_v43 = vld [vmem:[%s5599_s16 + $0x68] sm:$0xff]  ;;  %v1069_v44 = vld [vmem:[%s5599_s16 + $0x70] sm:$0xff] }
 0x6d5   :  { %v1022_v0 = vadd.f32 1e-05, %v1020_v48  ;;  %v1997_v48 = vld [vmem:[%s5600_s18 + $0x70] sm:$0xff] }
 0x6d7   :  { %3774 = vrsqrt.f32 %v1022_v0  ;;  %vm1029_vm12 = vweird.f32 %v1022_v0 }
 0x6dd   :  { %v3775_v1 = vpop.eup %3774 }
 0x6de   :  { %v1024_v2 = vmul.f32 %v3775_v1, %v1022_v0  ;;  %vm1030_vm11 = vweird.f32 %v3775_v1  ;;  %v2030_v0 = vld [vmem:[%s5600_s18 + $0x178] sm:$0xff] }
 0x6df   :  { %vm1031_vm14 = vmor %vm1029_vm12, %vm1030_vm11 }
 0x6e0   :  { %v1025_v3 = vmul.f32 %v3775_v1, %v1024_v2  ;;  %v2013_v2 = vld [vmem:[%s5600_s18 + $0xf0] sm:$0xff] }
 0x6e2   :  { %v1026_v5 = vmul.f32 0.5, %v1025_v3  ;;  %v2029_v3 = vld [vmem:[%s5600_s18 + $0x170] sm:$0xff] }
 0x6e4   :  { %v1027_v6 = vsub.f32 1.5, %v1026_v5  ;;  %v1994_v5 = vld [vmem:[%s5600_s18 + $0x58] sm:$0xff] }
 0x6e6   :  { %v1028_v54 = vmul.f32 %v3775_v1, %v1027_v6  ;;  %v2042_v6 = vld [vmem:[%s5600_s18 + $0x1d8] sm:$0xff] }
 0x6e8   :  { %v1032_v60 = vsel %vm1031_vm14, %v3775_v1, %v1028_v54  ;;  %v2043_v1 = vld [vmem:[%s5600_s18 + $0x1e0] sm:$0xff]  ;;  %v2028_v54 = vld [vmem:[%s5600_s18 + $0x168] sm:$0xff] }
 0x6e9   :  { %v1033_v61 = vmul.f32 %v1032_v60, %v1021_v55  ;;  %v2012_v55 = vld [vmem:[%s5600_s18 + $0xe8] sm:$0xff]  ;;  %v1993_v60 = vld [vmem:[%s5600_s18 + $0x50] sm:$0xff] }
 0x6eb   :  { %v1035_v52 = vmul.f32 %v1033_v61, %v1000_v40  ;;  %v1038_v56 = vperm.slane %v1033_v61, 0  ;;  %v1086_v40 = vld [vmem:[%s5599_s16 + $0xf8] sm:$0xff]  ;;  %v2041_v61 = vld [vmem:[%s5600_s18 + $0x1d0] sm:$0xff] }
 0x6ed   :  { %v1036_v4 = vsub.f32 %v1034_v7, %v1035_v52  ;;  %v1040_v14 = vmul.f32 %v1038_v56, %v4426_v9  ;;  %v1041_v28 = vmul.f32 %v1038_v56, %v4424_v8  ;;  %v1042_v32 = vmul.f32 %v1038_v56, %v4428_v10  ;;  %v2011_v7 = vld [vmem:[%s5600_s18 + $0xe0] sm:$0xff] }
 0x6ee   :  { %v1043_v10 = vmul.f32 %v1038_v56, %v4445_v22  ;;  %v1080_v22 = vld [vmem:[%s5599_s16 + $0xc8] sm:$0xff]  ;;  %v2027_v52 = vld [vmem:[%s5600_s18 + $0x160] sm:$0xff] }
 0x6ef   :  { %v1045_v15 = vperm.slane %v1036_v4, 0  ;;  %v1992_v56 = vld [vmem:[%s5600_s18 + $0x48] sm:$0xff] }
 0x6f0   :  { %v2040_v4 = vld [vmem:[%s5600_s18 + $0x1c8] sm:$0xff] }
 0x6f1   :  { %v1047_v25 = vadd.f32 %v1045_v15, %v1040_v14  ;;  %v1048_v9 = vadd.f32 %v1045_v15, %v1041_v28  ;;  %v1049_v8 = vadd.f32 %v1045_v15, %v1042_v32  ;;  %v1050_v20 = vadd.f32 %v1045_v15, %v1043_v10  ;;  %v2039_v14 = vld [vmem:[%s5600_s18 + $0x1c0] sm:$0xff]  ;;  %v2009_v15 = vld [vmem:[%s5600_s18 + $0xd0] sm:$0xff]  ;;  %v2006_v10 = vld [vmem:[%s5600_s18 + $0xb8] sm:$0xff] }
 0x6f2   :  { %v2037_v28 = vld [vmem:[%s5600_s18 + $0x1b0] sm:$0xff]  ;;  %v2023_v32 = vld [vmem:[%s5600_s18 + $0x140] sm:$0xff] }
 0x6f3   :  { %v4473_v26 = vmax.f32 %v1047_v25, 0.0  ;;  %v4484_v31 = vmax.f32 %v1048_v9, 0.0  ;;  %v4495_v18 = vmax.f32 %v1049_v8, 0.0  ;;  %v4506_v23 = vmax.f32 %v1050_v20, 0.0  ;;  %v1989_v25 = vld [vmem:[%s5600_s18 + $0x30] sm:$0xff]  ;;  %v2007_v9 = vld [vmem:[%s5600_s18 + $0xc0] sm:$0xff] }
 0x6f4   :  { %v2036_v8 = vld [vmem:[%s5600_s18 + $0x1a8] sm:$0xff]  ;;  %v2022_v20 = vld [vmem:[%s5600_s18 + $0x138] sm:$0xff] }
 0x6f5   :  { %3592 = vmatmul.msk.f32.vlgmr.msra.gmra.mxu0 %vm311_vm3, %v4473_v26  ;;  %3596 = vmatmul.msk.f32.vlgmr.msrb.gmra.mxu2 %vm311_vm3, %v4473_v26 }
 0x6f6   :  { %3600 = vmatmul.msk.f32.vlgmr.msrb.gmra.mxu3 %vm311_vm3, %v4473_v26  ;;  %3604 = vmatmul.msk.f32.vlgmr.msrb.gmra.mxu1 %vm311_vm3, %v4473_v26 }
 0x6f7   :  { %1410 = vmatpush.msrb.mxu2 %v1080_v22  ;;  %1439 = vmatpush.msrb.mxu3 %v1081_v33  ;;  %v1987_v22 = vld [vmem:[%s5600_s18 + $0x20] sm:$0xff] }
 0x6f8   :  { %1381 = vmatpush.msra.mxu0 %v1079_v34  ;;  %1468 = vmatpush.msrb.mxu1 %v1082_v27  ;;  %v2035_v33 = vld [vmem:[%s5600_s18 + $0x1a0] sm:$0xff]  ;;  %v2005_v34 = vld [vmem:[%s5600_s18 + $0xb0] sm:$0xff] }
 0x6f9   :  { %1411 = vmatpush.msrb.mxu2 %v1064_v30  ;;  %1440 = vmatpush.msrb.mxu3 %v1065_v35  ;;  %v2021_v27 = vld [vmem:[%s5600_s18 + $0x130] sm:$0xff]  ;;  %v2034_v30 = vld [vmem:[%s5600_s18 + $0x198] sm:$0xff]  ;;  %v2004_v35 = vld [vmem:[%s5600_s18 + $0xa8] sm:$0xff] }
 0x6fa   :  { %1382 = vmatpush.msra.mxu0 %v1063_v29  ;;  %1469 = vmatpush.msrb.mxu1 %v1066_v36  ;;  %v1986_v29 = vld [vmem:[%s5600_s18 + $0x18] sm:$0xff]  ;;  %v2020_v36 = vld [vmem:[%s5600_s18 + $0x128] sm:$0xff] }
 0x6fd   :  { %3593 = vmatmul.msk.f32.gmra.mxu0 %vm311_vm3, %v4484_v31  ;;  %3597 = vmatmul.msk.f32.gmra.mxu2 %vm311_vm3, %v4484_v31 }
 0x6fe   :  { %3601 = vmatmul.msk.f32.gmra.mxu3 %vm311_vm3, %v4484_v31  ;;  %3605 = vmatmul.msk.f32.gmra.mxu1 %vm311_vm3, %v4484_v31 }
 0x705   :  { %3594 = vmatmul.msk.f32.gmra.mxu0 %vm311_vm3, %v4495_v18  ;;  %3598 = vmatmul.msk.f32.gmra.mxu2 %vm311_vm3, %v4495_v18 }
 0x706   :  { %3602 = vmatmul.msk.f32.gmra.mxu3 %vm311_vm3, %v4495_v18  ;;  %3606 = vmatmul.msk.f32.gmra.mxu1 %vm311_vm3, %v4495_v18 }
 0x70d   :  { %3595 = vmatmul.msk.f32.gmra.mxu0 %vm311_vm3, %v4506_v23  ;;  %3599 = vmatmul.msk.f32.gmra.mxu2 %vm311_vm3, %v4506_v23 }
 0x70e   :  { %3603 = vmatmul.msk.f32.gmra.mxu3 %vm311_vm3, %v4506_v23  ;;  %3607 = vmatmul.msk.f32.gmra.mxu1 %vm311_vm3, %v4506_v23 }
 0x715   :  { %3608 = vmatmul.msk.f32.vlgmr.msrb.gmra.mxu0 %vm311_vm3, %v4473_v26  ;;  %3612 = vmatmul.msk.f32.vlgmr.msra.gmra.mxu2 %vm311_vm3, %v4473_v26 }
 0x716   :  { %3616 = vmatmul.msk.f32.vlgmr.msra.gmra.mxu3 %vm311_vm3, %v4473_v26  ;;  %3620 = vmatmul.msk.f32.vlgmr.msra.gmra.mxu1 %vm311_vm3, %v4473_v26 }
 0x717   :  { %1526 = vmatpush.msra.mxu2 %v1084_v37  ;;  %1555 = vmatpush.msra.mxu3 %v1085_v38  ;;  %v2033_v37 = vld [vmem:[%s5600_s18 + $0x190] sm:$0xff]  ;;  %v2003_v38 = vld [vmem:[%s5600_s18 + $0xa0] sm:$0xff] }
 0x718   :  { %1497 = vmatpush.msrb.mxu0 %v1083_v39  ;;  %1584 = vmatpush.msra.mxu1 %v1086_v40  ;;  %v2019_v39 = vld [vmem:[%s5600_s18 + $0x120] sm:$0xff]  ;;  %v1984_v40 = vld [vmem:[%s5600_s18 + $0x8] sm:$0xff] }
 0x719   :  { %1527 = vmatpush.msra.mxu2 %v1068_v43  ;;  %1556 = vmatpush.msra.mxu3 %v1069_v44  ;;  %v2002_v43 = vld [vmem:[%s5600_s18 + $0x98] sm:$0xff] }
 0x71a   :  { %1498 = vmatpush.msrb.mxu0 %v1067_v41  ;;  %1585 = vmatpush.msra.mxu1 %v1070_v45  ;;  %v2032_v41 = vld [vmem:[%s5600_s18 + $0x188] sm:$0xff]  ;;  %v2018_v44 = vld [vmem:[%s5600_s18 + $0x118] sm:$0xff]  ;;  %v1983_v45 = vld [vmem:[%s5600_s18] sm:$0xff] }
 0x71d   :  { %3609 = vmatmul.msk.f32.gmra.mxu0 %vm311_vm3, %v4484_v31  ;;  %3613 = vmatmul.msk.f32.gmra.mxu2 %vm311_vm3, %v4484_v31 }
 0x71e   :  { %3617 = vmatmul.msk.f32.gmra.mxu3 %vm311_vm3, %v4484_v31  ;;  %3621 = vmatmul.msk.f32.gmra.mxu1 %vm311_vm3, %v4484_v31 }
 0x725   :  { %3610 = vmatmul.msk.f32.gmra.mxu0 %vm311_vm3, %v4495_v18  ;;  %3614 = vmatmul.msk.f32.gmra.mxu2 %vm311_vm3, %v4495_v18 }
 0x726   :  { %3618 = vmatmul.msk.f32.gmra.mxu3 %vm311_vm3, %v4495_v18  ;;  %3622 = vmatmul.msk.f32.gmra.mxu1 %vm311_vm3, %v4495_v18 }
 0x72d   :  { %3611 = vmatmul.msk.f32.gmra.mxu0 %vm311_vm3, %v4506_v23  ;;  %3615 = vmatmul.msk.f32.gmra.mxu2 %vm311_vm3, %v4506_v23 }
 0x72e   :  { %3619 = vmatmul.msk.f32.gmra.mxu3 %vm311_vm3, %v4506_v23  ;;  %3623 = vmatmul.msk.f32.gmra.mxu1 %vm311_vm3, %v4506_v23 }
 0x735   :  { %3624 = vmatmul.msk.f32.vlgmr.msra.gmra.mxu0 %vm311_vm3, %v4473_v26  ;;  %3628 = vmatmul.msk.f32.vlgmr.msrb.gmra.mxu2 %vm311_vm3, %v4473_v26 }
 0x736   :  { %3632 = vmatmul.msk.f32.vlgmr.msrb.gmra.mxu3 %vm311_vm3, %v4473_v26  ;;  %3636 = vmatmul.msk.f32.vlgmr.msrb.gmra.mxu1 %vm311_vm3, %v4473_v26 }
 0x737   :  { %2243 = vmatpush.msra.mxu0 %v1998_v46  ;;  %2330 = vmatpush.msrb.mxu1 %v2046_v47  ;;  %v2031_v46 = vld [vmem:[%s5600_s18 + $0x180] sm:$0xff]  ;;  %v2001_v47 = vld [vmem:[%s5600_s18 + $0x90] sm:$0xff] }
 0x738   :  { %2272 = vmatpush.msrb.mxu2 %v2014_v62  ;;  %2301 = vmatpush.msrb.mxu3 %v2030_v0  ;;  %v2061_v62 = vld [vmem:[%s5600_s18 + $0x270] sm:$0xff] }
 0x739   :  { %2244 = vmatpush.msra.mxu0 %v1997_v48  ;;  %2331 = vmatpush.msrb.mxu1 %v2045_v49  ;;  %v2017_v48 = vld [vmem:[%s5600_s18 + $0x110] sm:$0xff]  ;;  %v2062_v49 = vld [vmem:[%s5600_s18 + $0x278] sm:$0xff] }
 0x73a   :  { %2273 = vmatpush.msrb.mxu2 %v2013_v2  ;;  %2302 = vmatpush.msrb.mxu3 %v2029_v3  ;;  %v2109_v0 = vld [vmem:[%s5600_s18 + $0x3f0] sm:$0xff]  ;;  %v1999_v2 = vld [vmem:[%s5600_s18 + $0x80] sm:$0xff] }
 0x73b   :  { %2245 = vmatpush.msra.mxu0 %v1996_v50  ;;  %2332 = vmatpush.msrb.mxu1 %v2044_v51  ;;  %v2110_v50 = vld [vmem:[%s5600_s18 + $0x3f8] sm:$0xff]  ;;  %v2000_v51 = vld [vmem:[%s5600_s18 + $0x88] sm:$0xff]  ;;  %v2015_v3 = vld [vmem:[%s5600_s18 + $0x100] sm:$0xff] }
 0x73c   :  { %2274 = vmatpush.msrb.mxu2 %v2012_v55  ;;  %2303 = vmatpush.msrb.mxu3 %v2028_v54  ;;  %v2078_v55 = vld [vmem:[%s5600_s18 + $0x2f8] sm:$0xff] }
 0x73d   :  { %3625 = vmatmul.msk.f32.gmra.mxu0 %vm311_vm3, %v4484_v31  ;;  %3629 = vmatmul.msk.f32.gmra.mxu2 %vm311_vm3, %v4484_v31  ;;  %v2094_v54 = vld [vmem:[%s5600_s18 + $0x378] sm:$0xff] }
 0x73e   :  { %3633 = vmatmul.msk.f32.gmra.mxu3 %vm311_vm3, %v4484_v31  ;;  %3637 = vmatmul.msk.f32.gmra.mxu1 %vm311_vm3, %v4484_v31 }
 0x73f   :  { %2246 = vmatpush.msra.mxu0 %v1995_v53  ;;  %2333 = vmatpush.msrb.mxu1 %v2043_v1  ;;  %v2016_v53 = vld [vmem:[%s5600_s18 + $0x108] sm:$0xff] }
 0x740   :  { %2275 = vmatpush.msrb.mxu2 %v2011_v7  ;;  %2304 = vmatpush.msrb.mxu3 %v2027_v52  ;;  %v2107_v7 = vld [vmem:[%s5600_s18 + $0x3e0] sm:$0xff] }
 0x741   :  { %2247 = vmatpush.msra.mxu0 %v1994_v5  ;;  %2334 = vmatpush.msrb.mxu1 %v2042_v6  ;;  %v2060_v6 = vld [vmem:[%s5600_s18 + $0x268] sm:$0xff] }
 0x742   :  { %2276 = vmatpush.msrb.mxu2 %v2010_v11  ;;  %2305 = vmatpush.msrb.mxu3 %v2026_v12  ;;  %v2093_v11 = vld [vmem:[%s5600_s18 + $0x370] sm:$0xff] }
 0x743   :  { %2248 = vmatpush.msra.mxu0 %v1993_v60  ;;  %2335 = vmatpush.msrb.mxu1 %v2041_v61  ;;  %v2059_v61 = vld [vmem:[%s5600_s18 + $0x260] sm:$0xff] }
 0x744   :  { %2277 = vmatpush.msrb.mxu2 %v2009_v15  ;;  %2306 = vmatpush.msrb.mxu3 %v2025_v16 }
 0x745   :  { %3626 = vmatmul.msk.f32.gmra.mxu0 %vm311_vm3, %v4495_v18  ;;  %3630 = vmatmul.msk.f32.gmra.mxu2 %vm311_vm3, %v4495_v18 }
 0x746   :  { %3634 = vmatmul.msk.f32.gmra.mxu3 %vm311_vm3, %v4495_v18  ;;  %3638 = vmatmul.msk.f32.gmra.mxu1 %vm311_vm3, %v4495_v18 }
 0x747   :  { %2249 = vmatpush.msra.mxu0 %v1992_v56  ;;  %2336 = vmatpush.msrb.mxu1 %v2040_v4  ;;  %v2077_v4 = vld [vmem:[%s5600_s18 + $0x2f0] sm:$0xff] }
 0x748   :  { %2278 = vmatpush.msrb.mxu2 %v2008_v21  ;;  %2307 = vmatpush.msrb.mxu3 %v2024_v24 }
 0x749   :  { %2250 = vmatpush.msra.mxu0 %v1991_v13  ;;  %2337 = vmatpush.msrb.mxu1 %v2039_v14  ;;  %v2058_v13 = vld [vmem:[%s5600_s18 + $0x258] sm:$0xff] }
 0x74a   :  { %2279 = vmatpush.msrb.mxu2 %v2007_v9  ;;  %2308 = vmatpush.msrb.mxu3 %v2023_v32  ;;  %v2106_v14 = vld [vmem:[%s5600_s18 + $0x3d8] sm:$0xff]  ;;  %v2075_v9 = vld [vmem:[%s5600_s18 + $0x2e0] sm:$0xff] }
 0x74b   :  { %2251 = vmatpush.msra.mxu0 %v1990_v17  ;;  %2338 = vmatpush.msrb.mxu1 %v2038_v19  ;;  %v2076_v17 = vld [vmem:[%s5600_s18 + $0x2e8] sm:$0xff]  ;;  %v2091_v32 = vld [vmem:[%s5600_s18 + $0x360] sm:$0xff] }
 0x74c   :  { %2280 = vmatpush.msrb.mxu2 %v2006_v10  ;;  %2309 = vmatpush.msrb.mxu3 %v2022_v20  ;;  %v2092_v19 = vld [vmem:[%s5600_s18 + $0x368] sm:$0xff] }
 0x74d   :  { %3627 = vmatmul.msk.f32.gmra.mxu0 %vm311_vm3, %v4506_v23  ;;  %3631 = vmatmul.msk.f32.gmra.mxu2 %vm311_vm3, %v4506_v23  ;;  %v2104_v10 = vld [vmem:[%s5600_s18 + $0x3c8] sm:$0xff] }
 0x74e   :  { %3635 = vmatmul.msk.f32.gmra.mxu3 %vm311_vm3, %v4506_v23  ;;  %3639 = vmatmul.msk.f32.gmra.mxu1 %vm311_vm3, %v4506_v23 }
 0x74f   :  { %2252 = vmatpush.msra.mxu0 %v1989_v25  ;;  %2339 = vmatpush.msrb.mxu1 %v2037_v28  ;;  %v2057_v25 = vld [vmem:[%s5600_s18 + $0x250] sm:$0xff] }
 0x750   :  { %2281 = vmatpush.msrb.mxu2 %v2005_v34  ;;  %2310 = vmatpush.msrb.mxu3 %v2021_v27  ;;  %v2105_v28 = vld [vmem:[%s5600_s18 + $0x3d0] sm:$0xff]  ;;  %v2090_v34 = vld [vmem:[%s5600_s18 + $0x358] sm:$0xff] }
 0x751   :  { %2340 = vmatpush.msrb.mxu1 %v2036_v8  ;;  %v2056_v8 = vld [vmem:[%s5600_s18 + $0x248] sm:$0xff] }
 0x752   :  { %2282 = vmatpush.msrb.mxu2 %v2004_v35  ;;  %2311 = vmatpush.msrb.mxu3 %v2020_v36  ;;  %v2103_v35 = vld [vmem:[%s5600_s18 + $0x3c0] sm:$0xff] }
 0x753   :  { %2341 = vmatpush.msrb.mxu1 %v2035_v33  ;;  %v2074_v33 = vld [vmem:[%s5600_s18 + $0x2d8] sm:$0xff]  ;;  %v1663_v36 = vld [vmem:[%s5602_s23] sm:$0xff] }
 0x754   :  { %2283 = vmatpush.msrb.mxu2 %v2003_v38  ;;  %2312 = vmatpush.msrb.mxu3 %v2019_v39  ;;  %v2073_v39 = vld [vmem:[%s5600_s18 + $0x2d0] sm:$0xff] }
 0x755   :  { %3640 = vmatmul.msk.f32.vlgmr.msrb.gmra.mxu0 %vm311_vm3, %v4473_v26  ;;  %3644 = vmatmul.msk.f32.vlgmr.msra.gmra.mxu2 %vm311_vm3, %v4473_v26 }
 0x756   :  { %3648 = vmatmul.msk.f32.vlgmr.msra.gmra.mxu3 %vm311_vm3, %v4473_v26  ;;  %3652 = vmatmul.msk.f32.vlgmr.msra.gmra.mxu1 %vm311_vm3, %v4473_v26  ;;  %v1988_v26 = vld [vmem:[%s5600_s18 + $0x28] sm:$0xff] }
 0x757   :  { %2253 = vmatpush.msra.mxu0 %v1988_v26  ;;  %2342 = vmatpush.msrb.mxu1 %v2034_v30  ;;  %v2055_v30 = vld [vmem:[%s5600_s18 + $0x240] sm:$0xff] }
 0x758   :  { %2284 = vmatpush.msrb.mxu2 %v2002_v43  ;;  %2313 = vmatpush.msrb.mxu3 %v2018_v44 }
 0x759   :  { %2254 = vmatpush.msra.mxu0 %v1987_v22  ;;  %2343 = vmatpush.msrb.mxu1 %v2033_v37 }
 0x75a   :  { %2285 = vmatpush.msrb.mxu2 %v2001_v47  ;;  %2314 = vmatpush.msrb.mxu3 %v2017_v48 }
 0x75b   :  { %2255 = vmatpush.msra.mxu0 %v1986_v29  ;;  %2344 = vmatpush.msrb.mxu1 %v2032_v41  ;;  %v1666_v41 = vld [vmem:[%s5602_s23 + $0x18] sm:$0xff] }
 0x75c   :  { %2286 = vmatpush.msrb.mxu2 %v2000_v51  ;;  %2315 = vmatpush.msrb.mxu3 %v2016_v53 }
 0x75d   :  { %3641 = vmatmul.msk.f32.gmra.mxu0 %vm311_vm3, %v4484_v31  ;;  %3645 = vmatmul.msk.f32.gmra.mxu2 %vm311_vm3, %v4484_v31 }
 0x75e   :  { %3649 = vmatmul.msk.f32.gmra.mxu3 %vm311_vm3, %v4484_v31  ;;  %3653 = vmatmul.msk.f32.gmra.mxu1 %vm311_vm3, %v4484_v31  ;;  %v1985_v31 = vld [vmem:[%s5600_s18 + $0x10] sm:$0xff] }
 0x75f   :  { %2256 = vmatpush.msra.mxu0 %v1985_v31  ;;  %2345 = vmatpush.msrb.mxu1 %v2031_v46  ;;  %v2102_v46 = vld [vmem:[%s5600_s18 + $0x3b8] sm:$0xff] }
 0x760   :  { %2287 = vmatpush.msrb.mxu2 %v1999_v2  ;;  %2316 = vmatpush.msrb.mxu3 %v2015_v3  ;;  %v2101_v2 = vld [vmem:[%s5600_s18 + $0x3b0] sm:$0xff] }
 0x761   :  { %2257 = vmatpush.msra.mxu0 %v1984_v40  ;;  %2446 = vmatpush.msra.mxu1 %v2110_v50  ;;  %v2089_v40 = vld [vmem:[%s5600_s18 + $0x350] sm:$0xff]  ;;  %v2088_v50 = vld [vmem:[%s5600_s18 + $0x348] sm:$0xff] }
 0x762   :  { %2388 = vmatpush.msra.mxu2 %v2078_v55  ;;  %2417 = vmatpush.msra.mxu3 %v2094_v54  ;;  %v2052_v54 = vld [vmem:[%s5600_s18 + $0x228] sm:$0xff] }
 0x763   :  { %2258 = vmatpush.msra.mxu0 %v1983_v45  ;;  %2447 = vmatpush.msra.mxu1 %v2109_v0  ;;  %v2054_v45 = vld [vmem:[%s5600_s18 + $0x238] sm:$0xff]  ;;  %v2053_v0 = vld [vmem:[%s5600_s18 + $0x230] sm:$0xff] }
 0x764   :  { %2389 = vmatpush.msra.mxu2 %v2077_v4  ;;  %2418 = vmatpush.msra.mxu3 %v2093_v11  ;;  %v2087_v4 = vld [vmem:[%s5600_s18 + $0x340] sm:$0xff]  ;;  %v2100_v11 = vld [vmem:[%s5600_s18 + $0x3a8] sm:$0xff] }
 0x765   :  { %3642 = vmatmul.msk.f32.gmra.mxu0 %vm311_vm3, %v4495_v18  ;;  %3646 = vmatmul.msk.f32.gmra.mxu2 %vm311_vm3, %v4495_v18 }
 0x766   :  { %3650 = vmatmul.msk.f32.gmra.mxu3 %vm311_vm3, %v4495_v18  ;;  %3654 = vmatmul.msk.f32.gmra.mxu1 %vm311_vm3, %v4495_v18  ;;  %v4681_v18 = vld [vmem:[%s5601_s22] sm:$0xff] }
 0x767   :  { %v4698_v1 = vperm.slane %v4681_v18, 0  ;;  %2359 = vmatpush.msrb.mxu0 %v2062_v49  ;;  %v4703_v5 = vperm.slane %v4681_v18, 3  ;;  %v4724_v16 = vperm.slane %v4681_v18, 1  ;;  %v4731_v24 = vperm.slane %v4681_v18, 2  ;;  %2390 = vmatpush.msra.mxu2 %v2076_v17  ;;  %v2072_v49 = vld [vmem:[%s5600_s18 + $0x2c8] sm:$0xff] }
 0x768   :  { %2419 = vmatpush.msra.mxu3 %v2092_v19 }
 0x769   :  { %2360 = vmatpush.msrb.mxu0 %v2061_v62  ;;  %2391 = vmatpush.msra.mxu2 %v2075_v9  ;;  %v2086_v9 = vld [vmem:[%s5600_s18 + $0x338] sm:$0xff] }
 0x76a   :  { %2420 = vmatpush.msra.mxu3 %v2091_v32  ;;  %v2099_v32 = vld [vmem:[%s5600_s18 + $0x3a0] sm:$0xff] }
 0x76b   :  { %2361 = vmatpush.msrb.mxu0 %v2060_v6  ;;  %2392 = vmatpush.msra.mxu2 %v2074_v33  ;;  %v2071_v6 = vld [vmem:[%s5600_s18 + $0x2c0] sm:$0xff]  ;;  %v1682_v33 = vld [vmem:[%s5602_s23 + $0x98] sm:$0xff] }
 0x76c   :  { %2421 = vmatpush.msra.mxu3 %v2090_v34  ;;  %v2050_v34 = vld [vmem:[%s5600_s18 + $0x218] sm:$0xff] }
 0x76d   :  { %3643 = vmatmul.msk.f32.gmra.mxu0 %vm311_vm3, %v4506_v23  ;;  %3647 = vmatmul.msk.f32.gmra.mxu2 %vm311_vm3, %v4506_v23 }
 0x76e   :  { %3651 = vmatmul.msk.f32.gmra.mxu3 %vm311_vm3, %v4506_v23  ;;  %3655 = vmatmul.msk.f32.gmra.mxu1 %vm311_vm3, %v4506_v23  ;;  %v2108_v23 = vld [vmem:[%s5600_s18 + $0x3e8] sm:$0xff] }
 0x76f   :  { %2448 = vmatpush.msra.mxu1 %v2108_v23  ;;  %2362 = vmatpush.msrb.mxu0 %v2059_v61  ;;  %v1664_v61 = vld [vmem:[%s5602_s23 + $0x8] sm:$0xff] }
 0x770   :  { %2393 = vmatpush.msra.mxu2 %v2073_v39  ;;  %2422 = vmatpush.msra.mxu3 %v2089_v40 }
 0x771   :  { %2449 = vmatpush.msra.mxu1 %v2107_v7  ;;  %2363 = vmatpush.msrb.mxu0 %v2058_v13 }
 0x772   :  { %v1152_v60 = vpop.f32.mrf.mxu0  ;;  %2394 = vmatpush.msra.mxu2 %v2072_v49  ;;  %2423 = vmatpush.msra.mxu3 %v2088_v50  ;;  %v2049_v49 = vld [vmem:[%s5600_s18 + $0x210] sm:$0xff] }
 0x773   :  { %v4712_v52 = vadd.f32 %v1152_v60, %v4698_v1  ;;  %v1239_v56 = vpop.f32.mrf.mxu1  ;;  %2450 = vmatpush.msra.mxu1 %v2106_v14  ;;  %2364 = vmatpush.msrb.mxu0 %v2057_v25 }
 0x774   :  { %v4717_v12 = vadd.f32 %v1239_v56, %v4703_v5  ;;  %2395 = vmatpush.msra.mxu2 %v2071_v6  ;;  %2424 = vmatpush.msra.mxu3 %v2087_v4  ;;  %v2048_v6 = vld [vmem:[%s5600_s18 + $0x208] sm:$0xff] }
 0x775   :  { %1599 = vst [vmem:[#allocation2] sm:$0xff] %v4712_v52  ;;  %v1727_v15 = vmul.f32 1.442695, %v4712_v52  ;;  %2451 = vmatpush.msra.mxu1 %v2105_v28  ;;  %2365 = vmatpush.msrb.mxu0 %v2056_v8  ;;  %v1679_v28 = vld [vmem:[%s5602_s23 + $0x80] sm:$0xff]  ;;  %v2096_v4 = vld [vmem:[%s5600_s18 + $0x388] sm:$0xff] }
 0x776   :  { %1602 = vst [vmem:[#allocation2 + $0x18] sm:$0xff] %v4717_v12  ;;  %v1733_v21 = vmul.f32 1.442695, %v4717_v12  ;;  %2425 = vmatpush.msra.mxu3 %v2086_v9  ;;  %v2082_v9 = vld [vmem:[%s5600_s18 + $0x318] sm:$0xff] }
 0x777   :  { %3776 = vpow2.f32 %v1727_v15  ;;  %2452 = vmatpush.msra.mxu1 %v2104_v10  ;;  %2366 = vmatpush.msrb.mxu0 %v2055_v30  ;;  %v2070_v15 = vld [vmem:[%s5600_s18 + $0x2b8] sm:$0xff] }
 0x778   :  { %3778 = vpow2.f32 %v1733_v21  ;;  %v1181_v26 = vpop.f32.mrf.mxu2  ;;  %2396 = vmatpush.msra.mxu2 %v2070_v15  ;;  %v1698_v15 = vld [vmem:[%s5602_s23 + $0x118] sm:$0xff] }
 0x779   :  { %v4740_v20 = vadd.f32 %v1181_v26, %v4724_v16  ;;  %v1210_v22 = vpop.f32.mrf.mxu3  ;;  %2453 = vmatpush.msra.mxu1 %v2103_v35  ;;  %2367 = vmatpush.msrb.mxu0 %v2054_v45 }
 0x77a   :  { %v4745_v27 = vadd.f32 %v1210_v22, %v4731_v24  ;;  %v1155_v29 = vpop.f32.mrf.mxu0 }
 0x77b   :  { %1600 = vst [vmem:[#allocation2 + $0x8] sm:$0xff] %v4740_v20  ;;  %v1729_v31 = vmul.f32 1.442695, %v4740_v20  ;;  %v4753_v37 = vadd.f32 %v1155_v29, %v4698_v1  ;;  %v1242_v38 = vpop.f32.mrf.mxu1  ;;  %2454 = vmatpush.msra.mxu1 %v2102_v46  ;;  %2368 = vmatpush.msrb.mxu0 %v2053_v0  ;;  %v2069_v29 = vld [vmem:[%s5600_s18 + $0x2b0] sm:$0xff] }
 0x77c   :  { %1601 = vst [vmem:[#allocation2 + $0x10] sm:$0xff] %v4745_v27  ;;  %v1731_v43 = vmul.f32 1.442695, %v4745_v27  ;;  %v4761_v44 = vadd.f32 %v1242_v38, %v4703_v5  ;;  %2397 = vmatpush.msra.mxu2 %v2069_v29  ;;  %v2097_v0 = vld [vmem:[%s5600_s18 + $0x390] sm:$0xff] }
 0x77d   :  { %v3777_v47 = vpop.eup %3776  ;;  %3780 = vpow2.f32 %v1729_v31  ;;  %1615 = vst [vmem:[#allocation2 + $0x80] sm:$0xff] %v4753_v37  ;;  %v1759_v48 = vmul.f32 1.442695, %v4753_v37  ;;  %2455 = vmatpush.msra.mxu1 %v2101_v2  ;;  %2369 = vmatpush.msrb.mxu0 %v2052_v54  ;;  %v2085_v31 = vld [vmem:[%s5600_s18 + $0x330] sm:$0xff] }
 0x77e   :  { %v3779_v51 = vpop.eup %3778  ;;  %v1855_v53 = vmul.f32 %v3777_v47, %v1663_v36  ;;  %3782 = vpow2.f32 %v1731_v43  ;;  %1618 = vst [vmem:[#allocation2 + $0x98] sm:$0xff] %v4761_v44  ;;  %v1765_v62 = vmul.f32 1.442695, %v4761_v44  ;;  %v2098_v43 = vld [vmem:[%s5600_s18 + $0x398] sm:$0xff]  ;;  %2426 = vmatpush.msra.mxu3 %v2085_v31  ;;  %v2081_v31 = vld [vmem:[%s5600_s18 + $0x310] sm:$0xff] }
 0x77f   :  { %v1858_v3 = vmul.f32 %v3779_v51, %v1666_v41  ;;  %3784 = vpow2.f32 %v1759_v48  ;;  %2456 = vmatpush.msra.mxu1 %v2100_v11 }
 0x780   :  { %v1919_v23 = vadd.f32 %v1855_v53, %v4712_v52  ;;  %3786 = vpow2.f32 %v1765_v62  ;;  %v1184_v55 = vpop.f32.mrf.mxu2  ;;  %v1665_v52 = vld [vmem:[%s5602_s23 + $0x10] sm:$0xff]  ;;  %v1680_v53 = vld [vmem:[%s5602_s23 + $0x88] sm:$0xff] }
 0x781   :  { %v1922_v60 = vadd.f32 %v1858_v3, %v4717_v12  ;;  %v4779_v7 = vadd.f32 %v1184_v55, %v4724_v16  ;;  %v1213_v56 = vpop.f32.mrf.mxu3  ;;  %v2051_v12 = vld [vmem:[%s5600_s18 + $0x220] sm:$0xff]  ;;  %2457 = vmatpush.msra.mxu1 %v2099_v32  ;;  %v2084_v62 = vld [vmem:[%s5600_s18 + $0x328] sm:$0xff]  ;;  %v1681_v3 = vld [vmem:[%s5602_s23 + $0x90] sm:$0xff] }
 0x782   :  { %v4785_v13 = vadd.f32 %v1213_v56, %v4731_v24  ;;  %v1158_v14 = vpop.f32.mrf.mxu0  ;;  %2259 = vmatmul.f32.vlgmr.msra.gmra.mxu0 %v1919_v23  ;;  %v2067_v23 = vld [vmem:[%s5600_s18 + $0x2a0] sm:$0xff]  ;;  %2427 = vmatpush.msra.mxu3 %v2084_v62 }
 0x783   :  { %v3781_v17 = vpop.eup %3780  ;;  %1616 = vst [vmem:[#allocation2 + $0x88] sm:$0xff] %v4779_v7  ;;  %v1761_v19 = vmul.f32 1.442695, %v4779_v7  ;;  %v4792_v21 = vadd.f32 %v1158_v14, %v4698_v1  ;;  %v1245_v25 = vpop.f32.mrf.mxu1  ;;  %2346 = vmatmul.f32.vlgmr.msrb.gmra.mxu1 %v1922_v60  ;;  %2370 = vmatpush.msrb.mxu0 %v2051_v12  ;;  %v2083_v56 = vld [vmem:[%s5600_s18 + $0x320] sm:$0xff] }
 0x784   :  { %v3783_v26 = vpop.eup %3782  ;;  %v1856_v8 = vmul.f32 %v3781_v17, %v1664_v61  ;;  %1617 = vst [vmem:[#allocation2 + $0x90] sm:$0xff] %v4785_v13  ;;  %v1763_v10 = vmul.f32 1.442695, %v4785_v13  ;;  %v4800_v22 = vadd.f32 %v1245_v25, %v4703_v5  ;;  %2458 = vmatpush.msra.mxu1 %v2098_v43  ;;  %v1695_v61 = vld [vmem:[%s5602_s23 + $0x100] sm:$0xff]  ;;  %v2066_v17 = vld [vmem:[%s5600_s18 + $0x298] sm:$0xff]  ;;  %2428 = vmatpush.msra.mxu3 %v2083_v56 }
 0x785   :  { %v3785_v30 = vpop.eup %3784  ;;  %v1857_v35 = vmul.f32 %v3783_v26, %v1665_v52  ;;  %3788 = vpow2.f32 %v1761_v19  ;;  %1631 = vst [vmem:[#allocation2 + $0x100] sm:$0xff] %v4792_v21  ;;  %v1791_v36 = vmul.f32 1.442695, %v4792_v21  ;;  %2371 = vmatpush.msrb.mxu0 %v2050_v34  ;;  %v4854_v34 = vperm.slane %v4681_v18, 4  ;;  %v2126_v43 = vld [vmem:[%s5600_s18 + $0x478] sm:$0xff] }
 0x786   :  { %v3787_v38 = vpop.eup %3786  ;;  %v1920_v39 = vadd.f32 %v1856_v8, %v4740_v20  ;;  %3790 = vpow2.f32 %v1763_v10  ;;  %1634 = vst [vmem:[#allocation2 + $0x118] sm:$0xff] %v4800_v22  ;;  %v1797_v40 = vmul.f32 1.442695, %v4800_v22  ;;  %v1871_v41 = vmul.f32 %v3785_v30, %v1679_v28  ;;  %v2068_v20 = vld [vmem:[%s5600_s18 + $0x2a8] sm:$0xff]  ;;  %2459 = vmatpush.msra.mxu1 %v2097_v0  ;;  %v2095_v10 = vld [vmem:[%s5600_s18 + $0x380] sm:$0xff]  ;;  %v2065_v30 = vld [vmem:[%s5600_s18 + $0x290] sm:$0xff]  ;;  %2429 = vmatpush.msra.mxu3 %v2082_v9 }
 0x787   :  { %v1921_v45 = vadd.f32 %v1857_v35, %v4745_v27  ;;  %3792 = vpow2.f32 %v1791_v36  ;;  %v1874_v46 = vmul.f32 %v3787_v38, %v1682_v33  ;;  %2398 = vmatpush.msra.mxu2 %v2068_v20  ;;  %2372 = vmatpush.msrb.mxu0 %v2049_v49  ;;  %v4858_v35 = vperm.slane %v4681_v18, 7  ;;  %v1711_v20 = vld [vmem:[%s5602_s23 + $0x180] sm:$0xff] }
 0x788   :  { %3794 = vpow2.f32 %v1797_v40  ;;  %v1187_v47 = vpop.f32.mrf.mxu2  ;;  %2288 = vmatmul.f32.vlgmr.msrb.gmra.mxu2 %v1920_v39  ;;  %v1935_v48 = vadd.f32 %v1871_v41, %v4753_v37  ;;  %2460 = vmatpush.msra.mxu1 %v2096_v4  ;;  %v1697_v41 = vld [vmem:[%s5602_s23 + $0x110] sm:$0xff]  ;;  %v2124_v4 = vld [vmem:[%s5600_s18 + $0x468] sm:$0xff] }
 0x789   :  { %v4817_v27 = vadd.f32 %v1187_v47, %v4724_v16  ;;  %v1216_v50 = vpop.f32.mrf.mxu3  ;;  %2317 = vmatmul.f32.vlgmr.msrb.gmra.mxu3 %v1921_v45  ;;  %v1938_v51 = vadd.f32 %v1874_v46, %v4761_v44  ;;  %2373 = vmatpush.msrb.mxu0 %v2048_v6  ;;  %v2174_v45 = vld [vmem:[%s5600_s18 + $0x5f8] sm:$0xff]  ;;  %v2064_v47 = vld [vmem:[%s5600_s18 + $0x288] sm:$0xff] }
 0x78a   :  { %v4824_v2 = vadd.f32 %v1216_v50, %v4731_v24  ;;  %v1161_v37 = vpop.f32.mrf.mxu0  ;;  %2262 = vmatmul.f32.gmra.mxu0 %v1935_v48  ;;  %2399 = vmatpush.msra.mxu2 %v2067_v23  ;;  %v4882_v50 = vperm.slane %v4681_v18, 5  ;;  %v1714_v6 = vld [vmem:[%s5602_s23 + $0x198] sm:$0xff]  ;;  %v2063_v23 = vld [vmem:[%s5600_s18 + $0x280] sm:$0xff] }
 0x78b   :  { %v3789_v55 = vpop.eup %3788  ;;  %1632 = vst [vmem:[#allocation2 + $0x108] sm:$0xff] %v4817_v27  ;;  %v1793_v44 = vmul.f32 1.442695, %v4817_v27  ;;  %v4832_v54 = vadd.f32 %v1161_v37, %v4698_v1  ;;  %v1248_v60 = vpop.f32.mrf.mxu1  ;;  %2349 = vmatmul.f32.gmra.mxu1 %v1938_v51  ;;  %v2047_v1 = vld [vmem:[%s5600_s18 + $0x200] sm:$0xff]  ;;  %2430 = vmatpush.msra.mxu3 %v2081_v31  ;;  %v2125_v51 = vld [vmem:[%s5600_s18 + $0x470] sm:$0xff] }
 0x78c   :  { %v3791_v11 = vpop.eup %3790  ;;  %1633 = vst [vmem:[#allocation2 + $0x110] sm:$0xff] %v4824_v2  ;;  %v1795_v52 = vmul.f32 1.442695, %v4824_v2  ;;  %v4840_v14 = vadd.f32 %v1248_v60, %v4703_v5  ;;  %v1872_v12 = vmul.f32 %v3789_v55, %v1680_v53  ;;  %2374 = vmatpush.msrb.mxu0 %v2047_v1  ;;  %2400 = vmatpush.msra.mxu2 %v2066_v17  ;;  %v2173_v53 = vld [vmem:[%s5600_s18 + $0x5f0] sm:$0xff]  ;;  %v2079_v55 = vld [vmem:[%s5600_s18 + $0x300] sm:$0xff]  ;;  %v2172_v1 = vld [vmem:[%s5600_s18 + $0x5e8] sm:$0xff] }
 0x78d   :  { %v3793_v19 = vpop.eup %3792  ;;  %3796 = vpow2.f32 %v1793_v44  ;;  %1647 = vst [vmem:[#allocation2 + $0x180] sm:$0xff] %v4832_v54  ;;  %v1823_v25 = vmul.f32 1.442695, %v4832_v54  ;;  %v1873_v28 = vmul.f32 %v3791_v11, %v1681_v3  ;;  %2461 = vmatpush.msra.mxu1 %v2095_v10 }
 0x78e   :  { %v3795_v5 = vpop.eup %3794  ;;  %3798 = vpow2.f32 %v1795_v52  ;;  %1650 = vst [vmem:[#allocation2 + $0x198] sm:$0xff] %v4840_v14  ;;  %v1829_v32 = vmul.f32 1.442695, %v4840_v14  ;;  %v1936_v26 = vadd.f32 %v1872_v12, %v4779_v7  ;;  %v1887_v8 = vmul.f32 %v3793_v19, %v1695_v61  ;;  %2401 = vmatpush.msra.mxu2 %v2065_v30  ;;  %2475 = vmatpush.msra.mxu0 %v2126_v43  ;;  %v2142_v19 = vld [vmem:[%s5600_s18 + $0x4f8] sm:$0xff]  ;;  %v2141_v30 = vld [vmem:[%s5600_s18 + $0x4f0] sm:$0xff] }
 0x78f   :  { %3800 = vpow2.f32 %v1823_v25  ;;  %v1937_v33 = vadd.f32 %v1873_v28, %v4785_v13  ;;  %v1890_v29 = vmul.f32 %v3795_v5, %v1698_v15  ;;  %v1696_v13 = vld [vmem:[%s5602_s23 + $0x108] sm:$0xff]  ;;  %2562 = vmatpush.msrb.mxu1 %v2174_v45  ;;  %v4897_v61 = vperm.slane %v4681_v18, 6  ;;  %v2123_v28 = vld [vmem:[%s5600_s18 + $0x460] sm:$0xff]  ;;  %v1670_v43 = vld [vmem:[%s5602_s23 + $0x38] sm:$0xff] }
 0x790   :  { %3802 = vpow2.f32 %v1829_v32  ;;  %v1190_v7 = vpop.f32.mrf.mxu2  ;;  %2291 = vmatmul.f32.gmra.mxu2 %v1936_v26  ;;  %v1951_v36 = vadd.f32 %v1887_v8, %v4792_v21  ;;  %2476 = vmatpush.msra.mxu0 %v2125_v51  ;;  %v1712_v32 = vld [vmem:[%s5602_s23 + $0x188] sm:$0xff]  ;;  %v2158_v26 = vld [vmem:[%s5600_s18 + $0x578] sm:$0xff]  ;;  %v2171_v8 = vld [vmem:[%s5600_s18 + $0x5e0] sm:$0xff] }
 0x791   :  { %v4864_v38 = vadd.f32 %v1190_v7, %v4724_v16  ;;  %v1219_v39 = vpop.f32.mrf.mxu3  ;;  %2320 = vmatmul.f32.gmra.mxu3 %v1937_v33  ;;  %v1954_v40 = vadd.f32 %v1890_v29, %v4800_v22  ;;  %v2080_v16 = vld [vmem:[%s5600_s18 + $0x308] sm:$0xff]  ;;  %2402 = vmatpush.msra.mxu2 %v2064_v47  ;;  %v1713_v33 = vld [vmem:[%s5602_s23 + $0x190] sm:$0xff]  ;;  %v2122_v29 = vld [vmem:[%s5600_s18 + $0x458] sm:$0xff] }
 0x792   :  { %v4871_v46 = vadd.f32 %v1219_v39, %v4731_v24  ;;  %v1268_v21 = vpop.f32.mrf.mxu0  ;;  %2265 = vmatmul.f32.gmra.mxu0 %v1951_v36  ;;  %2431 = vmatpush.msra.mxu3 %v2080_v16  ;;  %v1667_v36 = vld [vmem:[%s5602_s23 + $0x20] sm:$0xff]  ;;  %v2157_v39 = vld [vmem:[%s5600_s18 + $0x570] sm:$0xff]  ;;  %v2140_v16 = vld [vmem:[%s5600_s18 + $0x4e8] sm:$0xff] }
 0x793   :  { %v3797_v48 = vpop.eup %3796  ;;  %1648 = vst [vmem:[#allocation2 + $0x188] sm:$0xff] %v4864_v38  ;;  %v1825_v22 = vmul.f32 1.442695, %v4864_v38  ;;  %v4879_v49 = vadd.f32 %v1268_v21, %v4854_v34  ;;  %v1355_v24 = vpop.f32.mrf.mxu1  ;;  %2352 = vmatmul.f32.gmra.mxu1 %v1954_v40  ;;  %2403 = vmatpush.msra.mxu2 %v2063_v23  ;;  %v2170_v40 = vld [vmem:[%s5600_s18 + $0x5d8] sm:$0xff]  ;;  %v2121_v47 = vld [vmem:[%s5600_s18 + $0x450] sm:$0xff]  ;;  %v2156_v51 = vld [vmem:[%s5600_s18 + $0x568] sm:$0xff] }
 0x794   :  { %v3799_v62 = vpop.eup %3798  ;;  %1649 = vst [vmem:[#allocation2 + $0x190] sm:$0xff] %v4871_v46  ;;  %v1827_v0 = vmul.f32 1.442695, %v4871_v46  ;;  %v4889_v37 = vadd.f32 %v1355_v24, %v4858_v35  ;;  %v1888_v3 = vmul.f32 %v3797_v48, %v1696_v13  ;;  %2563 = vmatpush.msrb.mxu1 %v2173_v53  ;;  %2432 = vmatpush.msra.mxu3 %v2079_v55 }
 0x795   :  { %v3801_v44 = vpop.eup %3800  ;;  %3804 = vpow2.f32 %v1825_v22  ;;  %1603 = vst [vmem:[#allocation2 + $0x20] sm:$0xff] %v4879_v49  ;;  %v1735_v60 = vmul.f32 1.442695, %v4879_v49  ;;  %v1889_v56 = vmul.f32 %v3799_v62, %v1697_v41  ;;  %2477 = vmatpush.msra.mxu0 %v2124_v4  ;;  %2504 = vmatpush.msrb.mxu2 %v2142_v19 }
 0x796   :  { %v3803_v11 = vpop.eup %3802  ;;  %3806 = vpow2.f32 %v1827_v0  ;;  %1606 = vst [vmem:[#allocation2 + $0x38] sm:$0xff] %v4889_v37  ;;  %v1741_v52 = vmul.f32 1.442695, %v4889_v37  ;;  %v1952_v12 = vadd.f32 %v1888_v3, %v4817_v27  ;;  %v1903_v15 = vmul.f32 %v3801_v44, %v1711_v20  ;;  %2564 = vmatpush.msrb.mxu1 %v2172_v1  ;;  %2533 = vmatpush.msrb.mxu3 %v2158_v26  ;;  %v2139_v44 = vld [vmem:[%s5600_s18 + $0x4e0] sm:$0xff] }
 0x797   :  { %3808 = vpow2.f32 %v1735_v60  ;;  %v1953_v18 = vadd.f32 %v1889_v56, %v4824_v2  ;;  %v1906_v17 = vmul.f32 %v3803_v11, %v1714_v6  ;;  %2478 = vmatpush.msra.mxu0 %v2123_v28  ;;  %2505 = vmatpush.msrb.mxu2 %v2141_v30  ;;  %v2169_v6 = vld [vmem:[%s5600_s18 + $0x5d0] sm:$0xff]  ;;  %v1668_v11 = vld [vmem:[%s5602_s23 + $0x28] sm:$0xff]  ;;  %v2118_v30 = vld [vmem:[%s5600_s18 + $0x438] sm:$0xff] }
 0x798   :  { %3810 = vpow2.f32 %v1741_v52  ;;  %v1297_v25 = vpop.f32.mrf.mxu2  ;;  %2294 = vmatmul.f32.gmra.mxu2 %v1952_v12  ;;  %v1967_v27 = vadd.f32 %v1903_v15, %v4832_v54  ;;  %2565 = vmatpush.msrb.mxu1 %v2171_v8  ;;  %v2155_v12 = vld [vmem:[%s5600_s18 + $0x560] sm:$0xff]  ;;  %v2168_v15 = vld [vmem:[%s5600_s18 + $0x5c8] sm:$0xff] }
 0x799   :  { %v4909_v9 = vadd.f32 %v1297_v25, %v4882_v50  ;;  %v1326_v2 = vpop.f32.mrf.mxu3  ;;  %2323 = vmatmul.f32.gmra.mxu3 %v1953_v18  ;;  %v1970_v5 = vadd.f32 %v1906_v17, %v4840_v14  ;;  %2479 = vmatpush.msra.mxu0 %v2122_v29  ;;  %v2138_v17 = vld [vmem:[%s5600_s18 + $0x4d8] sm:$0xff] }
 0x79a   :  { %v4916_v10 = vadd.f32 %v1326_v2, %v4897_v61  ;;  %v1271_v54 = vpop.f32.mrf.mxu0  ;;  %2268 = vmatmul.f32.gmra.mxu0 %v1967_v27  ;;  %2534 = vmatpush.msrb.mxu3 %v2157_v39  ;;  %v1683_v2 = vld [vmem:[%s5602_s23 + $0xa0] sm:$0xff]  ;;  %v1686_v29 = vld [vmem:[%s5602_s23 + $0xb8] sm:$0xff]  ;;  %v2153_v39 = vld [vmem:[%s5600_s18 + $0x550] sm:$0xff] }
 0x79b   :  { %v3805_v7 = vpop.eup %3804  ;;  %1604 = vst [vmem:[#allocation2 + $0x28] sm:$0xff] %v4909_v9  ;;  %v1737_v14 = vmul.f32 1.442695, %v4909_v9  ;;  %v4925_v13 = vadd.f32 %v1271_v54, %v4854_v34  ;;  %v1358_v31 = vpop.f32.mrf.mxu1  ;;  %2355 = vmatmul.f32.gmra.mxu1 %v1970_v5  ;;  %2480 = vmatpush.msra.mxu0 %v2121_v47  ;;  %v2154_v5 = vld [vmem:[%s5600_s18 + $0x558] sm:$0xff] }
 0x79c   :  { %v3807_v41 = vpop.eup %3806  ;;  %1605 = vst [vmem:[#allocation2 + $0x30] sm:$0xff] %v4916_v10  ;;  %v1739_v45 = vmul.f32 1.442695, %v4916_v10  ;;  %v4933_v21 = vadd.f32 %v1358_v31, %v4858_v35  ;;  %v1904_v20 = vmul.f32 %v3805_v7, %v1712_v32  ;;  %2566 = vmatpush.msrb.mxu1 %v2170_v40  ;;  %2506 = vmatpush.msrb.mxu2 %v2140_v16  ;;  %v2167_v32 = vld [vmem:[%s5600_s18 + $0x5c0] sm:$0xff]  ;;  %v2137_v7 = vld [vmem:[%s5600_s18 + $0x4d0] sm:$0xff] }
 0x79d   :  { %v3809_v48 = vpop.eup %3808  ;;  %3812 = vpow2.f32 %v1737_v14  ;;  %1619 = vst [vmem:[#allocation2 + $0xa0] sm:$0xff] %v4925_v13  ;;  %v1767_v22 = vmul.f32 1.442695, %v4925_v13  ;;  %v1905_v24 = vmul.f32 %v3807_v41, %v1713_v33  ;;  %2535 = vmatpush.msrb.mxu3 %v2156_v51  ;;  %v2117_v51 = vld [vmem:[%s5600_s18 + $0x430] sm:$0xff] }
 0x79e   :  { %v3811_v53 = vpop.eup %3810  ;;  %v1859_v62 = vmul.f32 %v3809_v48, %v1667_v36  ;;  %3814 = vpow2.f32 %v1739_v45  ;;  %1622 = vst [vmem:[#allocation2 + $0xb8] sm:$0xff] %v4933_v21  ;;  %v1773_v0 = vmul.f32 1.442695, %v4933_v21  ;;  %v1968_v3 = vadd.f32 %v1904_v20, %v4864_v38  ;;  %v2120_v38 = vld [vmem:[%s5600_s18 + $0x448] sm:$0xff]  ;;  %2567 = vmatpush.msrb.mxu1 %v2169_v6  ;;  %2507 = vmatpush.msrb.mxu2 %v2139_v44  ;;  %v2166_v20 = vld [vmem:[%s5600_s18 + $0x5b8] sm:$0xff]  ;;  %v2165_v6 = vld [vmem:[%s5600_s18 + $0x5b0] sm:$0xff] }
 0x79f   :  { %v1862_v23 = vmul.f32 %v3811_v53, %v1670_v43  ;;  %3816 = vpow2.f32 %v1767_v22  ;;  %v1969_v55 = vadd.f32 %v1905_v24, %v4871_v46  ;;  %2481 = vmatpush.msra.mxu0 %v2120_v38  ;;  %2536 = vmatpush.msrb.mxu3 %v2155_v12  ;;  %v1684_v24 = vld [vmem:[%s5602_s23 + $0xa8] sm:$0xff] }
 0x7a0   :  { %v1923_v60 = vadd.f32 %v1859_v62, %v4879_v49  ;;  %3818 = vpow2.f32 %v1773_v0  ;;  %v1300_v56 = vpop.f32.mrf.mxu2  ;;  %2297 = vmatmul.f32.gmra.mxu2 %v1968_v3  ;;  %v1669_v49 = vld [vmem:[%s5602_s23 + $0x30] sm:$0xff]  ;;  %2568 = vmatpush.msrb.mxu1 %v2168_v15  ;;  %v2152_v3 = vld [vmem:[%s5600_s18 + $0x548] sm:$0xff] }
 0x7a1   :  { %v1926_v4 = vadd.f32 %v1862_v23, %v4889_v37  ;;  %v4951_v46 = vadd.f32 %v1300_v56, %v4882_v50  ;;  %v1329_v52 = vpop.f32.mrf.mxu3  ;;  %2326 = vmatmul.f32.gmra.mxu3 %v1969_v55  ;;  %v2119_v37 = vld [vmem:[%s5600_s18 + $0x440] sm:$0xff]  ;;  %2508 = vmatpush.msrb.mxu2 %v2138_v17  ;;  %v1685_v0 = vld [vmem:[%s5602_s23 + $0xb0] sm:$0xff]  ;;  %v2116_v44 = vld [vmem:[%s5600_s18 + $0x428] sm:$0xff] }
 0x7a2   :  { %v4957_v1 = vadd.f32 %v1329_v52, %v4897_v61  ;;  %v1274_v18 = vpop.f32.mrf.mxu0  ;;  %2375 = vmatmul.f32.vlgmr.msrb.gmra.mxu0 %v1923_v60  ;;  %2537 = vmatpush.msrb.mxu3 %v2154_v5  ;;  %v1699_v55 = vld [vmem:[%s5602_s23 + $0x120] sm:$0xff]  ;;  %v2164_v12 = vld [vmem:[%s5600_s18 + $0x5a8] sm:$0xff]  ;;  %v2150_v5 = vld [vmem:[%s5600_s18 + $0x538] sm:$0xff] }
 0x7a3   :  { %v3813_v19 = vpop.eup %3812  ;;  %1620 = vst [vmem:[#allocation2 + $0xa8] sm:$0xff] %v4951_v46  ;;  %v1769_v25 = vmul.f32 1.442695, %v4951_v46  ;;  %v4964_v27 = vadd.f32 %v1274_v18, %v4854_v34  ;;  %v1361_v28 = vpop.f32.mrf.mxu1  ;;  %2462 = vmatmul.f32.vlgmr.msra.gmra.mxu1 %v1926_v4  ;;  %2482 = vmatpush.msra.mxu0 %v2119_v37  ;;  %v2135_v60 = vld [vmem:[%s5600_s18 + $0x4c0] sm:$0xff]  ;;  %v5016_v17 = vld [vmem:[%s5601_s22 + $0x8] sm:$0xff] }
 0x7a4   :  { %v3815_v26 = vpop.eup %3814  ;;  %v1860_v8 = vmul.f32 %v3813_v19, %v1668_v11  ;;  %1621 = vst [vmem:[#allocation2 + $0xb0] sm:$0xff] %v4957_v1  ;;  %v1771_v54 = vmul.f32 1.442695, %v4957_v1  ;;  %v4972_v33 = vadd.f32 %v1361_v28, %v4858_v35  ;;  %2569 = vmatpush.msrb.mxu1 %v2167_v32  ;;  %2509 = vmatpush.msrb.mxu2 %v2137_v7  ;;  %v1702_v11 = vld [vmem:[%s5602_s23 + $0x138] sm:$0xff]  ;;  %v2151_v52 = vld [vmem:[%s5600_s18 + $0x540] sm:$0xff] }
 0x7a5   :  { %v3817_v36 = vpop.eup %3816  ;;  %v1861_v14 = vmul.f32 %v3815_v26, %v1669_v49  ;;  %3820 = vpow2.f32 %v1769_v25  ;;  %1635 = vst [vmem:[#allocation2 + $0x120] sm:$0xff] %v4964_v27  ;;  %v1799_v31 = vmul.f32 1.442695, %v4964_v27  ;;  %2483 = vmatpush.msra.mxu0 %v2118_v30  ;;  %2538 = vmatpush.msrb.mxu3 %v2153_v39  ;;  %v2134_v19 = vld [vmem:[%s5600_s18 + $0x4b8] sm:$0xff]  ;;  %v5029_v30 = vperm.slane %v5016_v17, 0 }
 0x7a6   :  { %v3819_v40 = vpop.eup %3818  ;;  %v1924_v41 = vadd.f32 %v1860_v8, %v4909_v9  ;;  %3822 = vpow2.f32 %v1771_v54  ;;  %1638 = vst [vmem:[#allocation2 + $0x138] sm:$0xff] %v4972_v33  ;;  %v1805_v43 = vmul.f32 1.442695, %v4972_v33  ;;  %v1875_v45 = vmul.f32 %v3817_v36, %v1683_v2  ;;  %v2136_v9 = vld [vmem:[%s5600_s18 + $0x4c8] sm:$0xff]  ;;  %2570 = vmatpush.msrb.mxu1 %v2166_v20  ;;  %v2163_v54 = vld [vmem:[%s5600_s18 + $0x5a0] sm:$0xff]  ;;  %v2133_v36 = vld [vmem:[%s5600_s18 + $0x4b0] sm:$0xff] }
 0x7a7   :  { %v1925_v47 = vadd.f32 %v1861_v14, %v4916_v10  ;;  %3824 = vpow2.f32 %v1799_v31  ;;  %v1878_v16 = vmul.f32 %v3819_v40, %v1686_v29  ;;  %2510 = vmatpush.msrb.mxu2 %v2136_v9  ;;  %2484 = vmatpush.msra.mxu0 %v2117_v51  ;;  %v5033_v14 = vperm.slane %v5016_v17, 3  ;;  %v2162_v20 = vld [vmem:[%s5600_s18 + $0x598] sm:$0xff]  ;;  %v2113_v9 = vld [vmem:[%s5600_s18 + $0x410] sm:$0xff]  ;;  %v1715_v51 = vld [vmem:[%s5602_s23 + $0x1a0] sm:$0xff] }
 0x7a8   :  { %3826 = vpow2.f32 %v1805_v43  ;;  %v1303_v48 = vpop.f32.mrf.mxu2  ;;  %2404 = vmatmul.f32.vlgmr.msra.gmra.mxu2 %v1924_v41  ;;  %v1939_v22 = vadd.f32 %v1875_v45, %v4925_v13  ;;  %2539 = vmatpush.msrb.mxu3 %v2152_v3  ;;  %v1700_v43 = vld [vmem:[%s5602_s23 + $0x128] sm:$0xff]  ;;  %v2149_v45 = vld [vmem:[%s5600_s18 + $0x530] sm:$0xff] }
 0x7a9   :  { %v4990_v10 = vadd.f32 %v1303_v48, %v4882_v50  ;;  %v1332_v53 = vpop.f32.mrf.mxu3  ;;  %2433 = vmatmul.f32.vlgmr.msra.gmra.mxu3 %v1925_v47  ;;  %v1942_v62 = vadd.f32 %v1878_v16, %v4933_v21  ;;  %2571 = vmatpush.msrb.mxu1 %v2165_v6  ;;  %v5048_v16 = vperm.slane %v5016_v17, 1  ;;  %v2132_v48 = vld [vmem:[%s5600_s18 + $0x4a8] sm:$0xff] }
 0x7aa   :  { %v4997_v13 = vadd.f32 %v1332_v53, %v4897_v61  ;;  %v1277_v23 = vpop.f32.mrf.mxu0  ;;  %2378 = vmatmul.f32.gmra.mxu0 %v1939_v22  ;;  %2511 = vmatpush.msrb.mxu2 %v2135_v60  ;;  %v2148_v53 = vld [vmem:[%s5600_s18 + $0x528] sm:$0xff]  ;;  %v2131_v60 = vld [vmem:[%s5600_s18 + $0x4a0] sm:$0xff] }
 0x7ab   :  { %v3821_v56 = vpop.eup %3820  ;;  %1636 = vst [vmem:[#allocation2 + $0x128] sm:$0xff] %v4990_v10  ;;  %v1801_v21 = vmul.f32 1.442695, %v4990_v10  ;;  %v5005_v38 = vadd.f32 %v1277_v23, %v4854_v34  ;;  %v1364_v4 = vpop.f32.mrf.mxu1  ;;  %2465 = vmatmul.f32.gmra.mxu1 %v1942_v62  ;;  %v2115_v34 = vld [vmem:[%s5600_s18 + $0x420] sm:$0xff]  ;;  %2485 = vmatpush.msra.mxu0 %v2116_v44  ;;  %v2161_v62 = vld [vmem:[%s5600_s18 + $0x590] sm:$0xff]  ;;  %v2112_v44 = vld [vmem:[%s5600_s18 + $0x408] sm:$0xff] }
 0x7ac   :  { %v3823_v15 = vpop.eup %3822  ;;  %1637 = vst [vmem:[#allocation2 + $0x130] sm:$0xff] %v4997_v13  ;;  %v1803_v49 = vmul.f32 1.442695, %v4997_v13  ;;  %v5013_v18 = vadd.f32 %v1364_v4, %v4858_v35  ;;  %v1876_v37 = vmul.f32 %v3821_v56, %v1684_v24  ;;  %2540 = vmatpush.msrb.mxu3 %v2151_v52  ;;  %2572 = vmatpush.msrb.mxu1 %v2164_v12  ;;  %v5072_v4 = vperm.slane %v5016_v17, 2  ;;  %v2147_v52 = vld [vmem:[%s5600_s18 + $0x520] sm:$0xff] }
 0x7ad   :  { %v3825_v25 = vpop.eup %3824  ;;  %3828 = vpow2.f32 %v1801_v21  ;;  %1651 = vst [vmem:[#allocation2 + $0x1a0] sm:$0xff] %v5005_v38  ;;  %v1831_v28 = vmul.f32 1.442695, %v5005_v38  ;;  %v1877_v2 = vmul.f32 %v3823_v15, %v1685_v0  ;;  %2486 = vmatpush.msra.mxu0 %v2115_v34  ;;  %2512 = vmatpush.msrb.mxu2 %v2134_v19  ;;  %v2160_v34 = vld [vmem:[%s5600_s18 + $0x588] sm:$0xff] }
 0x7ae   :  { %v3827_v35 = vpop.eup %3826  ;;  %3830 = vpow2.f32 %v1803_v49  ;;  %1654 = vst [vmem:[#allocation2 + $0x1b8] sm:$0xff] %v5013_v18  ;;  %v1837_v32 = vmul.f32 1.442695, %v5013_v18  ;;  %v1940_v26 = vadd.f32 %v1876_v37, %v4951_v46  ;;  %v1891_v8 = vmul.f32 %v3825_v25, %v1699_v55  ;;  %2541 = vmatpush.msrb.mxu3 %v2150_v5  ;;  %2573 = vmatpush.msrb.mxu1 %v2163_v54  ;;  %v1718_v55 = vld [vmem:[%s5602_s23 + $0x1b8] sm:$0xff]  ;;  %v2111_v5 = vld [vmem:[%s5600_s18 + $0x400] sm:$0xff] }
 0x7af   :  { %3832 = vpow2.f32 %v1831_v28  ;;  %v1941_v29 = vadd.f32 %v1877_v2, %v4957_v1  ;;  %v1894_v7 = vmul.f32 %v3827_v35, %v1702_v11  ;;  %v2114_v1 = vld [vmem:[%s5600_s18 + $0x418] sm:$0xff]  ;;  %2513 = vmatpush.msrb.mxu2 %v2133_v36  ;;  %v2159_v54 = vld [vmem:[%s5600_s18 + $0x580] sm:$0xff]  ;;  %v2129_v36 = vld [vmem:[%s5600_s18 + $0x490] sm:$0xff] }
 0x7b0   :  { %3834 = vpow2.f32 %v1837_v32  ;;  %v1306_v46 = vpop.f32.mrf.mxu2  ;;  %2407 = vmatmul.f32.gmra.mxu2 %v1940_v26  ;;  %v1955_v31 = vadd.f32 %v1891_v8, %v4964_v27  ;;  %2487 = vmatpush.msra.mxu0 %v2114_v1  ;;  %v2130_v28 = vld [vmem:[%s5600_s18 + $0x498] sm:$0xff]  ;;  %v1716_v26 = vld [vmem:[%s5602_s23 + $0x1a8] sm:$0xff]  ;;  %v1671_v1 = vld [vmem:[%s5602_s23 + $0x40] sm:$0xff] }
 0x7b1   :  { %v5038_v39 = vadd.f32 %v1306_v46, %v4882_v50  ;;  %v1335_v40 = vpop.f32.mrf.mxu3  ;;  %2436 = vmatmul.f32.gmra.mxu3 %v1941_v29  ;;  %v1958_v41 = vadd.f32 %v1894_v7, %v4972_v33  ;;  %v1701_v50 = vld [vmem:[%s5602_s23 + $0x130] sm:$0xff]  ;;  %2574 = vmatpush.msrb.mxu1 %v2162_v20  ;;  %v2146_v8 = vld [vmem:[%s5600_s18 + $0x518] sm:$0xff] }
 0x7b2   :  { %v5045_v47 = vadd.f32 %v1335_v40, %v4897_v61  ;;  %v1384_v27 = vpop.f32.mrf.mxu0  ;;  %2381 = vmatmul.f32.gmra.mxu0 %v1955_v31  ;;  %2542 = vmatpush.msrb.mxu3 %v2149_v45  ;;  %v1717_v7 = vld [vmem:[%s5602_s23 + $0x1b0] sm:$0xff]  ;;  %v2190_v46 = vld [vmem:[%s5600_s18 + $0x678] sm:$0xff] }
 0x7b3   :  { %v3829_v33 = vpop.eup %3828  ;;  %1652 = vst [vmem:[#allocation2 + $0x1a8] sm:$0xff] %v5038_v39  ;;  %v1833_v22 = vmul.f32 1.442695, %v5038_v39  ;;  %v5056_v61 = vadd.f32 %v1384_v27, %v5029_v30  ;;  %v1471_v24 = vpop.f32.mrf.mxu1  ;;  %2468 = vmatmul.f32.gmra.mxu1 %v1958_v41  ;;  %2488 = vmatpush.msra.mxu0 %v2113_v9  ;;  %v2238_v45 = vld [vmem:[%s5600_s18 + $0x7f8] sm:$0xff] }
 0x7b4   :  { %v3831_v0 = vpop.eup %3830  ;;  %1653 = vst [vmem:[#allocation2 + $0x1b0] sm:$0xff] %v5045_v47  ;;  %v1835_v3 = vmul.f32 1.442695, %v5045_v47  ;;  %v5064_v6 = vadd.f32 %v1471_v24, %v5033_v14  ;;  %v1892_v23 = vmul.f32 %v3829_v33, %v1700_v43  ;;  %2514 = vmatpush.msrb.mxu2 %v2132_v48  ;;  %2543 = vmatpush.msrb.mxu3 %v2148_v53  ;;  %v2145_v43 = vld [vmem:[%s5600_s18 + $0x510] sm:$0xff]  ;;  %v1674_v27 = vld [vmem:[%s5602_s23 + $0x58] sm:$0xff]  ;;  %v2128_v33 = vld [vmem:[%s5600_s18 + $0x488] sm:$0xff] }
 0x7b5   :  { %v3833_v56 = vpop.eup %3832  ;;  %3836 = vpow2.f32 %v1833_v22  ;;  %1607 = vst [vmem:[#allocation2 + $0x40] sm:$0xff] %v5056_v61  ;;  %v1743_v21 = vmul.f32 1.442695, %v5056_v61  ;;  %v1893_v11 = vmul.f32 %v3831_v0, %v1701_v50  ;;  %2575 = vmatpush.msrb.mxu1 %v2161_v62  ;;  %2489 = vmatpush.msra.mxu0 %v2112_v44  ;;  %v2189_v22 = vld [vmem:[%s5600_s18 + $0x670] sm:$0xff]  ;;  %v2144_v62 = vld [vmem:[%s5600_s18 + $0x508] sm:$0xff] }
 0x7b6   :  { %v3835_v12 = vpop.eup %3834  ;;  %3838 = vpow2.f32 %v1835_v3  ;;  %1610 = vst [vmem:[#allocation2 + $0x58] sm:$0xff] %v5064_v6  ;;  %v1749_v15 = vmul.f32 1.442695, %v5064_v6  ;;  %v1956_v49 = vadd.f32 %v1892_v23, %v4990_v10  ;;  %v1907_v37 = vmul.f32 %v3833_v56, %v1715_v51  ;;  %2515 = vmatpush.msrb.mxu2 %v2131_v60  ;;  %2544 = vmatpush.msrb.mxu3 %v2147_v52  ;;  %v2237_v44 = vld [vmem:[%s5600_s18 + $0x7f0] sm:$0xff] }
 0x7b7   :  { %3840 = vpow2.f32 %v1743_v21  ;;  %v1957_v19 = vadd.f32 %v1893_v11, %v4997_v13  ;;  %v1910_v25 = vmul.f32 %v3835_v12, %v1718_v55  ;;  %2576 = vmatpush.msrb.mxu1 %v2160_v34  ;;  %2490 = vmatpush.msra.mxu0 %v2111_v5  ;;  %v2127_v21 = vld [vmem:[%s5600_s18 + $0x480] sm:$0xff]  ;;  %v2236_v34 = vld [vmem:[%s5600_s18 + $0x7e8] sm:$0xff] }
 0x7b8   :  { %3842 = vpow2.f32 %v1749_v15  ;;  %v1413_v2 = vpop.f32.mrf.mxu2  ;;  %2410 = vmatmul.f32.gmra.mxu2 %v1956_v49  ;;  %v1971_v10 = vadd.f32 %v1907_v37, %v5005_v38  ;;  %2545 = vmatpush.msrb.mxu3 %v2146_v8  ;;  %v1672_v15 = vld [vmem:[%s5602_s23 + $0x48] sm:$0xff]  ;;  %v1687_v8 = vld [vmem:[%s5602_s23 + $0xc0] sm:$0xff] }
 0x7b9   :  { %v5084_v35 = vadd.f32 %v1413_v2, %v5048_v16  ;;  %v1442_v13 = vpop.f32.mrf.mxu3  ;;  %2439 = vmatmul.f32.gmra.mxu3 %v1957_v19  ;;  %v1974_v32 = vadd.f32 %v1910_v25, %v5013_v18  ;;  %2516 = vmatpush.msrb.mxu2 %v2130_v28  ;;  %v2188_v37 = vld [vmem:[%s5600_s18 + $0x668] sm:$0xff]  ;;  %v2222_v28 = vld [vmem:[%s5600_s18 + $0x778] sm:$0xff] }
 0x7ba   :  { %v5091_v29 = vadd.f32 %v1442_v13, %v5072_v4  ;;  %v1387_v38 = vpop.f32.mrf.mxu0  ;;  %2384 = vmatmul.f32.gmra.mxu0 %v1971_v10  ;;  %2577 = vmatpush.msrb.mxu1 %v2159_v54 }
 0x7bb   :  { %v3837_v31 = vpop.eup %3836  ;;  %1608 = vst [vmem:[#allocation2 + $0x48] sm:$0xff] %v5084_v35  ;;  %v1745_v18 = vmul.f32 1.442695, %v5084_v35  ;;  %v5100_v40 = vadd.f32 %v1387_v38, %v5029_v30  ;;  %v1474_v41 = vpop.f32.mrf.mxu1  ;;  %2471 = vmatmul.f32.gmra.mxu1 %v1974_v32  ;;  %2517 = vmatpush.msrb.mxu2 %v2129_v36  ;;  %v2187_v32 = vld [vmem:[%s5600_s18 + $0x660] sm:$0xff] }
 0x7bc   :  { %v3839_v20 = vpop.eup %3838  ;;  %1609 = vst [vmem:[#allocation2 + $0x50] sm:$0xff] %v5091_v29  ;;  %v1747_v50 = vmul.f32 1.442695, %v5091_v29  ;;  %v5108_v9 = vadd.f32 %v1474_v41, %v5033_v14  ;;  %v1908_v48 = vmul.f32 %v3837_v31, %v1716_v26  ;;  %2591 = vmatpush.msrb.mxu0 %v2190_v46  ;;  %2546 = vmatpush.msrb.mxu3 %v2145_v43  ;;  %v2235_v26 = vld [vmem:[%s5600_s18 + $0x7e0] sm:$0xff]  ;;  %v1690_v46 = vld [vmem:[%s5602_s23 + $0xd8] sm:$0xff]  ;;  %v2205_v31 = vld [vmem:[%s5600_s18 + $0x6f0] sm:$0xff] }
 0x7bd   :  { %v3841_v24 = vpop.eup %3840  ;;  %3844 = vpow2.f32 %v1745_v18  ;;  %1623 = vst [vmem:[#allocation2 + $0xc0] sm:$0xff] %v5100_v40  ;;  %v1775_v51 = vmul.f32 1.442695, %v5100_v40  ;;  %v1909_v53 = vmul.f32 %v3839_v20, %v1717_v7  ;;  %2678 = vmatpush.msra.mxu1 %v2238_v45  ;;  %2518 = vmatpush.msrb.mxu2 %v2128_v33  ;;  %v2186_v45 = vld [vmem:[%s5600_s18 + $0x658] sm:$0xff] }
 0x7be   :  { %v3843_v0 = vpop.eup %3842  ;;  %v1863_v3 = vmul.f32 %v3841_v24, %v1671_v1  ;;  %3846 = vpow2.f32 %v1747_v50  ;;  %1626 = vst [vmem:[#allocation2 + $0xd8] sm:$0xff] %v5108_v9  ;;  %v1781_v23 = vmul.f32 1.442695, %v5108_v9  ;;  %v1972_v55 = vadd.f32 %v1908_v48, %v5038_v39  ;;  %2592 = vmatpush.msrb.mxu0 %v2189_v22  ;;  %2547 = vmatpush.msrb.mxu3 %v2144_v62  ;;  %v2143_v39 = vld [vmem:[%s5600_s18 + $0x500] sm:$0xff]  ;;  %v2221_v1 = vld [vmem:[%s5600_s18 + $0x770] sm:$0xff]  ;;  %v2234_v33 = vld [vmem:[%s5600_s18 + $0x7d8] sm:$0xff] }
 0x7bf   :  { %v1866_v60 = vmul.f32 %v3843_v0, %v1674_v27  ;;  %3848 = vpow2.f32 %v1775_v51  ;;  %v1973_v56 = vadd.f32 %v1909_v53, %v5045_v47  ;;  %2679 = vmatpush.msra.mxu1 %v2237_v44  ;;  %2519 = vmatpush.msrb.mxu2 %v2127_v21  ;;  %v2185_v62 = vld [vmem:[%s5600_s18 + $0x650] sm:$0xff]  ;;  %v1688_v44 = vld [vmem:[%s5602_s23 + $0xc8] sm:$0xff]  ;;  %v2203_v21 = vld [vmem:[%s5600_s18 + $0x6e0] sm:$0xff] }
 0x7c0   :  { %v1927_v11 = vadd.f32 %v1863_v3, %v5056_v61  ;;  %3850 = vpow2.f32 %v1781_v23  ;;  %v1416_v52 = vpop.f32.mrf.mxu2  ;;  %2413 = vmatmul.f32.gmra.mxu2 %v1972_v55  ;;  %v1673_v61 = vld [vmem:[%s5602_s23 + $0x50] sm:$0xff]  ;;  %2548 = vmatpush.msrb.mxu3 %v2143_v39  ;;  %v2220_v23 = vld [vmem:[%s5600_s18 + $0x768] sm:$0xff] }
 0x7c1   :  { %v1930_v12 = vadd.f32 %v1866_v60, %v5064_v6  ;;  %v5126_v47 = vadd.f32 %v1416_v52, %v5048_v16  ;;  %v1445_v49 = vpop.f32.mrf.mxu3  ;;  %2442 = vmatmul.f32.gmra.mxu3 %v1973_v56  ;;  %v2206_v6 = vld [vmem:[%s5600_s18 + $0x6f8] sm:$0xff]  ;;  %2593 = vmatpush.msrb.mxu0 %v2188_v37  ;;  %v2233_v55 = vld [vmem:[%s5600_s18 + $0x7d0] sm:$0xff]  ;;  %v2184_v56 = vld [vmem:[%s5600_s18 + $0x648] sm:$0xff] }
 0x7c2   :  { %v5132_v19 = vadd.f32 %v1445_v49, %v5072_v4  ;;  %v1390_v25 = vpop.f32.mrf.mxu0  ;;  %2491 = vmatmul.f32.vlgmr.msra.gmra.mxu0 %v1927_v11  ;;  %2680 = vmatpush.msra.mxu1 %v2236_v34  ;;  %v1689_v11 = vld [vmem:[%s5602_s23 + $0xd0] sm:$0xff]  ;;  %v2232_v49 = vld [vmem:[%s5600_s18 + $0x7c8] sm:$0xff]  ;;  %v1703_v37 = vld [vmem:[%s5602_s23 + $0x140] sm:$0xff] }
 0x7c3   :  { %v3845_v2 = vpop.eup %3844  ;;  %1624 = vst [vmem:[#allocation2 + $0xc8] sm:$0xff] %v5126_v47  ;;  %v1777_v10 = vmul.f32 1.442695, %v5126_v47  ;;  %v5139_v5 = vadd.f32 %v1390_v25, %v5029_v30  ;;  %v1477_v13 = vpop.f32.mrf.mxu1  ;;  %2578 = vmatmul.f32.vlgmr.msrb.gmra.mxu1 %v1930_v12  ;;  %2620 = vmatpush.msra.mxu2 %v2206_v6  ;;  %v2183_v6 = vld [vmem:[%s5600_s18 + $0x640] sm:$0xff] }
 0x7c4   :  { %v3847_v54 = vpop.eup %3846  ;;  %v1864_v38 = vmul.f32 %v3845_v2, %v1672_v15  ;;  %1625 = vst [vmem:[#allocation2 + $0xd0] sm:$0xff] %v5132_v19  ;;  %v1779_v7 = vmul.f32 1.442695, %v5132_v19  ;;  %v5147_v36 = vadd.f32 %v1477_v13, %v5033_v14  ;;  %2649 = vmatpush.msra.mxu3 %v2222_v28  ;;  %2594 = vmatpush.msrb.mxu0 %v2187_v32  ;;  %v2219_v15 = vld [vmem:[%s5600_s18 + $0x760] sm:$0xff]  ;;  %v2202_v28 = vld [vmem:[%s5600_s18 + $0x6d8] sm:$0xff] }
 0x7c5   :  { %v3849_v18 = vpop.eup %3848  ;;  %v1865_v41 = vmul.f32 %v3847_v54, %v1673_v61  ;;  %3852 = vpow2.f32 %v1777_v10  ;;  %1639 = vst [vmem:[#allocation2 + $0x140] sm:$0xff] %v5139_v5  ;;  %v1807_v43 = vmul.f32 1.442695, %v5139_v5  ;;  %2681 = vmatpush.msra.mxu1 %v2235_v26  ;;  %2621 = vmatpush.msra.mxu2 %v2205_v31  ;;  %v1706_v2 = vld [vmem:[%s5602_s23 + $0x158] sm:$0xff]  ;;  %v5201_v31 = vperm.slane %v5016_v17, 4 }
 0x7c6   :  { %v3851_v20 = vpop.eup %3850  ;;  %v1928_v27 = vadd.f32 %v1864_v38, %v5084_v35  ;;  %3854 = vpow2.f32 %v1779_v7  ;;  %1642 = vst [vmem:[#allocation2 + $0x158] sm:$0xff] %v5147_v36  ;;  %v1813_v50 = vmul.f32 1.442695, %v5147_v36  ;;  %v1879_v48 = vmul.f32 %v3849_v18, %v1687_v8  ;;  %2650 = vmatpush.msra.mxu3 %v2221_v1  ;;  %v2204_v35 = vld [vmem:[%s5600_s18 + $0x6e8] sm:$0xff]  ;;  %2595 = vmatpush.msrb.mxu0 %v2186_v45  ;;  %v2218_v26 = vld [vmem:[%s5600_s18 + $0x758] sm:$0xff]  ;;  %v2231_v38 = vld [vmem:[%s5600_s18 + $0x7c0] sm:$0xff] }
 0x7c7   :  { %v1929_v22 = vadd.f32 %v1865_v41, %v5091_v29  ;;  %3856 = vpow2.f32 %v1807_v43  ;;  %v1882_v24 = vmul.f32 %v3851_v20, %v1690_v46  ;;  %2682 = vmatpush.msra.mxu1 %v2234_v33  ;;  %2622 = vmatpush.msra.mxu2 %v2204_v35  ;;  %v2201_v18 = vld [vmem:[%s5600_s18 + $0x6d0] sm:$0xff]  ;;  %v2182_v43 = vld [vmem:[%s5600_s18 + $0x638] sm:$0xff]  ;;  %v1704_v33 = vld [vmem:[%s5602_s23 + $0x148] sm:$0xff] }
 0x7c8   :  { %3858 = vpow2.f32 %v1813_v50  ;;  %v1419_v51 = vpop.f32.mrf.mxu2  ;;  %2520 = vmatmul.f32.vlgmr.msrb.gmra.mxu2 %v1928_v27  ;;  %v1943_v53 = vadd.f32 %v1879_v48, %v5100_v40  ;;  %2596 = vmatpush.msrb.mxu0 %v2185_v62  ;;  %v2217_v45 = vld [vmem:[%s5600_s18 + $0x750] sm:$0xff]  ;;  %v2230_v48 = vld [vmem:[%s5600_s18 + $0x7b8] sm:$0xff] }
 0x7c9   :  { %v5164_v29 = vadd.f32 %v1419_v51, %v5048_v16  ;;  %v1448_v0 = vpop.f32.mrf.mxu3  ;;  %2549 = vmatmul.f32.vlgmr.msrb.gmra.mxu3 %v1929_v22  ;;  %v1946_v3 = vadd.f32 %v1882_v24, %v5108_v9  ;;  %2683 = vmatpush.msra.mxu1 %v2233_v55  ;;  %v1705_v22 = vld [vmem:[%s5602_s23 + $0x150] sm:$0xff]  ;;  %v2216_v51 = vld [vmem:[%s5600_s18 + $0x748] sm:$0xff] }
 0x7ca   :  { %v5171_v60 = vadd.f32 %v1448_v0, %v5072_v4  ;;  %v1393_v40 = vpop.f32.mrf.mxu0  ;;  %2494 = vmatmul.f32.gmra.mxu0 %v1943_v53  ;;  %2651 = vmatpush.msra.mxu3 %v2220_v23  ;;  %v2181_v35 = vld [vmem:[%s5600_s18 + $0x630] sm:$0xff]  ;;  %v1719_v23 = vld [vmem:[%s5602_s23 + $0x1c0] sm:$0xff] }
 0x7cb   :  { %v3853_v52 = vpop.eup %3852  ;;  %1640 = vst [vmem:[#allocation2 + $0x148] sm:$0xff] %v5164_v29  ;;  %v1809_v9 = vmul.f32 1.442695, %v5164_v29  ;;  %v5179_v39 = vadd.f32 %v1393_v40, %v5029_v30  ;;  %v1480_v12 = vpop.f32.mrf.mxu1  ;;  %2581 = vmatmul.f32.gmra.mxu1 %v1946_v3  ;;  %2597 = vmatpush.msrb.mxu0 %v2184_v56  ;;  %v2180_v3 = vld [vmem:[%s5600_s18 + $0x628] sm:$0xff]  ;;  %v2199_v56 = vld [vmem:[%s5600_s18 + $0x6c0] sm:$0xff] }
 0x7cc   :  { %v3855_v34 = vpop.eup %3854  ;;  %1641 = vst [vmem:[#allocation2 + $0x150] sm:$0xff] %v5171_v60  ;;  %v1811_v61 = vmul.f32 1.442695, %v5171_v60  ;;  %v5187_v25 = vadd.f32 %v1480_v12, %v5033_v14  ;;  %v1880_v30 = vmul.f32 %v3853_v52, %v1688_v44  ;;  %2623 = vmatpush.msra.mxu2 %v2203_v21  ;;  %2652 = vmatpush.msra.mxu3 %v2219_v15  ;;  %v5238_v21 = vperm.slane %v5016_v17, 5  ;;  %v1722_v52 = vld [vmem:[%s5602_s23 + $0x1d8] sm:$0xff]  ;;  %v2215_v15 = vld [vmem:[%s5600_s18 + $0x740] sm:$0xff] }
 0x7cd   :  { %v3857_v10 = vpop.eup %3856  ;;  %3860 = vpow2.f32 %v1809_v9  ;;  %1655 = vst [vmem:[#allocation2 + $0x1c0] sm:$0xff] %v5179_v39  ;;  %v1839_v13 = vmul.f32 1.442695, %v5179_v39  ;;  %v1881_v32 = vmul.f32 %v3855_v34, %v1689_v11  ;;  %2684 = vmatpush.msra.mxu1 %v2232_v49  ;;  %2598 = vmatpush.msrb.mxu0 %v2183_v6  ;;  %v2228_v49 = vld [vmem:[%s5600_s18 + $0x7a8] sm:$0xff] }
 0x7ce   :  { %v3859_v14 = vpop.eup %3858  ;;  %3862 = vpow2.f32 %v1811_v61  ;;  %1658 = vst [vmem:[#allocation2 + $0x1d8] sm:$0xff] %v5187_v25  ;;  %v1845_v8 = vmul.f32 1.442695, %v5187_v25  ;;  %v1944_v54 = vadd.f32 %v1880_v30, %v5126_v47  ;;  %v1895_v7 = vmul.f32 %v3857_v10, %v1703_v37  ;;  %2624 = vmatpush.msra.mxu2 %v2202_v28  ;;  %2653 = vmatpush.msra.mxu3 %v2218_v26  ;;  %v2198_v10 = vld [vmem:[%s5600_s18 + $0x6b8] sm:$0xff] }
 0x7cf   :  { %3864 = vpow2.f32 %v1839_v13  ;;  %v1945_v46 = vadd.f32 %v1881_v32, %v5132_v19  ;;  %v1898_v1 = vmul.f32 %v3859_v14, %v1706_v2  ;;  %v5205_v47 = vperm.slane %v5016_v17, 7  ;;  %2685 = vmatpush.msra.mxu1 %v2231_v38  ;;  %2599 = vmatpush.msrb.mxu0 %v2182_v43  ;;  %v2179_v2 = vld [vmem:[%s5600_s18 + $0x620] sm:$0xff]  ;;  %v2214_v26 = vld [vmem:[%s5600_s18 + $0x738] sm:$0xff]  ;;  %v1720_v38 = vld [vmem:[%s5602_s23 + $0x1c8] sm:$0xff] }
 0x7d0   :  { %3866 = vpow2.f32 %v1845_v8  ;;  %v1422_v41 = vpop.f32.mrf.mxu2  ;;  %2523 = vmatmul.f32.gmra.mxu2 %v1944_v54  ;;  %v1959_v19 = vadd.f32 %v1895_v7, %v5139_v5  ;;  %2654 = vmatpush.msra.mxu3 %v2217_v45  ;;  %v5246_v37 = vperm.slane %v5016_v17, 6  ;;  %v2227_v14 = vld [vmem:[%s5600_s18 + $0x7a0] sm:$0xff] }
 0x7d1   :  { %v5211_v20 = vadd.f32 %v1422_v41, %v5048_v16  ;;  %v1451_v27 = vpop.f32.mrf.mxu3  ;;  %2552 = vmatmul.f32.gmra.mxu3 %v1945_v46  ;;  %v1962_v50 = vadd.f32 %v1898_v1, %v5147_v36  ;;  %2625 = vmatpush.msra.mxu2 %v2201_v18  ;;  %v2200_v16 = vld [vmem:[%s5600_s18 + $0x6c8] sm:$0xff]  ;;  %v2178_v1 = vld [vmem:[%s5600_s18 + $0x618] sm:$0xff]  ;;  %v1721_v18 = vld [vmem:[%s5602_s23 + $0x1d0] sm:$0xff] }
 0x7d2   :  { %v5218_v24 = vadd.f32 %v1451_v27, %v5072_v4  ;;  %v1500_v5 = vpop.f32.mrf.mxu0  ;;  %2497 = vmatmul.f32.gmra.mxu0 %v1959_v19  ;;  %v2229_v4 = vld [vmem:[%s5600_s18 + $0x7b0] sm:$0xff]  ;;  %2686 = vmatpush.msra.mxu1 %v2230_v48  ;;  %v1675_v19 = vld [vmem:[%s5602_s23 + $0x60] sm:$0xff] }
 0x7d3   :  { %v3861_v53 = vpop.eup %3860  ;;  %1656 = vst [vmem:[#allocation2 + $0x1c8] sm:$0xff] %v5211_v20  ;;  %v1841_v36 = vmul.f32 1.442695, %v5211_v20  ;;  %v5226_v62 = vadd.f32 %v1500_v5, %v5201_v31  ;;  %v1587_v0 = vpop.f32.mrf.mxu1  ;;  %2584 = vmatmul.f32.gmra.mxu1 %v1962_v50  ;;  %2600 = vmatpush.msrb.mxu0 %v2181_v35  ;;  %v2213_v27 = vld [vmem:[%s5600_s18 + $0x730] sm:$0xff]  ;;  %v2226_v50 = vld [vmem:[%s5600_s18 + $0x798] sm:$0xff] }
 0x7d4   :  { %v3863_v55 = vpop.eup %3862  ;;  %1657 = vst [vmem:[#allocation2 + $0x1d0] sm:$0xff] %v5218_v24  ;;  %v1843_v44 = vmul.f32 1.442695, %v5218_v24  ;;  %v5234_v40 = vadd.f32 %v1587_v0, %v5205_v47  ;;  %v1896_v11 = vmul.f32 %v3861_v53, %v1704_v33  ;;  %2626 = vmatpush.msra.mxu2 %v2200_v16  ;;  %2655 = vmatpush.msra.mxu3 %v2216_v51  ;;  %v1678_v33 = vld [vmem:[%s5602_s23 + $0x78] sm:$0xff]  ;;  %v2177_v35 = vld [vmem:[%s5600_s18 + $0x610] sm:$0xff]  ;;  %v2196_v16 = vld [vmem:[%s5600_s18 + $0x6a8] sm:$0xff] }
 0x7d5   :  { %v3865_v9 = vpop.eup %3864  ;;  %3868 = vpow2.f32 %v1841_v36  ;;  %1611 = vst [vmem:[#allocation2 + $0x60] sm:$0xff] %v5226_v62  ;;  %v1751_v12 = vmul.f32 1.442695, %v5226_v62  ;;  %v1897_v34 = vmul.f32 %v3863_v55, %v1705_v22  ;;  %2687 = vmatpush.msra.mxu1 %v2229_v4  ;;  %2601 = vmatpush.msrb.mxu0 %v2180_v3  ;;  %v2212_v0 = vld [vmem:[%s5600_s18 + $0x728] sm:$0xff]  ;;  %v2225_v4 = vld [vmem:[%s5600_s18 + $0x790] sm:$0xff] }
 0x7d6   :  { %v3867_v61 = vpop.eup %3866  ;;  %3870 = vpow2.f32 %v1843_v44  ;;  %1614 = vst [vmem:[#allocation2 + $0x78] sm:$0xff] %v5234_v40  ;;  %v1757_v30 = vmul.f32 1.442695, %v5234_v40  ;;  %v1960_v6 = vadd.f32 %v1896_v11, %v5164_v29  ;;  %v1911_v28 = vmul.f32 %v3865_v9, %v1719_v23  ;;  %2627 = vmatpush.msra.mxu2 %v2199_v56  ;;  %2656 = vmatpush.msra.mxu3 %v2215_v15  ;;  %v2176_v56 = vld [vmem:[%s5600_s18 + $0x608] sm:$0xff]  ;;  %v2195_v11 = vld [vmem:[%s5600_s18 + $0x6a0] sm:$0xff] }
 0x7d7   :  { %3872 = vpow2.f32 %v1751_v12  ;;  %v1961_v17 = vadd.f32 %v1897_v34, %v5171_v60  ;;  %v1914_v13 = vmul.f32 %v3867_v61, %v1722_v52  ;;  %2688 = vmatpush.msra.mxu1 %v2228_v49  ;;  %2602 = vmatpush.msrb.mxu0 %v2179_v2  ;;  %v2211_v9 = vld [vmem:[%s5600_s18 + $0x720] sm:$0xff]  ;;  %v2224_v12 = vld [vmem:[%s5600_s18 + $0x788] sm:$0xff] }
 0x7d8   :  { %3874 = vpow2.f32 %v1757_v30  ;;  %v1529_v32 = vpop.f32.mrf.mxu2  ;;  %v1975_v29 = vadd.f32 %v1911_v28, %v5179_v39  ;;  %2526 = vmatmul.f32.gmra.mxu2 %v1960_v6  ;;  %v2197_v39 = vld [vmem:[%s5600_s18 + $0x6b0] sm:$0xff]  ;;  %2657 = vmatpush.msra.mxu3 %v2214_v26  ;;  %v1676_v61 = vld [vmem:[%s5602_s23 + $0x68] sm:$0xff]  ;;  %v2175_v28 = vld [vmem:[%s5600_s18 + $0x600] sm:$0xff] }
 0x7d9   :  { %v5258_v8 = vadd.f32 %v1529_v32, %v5238_v21  ;;  %v1558_v60 = vpop.f32.mrf.mxu3  ;;  %2555 = vmatmul.f32.gmra.mxu3 %v1961_v17  ;;  %v1978_v54 = vadd.f32 %v1914_v13, %v5187_v25  ;;  %2628 = vmatpush.msra.mxu2 %v2198_v10  ;;  %v2194_v17 = vld [vmem:[%s5600_s18 + $0x698] sm:$0xff]  ;;  %v2223_v32 = vld [vmem:[%s5600_s18 + $0x780] sm:$0xff] }
 0x7da   :  { %v5263_v7 = vadd.f32 %v1558_v60, %v5246_v37  ;;  %v1503_v46 = vpop.f32.mrf.mxu0  ;;  %2689 = vmatpush.msra.mxu1 %v2227_v14  ;;  %2500 = vmatmul.f32.gmra.mxu0 %v1975_v29  ;;  %v2210_v13 = vld [vmem:[%s5600_s18 + $0x718] sm:$0xff]  ;;  %v1691_v60 = vld [vmem:[%s5602_s23 + $0xe0] sm:$0xff] }
 0x7db   :  { %v3869_v41 = vpop.eup %3868  ;;  %1612 = vst [vmem:[#allocation2 + $0x68] sm:$0xff] %v5258_v8  ;;  %v1753_v25 = vmul.f32 1.442695, %v5258_v8  ;;  %v5272_v43 = vadd.f32 %v1503_v46, %v5201_v31  ;;  %v1590_v45 = vpop.f32.mrf.mxu1  ;;  %2587 = vmatmul.f32.gmra.mxu1 %v1978_v54  ;;  %2603 = vmatpush.msrb.mxu0 %v2178_v1 }
 0x7dc   :  { %v3871_v48 = vpop.eup %3870  ;;  %1613 = vst [vmem:[#allocation2 + $0x70] sm:$0xff] %v5263_v7  ;;  %v1755_v22 = vmul.f32 1.442695, %v5263_v7  ;;  %v5280_v5 = vadd.f32 %v1590_v45, %v5205_v47  ;;  %v1912_v51 = vmul.f32 %v3869_v41, %v1720_v38  ;;  %2629 = vmatpush.msra.mxu2 %v2197_v39  ;;  %2658 = vmatpush.msra.mxu3 %v2213_v27  ;;  %v2193_v39 = vld [vmem:[%s5600_s18 + $0x690] sm:$0xff]  ;;  %v1694_v41 = vld [vmem:[%s5602_s23 + $0xf8] sm:$0xff] }
 0x7dd   :  { %v3873_v53 = vpop.eup %3872  ;;  %3876 = vpow2.f32 %v1753_v25  ;;  %1627 = vst [vmem:[#allocation2 + $0xe0] sm:$0xff] %v5272_v43  ;;  %v1783_v36 = vmul.f32 1.442695, %v5272_v43  ;;  %v1913_v3 = vmul.f32 %v3871_v48, %v1721_v18  ;;  %2690 = vmatpush.msra.mxu1 %v2226_v50  ;;  %2604 = vmatpush.msrb.mxu0 %v2177_v35  ;;  %v2209_v18 = vld [vmem:[%s5600_s18 + $0x710] sm:$0xff]  ;;  %v2192_v48 = vld [vmem:[%s5600_s18 + $0x688] sm:$0xff] }
 0x7de   :  { %v3875_v23 = vpop.eup %3874  ;;  %v1867_v55 = vmul.f32 %v3873_v53, %v1675_v19  ;;  %3878 = vpow2.f32 %v1755_v22  ;;  %1630 = vst [vmem:[#allocation2 + $0xf8] sm:$0xff] %v5280_v5  ;;  %v1789_v44 = vmul.f32 1.442695, %v5280_v5  ;;  %2630 = vmatpush.msra.mxu2 %v2196_v16  ;;  %v1976_v15 = vadd.f32 %v1912_v51, %v5211_v20  ;;  %2659 = vmatpush.msra.mxu3 %v2212_v0  ;;  %v2191_v53 = vld [vmem:[%s5600_s18 + $0x680] sm:$0xff] }
 0x7df   :  { %v1870_v52 = vmul.f32 %v3875_v23, %v1678_v33  ;;  %3880 = vpow2.f32 %v1783_v36  ;;  %v1977_v49 = vadd.f32 %v1913_v3, %v5218_v24  ;;  %2691 = vmatpush.msra.mxu1 %v2225_v4  ;;  %2605 = vmatpush.msrb.mxu0 %v2176_v56  ;;  %v1677_v24 = vld [vmem:[%s5602_s23 + $0x70] sm:$0xff]  ;;  %v2208_v33 = vld [vmem:[%s5600_s18 + $0x708] sm:$0xff]  ;;  %v2207_v36 = vld [vmem:[%s5600_s18 + $0x700] sm:$0xff] }
 0x7e0   :  { %3882 = vpow2.f32 %v1789_v44  ;;  %v1532_v34 = vpop.f32.mrf.mxu2  ;;  %2631 = vmatpush.msra.mxu2 %v2195_v11  ;;  %v1931_v2 = vadd.f32 %v1867_v55, %v5226_v62  ;;  %2660 = vmatpush.msra.mxu3 %v2211_v9  ;;  %v1692_v23 = vld [vmem:[%s5602_s23 + $0xe8] sm:$0xff]  ;;  %v1693_v56 = vld [vmem:[%s5602_s23 + $0xf0] sm:$0xff] }
 0x7e1   :  { %v5298_v30 = vadd.f32 %v1532_v34, %v5238_v21  ;;  %v1561_v6 = vpop.f32.mrf.mxu3  ;;  %v1934_v20 = vadd.f32 %v1870_v52, %v5234_v40  ;;  %2692 = vmatpush.msra.mxu1 %v2224_v12  ;;  %2529 = vmatmul.f32.gmra.mxu2 %v1976_v15  ;;  %v1707_v15 = vld [vmem:[%s5602_s23 + $0x160] sm:$0xff] }
 0x7e2   :  { %v5306_v10 = vadd.f32 %v1561_v6, %v5246_v37  ;;  %v1506_v26 = vpop.f32.mrf.mxu0  ;;  %2558 = vmatmul.f32.gmra.mxu3 %v1977_v49  ;;  %2606 = vmatpush.msrb.mxu0 %v2175_v28 }
 0x7e3   :  { %v3877_v14 = vpop.eup %3876  ;;  %1628 = vst [vmem:[#allocation2 + $0xe8] sm:$0xff] %v5298_v30  ;;  %v1785_v62 = vmul.f32 1.442695, %v5298_v30  ;;  %v5313_v40 = vadd.f32 %v1506_v26, %v5201_v31  ;;  %v1593_v29 = vpop.f32.mrf.mxu1  ;;  %2632 = vmatpush.msra.mxu2 %v2194_v17  ;;  %2661 = vmatpush.msra.mxu3 %v2210_v13 }
 0x7e4   :  { %v3879_v54 = vpop.eup %3878  ;;  %v1868_v38 = vmul.f32 %v3877_v14, %v1676_v61  ;;  %1629 = vst [vmem:[#allocation2 + $0xf0] sm:$0xff] %v5306_v10  ;;  %v1787_v46 = vmul.f32 1.442695, %v5306_v10  ;;  %v5319_v1 = vadd.f32 %v1593_v29, %v5205_v47  ;;  %2693 = vmatpush.msra.mxu1 %v2223_v32  ;;  %2607 = vmatmul.f32.vlgmr.msrb.gmra.mxu0 %v1931_v2  ;;  %v1710_v61 = vld [vmem:[%s5602_s23 + $0x178] sm:$0xff] }
 0x7e5   :  { %v3881_v19 = vpop.eup %3880  ;;  %v1869_v25 = vmul.f32 %v3879_v54, %v1677_v24  ;;  %3884 = vpow2.f32 %v1785_v62  ;;  %1643 = vst [vmem:[#allocation2 + $0x160] sm:$0xff] %v5313_v40  ;;  %v1815_v45 = vmul.f32 1.442695, %v5313_v40  ;;  %2694 = vmatmul.f32.vlgmr.msra.gmra.mxu1 %v1934_v20  ;;  %2633 = vmatpush.msra.mxu2 %v2193_v39  ;;  %v1708_v62 = vld [vmem:[%s5602_s23 + $0x168] sm:$0xff] }
 0x7e6   :  { %v3883_v27 = vpop.eup %3882  ;;  %3886 = vpow2.f32 %v1787_v46  ;;  %1646 = vst [vmem:[#allocation2 + $0x178] sm:$0xff] %v5319_v1  ;;  %v1821_v50 = vmul.f32 1.442695, %v5319_v1  ;;  %v1883_v22 = vmul.f32 %v3881_v19, %v1691_v60  ;;  %2662 = vmatpush.msra.mxu3 %v2209_v18  ;;  %v1932_v16 = vadd.f32 %v1868_v38, %v5258_v8  ;;  %v1709_v38 = vld [vmem:[%s5602_s23 + $0x170] sm:$0xff]  ;;  %v1723_v18 = vld [vmem:[%s5602_s23 + $0x1e0] sm:$0xff] }
 0x7e7   :  { %3888 = vpow2.f32 %v1815_v45  ;;  %v1886_v35 = vmul.f32 %v3883_v27, %v1694_v41  ;;  %v1933_v51 = vadd.f32 %v1869_v25, %v5263_v7  ;;  %2634 = vmatpush.msra.mxu2 %v2192_v48 }
 0x7e8   :  { %3890 = vpow2.f32 %v1821_v50  ;;  %v1535_v0 = vpop.f32.mrf.mxu2  ;;  %2663 = vmatpush.msra.mxu3 %v2208_v33  ;;  %v1947_v8 = vadd.f32 %v1883_v22, %v5272_v43  ;;  %v1724_v50 = vld [vmem:[%s5602_s23 + $0x1e8] sm:$0xff]  ;;  %v1725_v22 = vld [vmem:[%s5602_s23 + $0x1f0] sm:$0xff] }
 0x7e9   :  { %v5335_v4 = vadd.f32 %v1535_v0, %v5238_v21  ;;  %v1564_v3 = vpop.f32.mrf.mxu3  ;;  %v1950_v7 = vadd.f32 %v1886_v35, %v5280_v5  ;;  %2635 = vmatpush.msra.mxu2 %v2191_v53 }
 0x7ea   :  { %v5339_v55 = vadd.f32 %v1564_v3, %v5246_v37  ;;  %v1509_v44 = vpop.f32.mrf.mxu0  ;;  %2664 = vmatpush.msra.mxu3 %v2207_v36  ;;  %2636 = vmatmul.f32.vlgmr.msra.gmra.mxu2 %v1932_v16 }
 0x7eb   :  { %v3885_v11 = vpop.eup %3884  ;;  %1644 = vst [vmem:[#allocation2 + $0x168] sm:$0xff] %v5335_v4  ;;  %v1817_v52 = vmul.f32 1.442695, %v5335_v4  ;;  %v1510_v9 = vadd.f32 %v1509_v44, %v5201_v31  ;;  %v1596_v12 = vpop.f32.mrf.mxu1  ;;  %2665 = vmatmul.f32.vlgmr.msra.gmra.mxu3 %v1933_v51 }
 0x7ec   :  { %v3887_v49 = vpop.eup %3886  ;;  %1645 = vst [vmem:[#allocation2 + $0x170] sm:$0xff] %v5339_v55  ;;  %v1819_v43 = vmul.f32 1.442695, %v5339_v55  ;;  %v1597_v5 = vadd.f32 %v1596_v12, %v5205_v47  ;;  %v1884_v34 = vmul.f32 %v3885_v11, %v1692_v23  ;;  %2610 = vmatmul.f32.gmra.mxu0 %v1947_v8 }
 0x7ed   :  { %v3889_v6 = vpop.eup %3888  ;;  %3892 = vpow2.f32 %v1817_v52  ;;  %1659 = vst [vmem:[#allocation2 + $0x1e0] sm:$0xff] %v1510_v9  ;;  %v1847_v28 = vmul.f32 1.442695, %v1510_v9  ;;  %v1885_v17 = vmul.f32 %v3887_v49, %v1693_v56  ;;  %2697 = vmatmul.f32.gmra.mxu1 %v1950_v7 }
 0x7ee   :  { %v3891_v31 = vpop.eup %3890  ;;  %3894 = vpow2.f32 %v1819_v43  ;;  %1662 = vst [vmem:[#allocation2 + $0x1f8] sm:$0xff] %v1597_v5  ;;  %v1853_v2 = vmul.f32 1.442695, %v1597_v5  ;;  %v1899_v20 = vmul.f32 %v3889_v6, %v1707_v15  ;;  %v1948_v13 = vadd.f32 %v1884_v34, %v5298_v30 }
 0x7ef   :  { %3896 = vpow2.f32 %v1847_v28  ;;  %v1902_v24 = vmul.f32 %v3891_v31, %v1710_v61  ;;  %v1949_v32 = vadd.f32 %v1885_v17, %v5306_v10  ;;  %v1726_v10 = vld [vmem:[%s5602_s23 + $0x1f8] sm:$0xff] }
 0x7f0   :  { %3898 = vpow2.f32 %v1853_v2  ;;  %v1538_v47 = vpop.f32.mrf.mxu2  ;;  %v1963_v60 = vadd.f32 %v1899_v20, %v5313_v40 }
 0x7f1   :  { %v1539_v26 = vadd.f32 %v1538_v47, %v5238_v21  ;;  %v1567_v14 = vpop.f32.mrf.mxu3  ;;  %v1966_v54 = vadd.f32 %v1902_v24, %v5319_v1 }
 0x7f2   :  { %v1568_v29 = vadd.f32 %v1567_v14, %v5246_v37  ;;  %2639 = vmatmul.f32.gmra.mxu2 %v1948_v13 }
 0x7f3   :  { %v3893_v46 = vpop.eup %3892  ;;  %1660 = vst [vmem:[#allocation2 + $0x1e8] sm:$0xff] %v1539_v26  ;;  %v1849_v39 = vmul.f32 1.442695, %v1539_v26  ;;  %2668 = vmatmul.f32.gmra.mxu3 %v1949_v32 }
 0x7f4   :  { %v3895_v41 = vpop.eup %3894  ;;  %1661 = vst [vmem:[#allocation2 + $0x1f0] sm:$0xff] %v1568_v29  ;;  %v1851_v30 = vmul.f32 1.442695, %v1568_v29  ;;  %v1900_v21 = vmul.f32 %v3893_v46, %v1708_v62  ;;  %2613 = vmatmul.f32.gmra.mxu0 %v1963_v60 }
 0x7f5   :  { %v3897_v19 = vpop.eup %3896  ;;  %3900 = vpow2.f32 %v1849_v39  ;;  %v1901_v37 = vmul.f32 %v3895_v41, %v1709_v38  ;;  %2700 = vmatmul.f32.gmra.mxu1 %v1966_v54 }
 0x7f6   :  { %v3899_v40 = vpop.eup %3898  ;;  %3902 = vpow2.f32 %v1851_v30  ;;  %v1915_v1 = vmul.f32 %v3897_v19, %v1723_v18  ;;  %v1964_v45 = vadd.f32 %v1900_v21, %v5335_v4  ;;  %v3750_v4 = vld [vmem:[%s5603_s26] ss:$0 sm:$0xff] }
 0x7f7   :  { %v1918_v25 = vmul.f32 %v3899_v40, %v1726_v10  ;;  %v1965_v27 = vadd.f32 %v1901_v37, %v5339_v55 }
 0x7f8   :  { %v1979_v48 = vadd.f32 %v1915_v1, %v1510_v9 }
 0x7f9   :  { %v1982_v33 = vadd.f32 %v1918_v25, %v1597_v5 }
 0x7fa   :  { %2642 = vmatmul.f32.gmra.mxu2 %v1964_v45 }
 0x7fb   :  { %v3901_v35 = vpop.eup %3900  ;;  %2671 = vmatmul.f32.gmra.mxu3 %v1965_v27 }
 0x7fc   :  { %v3903_v16 = vpop.eup %3902  ;;  %v1916_v51 = vmul.f32 %v3901_v35, %v1724_v50  ;;  %2616 = vmatmul.f32.gmra.mxu0 %v1979_v48 }
 0x7fd   :  { %v1917_v53 = vmul.f32 %v3903_v16, %v1725_v22  ;;  %2703 = vmatmul.f32.gmra.mxu1 %v1982_v33 }
 0x7fe   :  { %v1980_v3 = vadd.f32 %v1916_v51, %v1539_v26 }
 0x7ff   :  { %v2260_v36 = vpop.f32.mrf.mxu0  ;;  %v1981_v23 = vadd.f32 %v1917_v53, %v1568_v29 }
 0x800   :  { %v2347_v0 = vpop.f32.mrf.mxu1  ;;  %v2261_v8 = vadd.f32 %v3750_v4, %v2260_v36 }
 0x802   :  { %2645 = vmatmul.f32.gmra.mxu2 %v1980_v3 }
 0x803   :  { %2674 = vmatmul.f32.gmra.mxu3 %v1981_v23 }
 0x807   :  { %v2263_v55 = vpop.f32.mrf.mxu0 }
 0x808   :  { %v2350_v44 = vpop.f32.mrf.mxu1  ;;  %v2264_v49 = vadd.f32 %v3750_v4, %v2263_v55 }
 0x80b   :  { %v2289_v7 = vpop.f32.mrf.mxu2 }
 0x80c   :  { %v2290_v56 = vadd.f32 %v2289_v7, %v2261_v8  ;;  %v2318_v11 = vpop.f32.mrf.mxu3 }
 0x80e   :  { %v2319_v52 = vadd.f32 %v2318_v11, %v2290_v56 }
 0x80f   :  { %v2266_v9 = vpop.f32.mrf.mxu0 }
 0x810   :  { %v2353_v12 = vpop.f32.mrf.mxu1  ;;  %v2348_v15 = vadd.f32 %v2347_v0, %v2319_v52  ;;  %v2267_v31 = vadd.f32 %v3750_v4, %v2266_v9 }
 0x813   :  { %v2292_v43 = vpop.f32.mrf.mxu2 }
 0x814   :  { %v2293_v5 = vadd.f32 %v2292_v43, %v2264_v49  ;;  %v2321_v34 = vpop.f32.mrf.mxu3 }
 0x816   :  { %v2322_v61 = vadd.f32 %v2321_v34, %v2293_v5 }
 0x817   :  { %v2269_v6 = vpop.f32.mrf.mxu0 }
 0x818   :  { %v2356_v28 = vpop.f32.mrf.mxu1  ;;  %v2351_v17 = vadd.f32 %v2350_v44, %v2322_v61  ;;  %v2270_v62 = vadd.f32 %v3750_v4, %v2269_v6 }
 0x81b   :  { %v2295_v2 = vpop.f32.mrf.mxu2 }
 0x81c   :  { %v2296_v20 = vadd.f32 %v2295_v2, %v2267_v31  ;;  %v2324_v24 = vpop.f32.mrf.mxu3 }
 0x81e   :  { %v2325_v47 = vadd.f32 %v2324_v24, %v2296_v20 }
 0x81f   :  { %v2376_v13 = vpop.f32.mrf.mxu0 }
 0x820   :  { %v2377_v32 = vadd.f32 %v2376_v13, %v2348_v15  ;;  %v2463_v26 = vpop.f32.mrf.mxu1  ;;  %v2354_v14 = vadd.f32 %v2353_v12, %v2325_v47 }
 0x823   :  { %v2298_v29 = vpop.f32.mrf.mxu2 }
 0x824   :  { %v2299_v60 = vadd.f32 %v2298_v29, %v2270_v62  ;;  %v2327_v54 = vpop.f32.mrf.mxu3 }
 0x826   :  { %v2328_v38 = vadd.f32 %v2327_v54, %v2299_v60 }
 0x827   :  { %v2379_v46 = vpop.f32.mrf.mxu0 }
 0x828   :  { %v2466_v39 = vpop.f32.mrf.mxu1  ;;  %v2357_v18 = vadd.f32 %v2356_v28, %v2328_v38  ;;  %v2380_v56 = vadd.f32 %v2379_v46, %v2351_v17 }
 0x82b   :  { %v2405_v41 = vpop.f32.mrf.mxu2 }
 0x82c   :  { %v2406_v30 = vadd.f32 %v2405_v41, %v2377_v32  ;;  %v2434_v21 = vpop.f32.mrf.mxu3 }
 0x82e   :  { %v2435_v10 = vadd.f32 %v2434_v21, %v2406_v30 }
 0x82f   :  { %v2382_v19 = vpop.f32.mrf.mxu0 }
 0x830   :  { %v2469_v37 = vpop.f32.mrf.mxu1  ;;  %v2464_v40 = vadd.f32 %v2463_v26, %v2435_v10  ;;  %v2383_v43 = vadd.f32 %v2382_v19, %v2354_v14 }
 0x833   :  { %v2408_v1 = vpop.f32.mrf.mxu2 }
 0x834   :  { %v2437_v25 = vpop.f32.mrf.mxu3  ;;  %v2409_v11 = vadd.f32 %v2408_v1, %v2380_v56 }
 0x836   :  { %v2438_v12 = vadd.f32 %v2437_v25, %v2409_v11 }
 0x837   :  { %v2385_v45 = vpop.f32.mrf.mxu0 }
 0x838   :  { %v2472_v27 = vpop.f32.mrf.mxu1  ;;  %v2467_v6 = vadd.f32 %v2466_v39, %v2438_v12  ;;  %v2386_v13 = vadd.f32 %v2385_v45, %v2357_v18 }
 0x83b   :  { %v2411_v50 = vpop.f32.mrf.mxu2 }
 0x83c   :  { %v2440_v48 = vpop.f32.mrf.mxu3  ;;  %v2412_v61 = vadd.f32 %v2411_v50, %v2383_v43 }
 0x83e   :  { %v2441_v2 = vadd.f32 %v2440_v48, %v2412_v61 }
 0x83f   :  { %v2492_v33 = vpop.f32.mrf.mxu0 }
 0x840   :  { %v2579_v35 = vpop.f32.mrf.mxu1  ;;  %v2493_v52 = vadd.f32 %v2492_v33, %v2464_v40  ;;  %v2470_v60 = vadd.f32 %v2469_v37, %v2441_v2 }
 0x843   :  { %v2414_v22 = vpop.f32.mrf.mxu2 }
 0x844   :  { %v2443_v16 = vpop.f32.mrf.mxu3  ;;  %v2415_v29 = vadd.f32 %v2414_v22, %v2386_v13 }
 0x846   :  { %v2444_v46 = vadd.f32 %v2443_v16, %v2415_v29 }
 0x847   :  { %v2495_v51 = vpop.f32.mrf.mxu0 }
 0x848   :  { %v2582_v0 = vpop.f32.mrf.mxu1  ;;  %v2496_v31 = vadd.f32 %v2495_v51, %v2467_v6  ;;  %v2473_v1 = vadd.f32 %v2472_v27, %v2444_v46 }
 0x84b   :  { %v2521_v53 = vpop.f32.mrf.mxu2 }
 0x84c   :  { %v2550_v36 = vpop.f32.mrf.mxu3  ;;  %v2522_v15 = vadd.f32 %v2521_v53, %v2493_v52 }
 0x84e   :  { %v2551_v28 = vadd.f32 %v2550_v36, %v2522_v15 }
 0x84f   :  { %v2498_v3 = vpop.f32.mrf.mxu0 }
 0x850   :  { %v2585_v55 = vpop.f32.mrf.mxu1  ;;  %v2580_v24 = vadd.f32 %v2579_v35, %v2551_v28  ;;  %v2499_v14 = vadd.f32 %v2498_v3, %v2470_v60 }
 0x853   :  { %v2524_v23 = vpop.f32.mrf.mxu2 }
 0x854   :  { %v2553_v4 = vpop.f32.mrf.mxu3  ;;  %v2525_v20 = vadd.f32 %v2524_v23, %v2496_v31 }
 0x856   :  { %v2554_v54 = vadd.f32 %v2553_v4, %v2525_v20 }
 0x857   :  { %v2501_v44 = vpop.f32.mrf.mxu0 }
 0x858   :  { %v2588_v9 = vpop.f32.mrf.mxu1  ;;  %v2583_v30 = vadd.f32 %v2582_v0, %v2554_v54  ;;  %v2502_v48 = vadd.f32 %v2501_v44, %v2473_v1  ;;  %v2775_v1 = vld [vmem:[%s5604_s28] sm:$0xff] }
 0x85b   :  { %v2527_v8 = vpop.f32.mrf.mxu2 }
 0x85c   :  { %v2556_v7 = vpop.f32.mrf.mxu3  ;;  %v2528_v41 = vadd.f32 %v2527_v8, %v2499_v14 }
 0x85e   :  { %v2557_v25 = vadd.f32 %v2556_v7, %v2528_v41 }
 0x860   :  { %v2586_v35 = vadd.f32 %v2585_v55, %v2557_v25 }
 0x861   :  { %v2608_v49 = vpop.f32.mrf.mxu0 }
 0x862   :  { %v2695_v47 = vpop.f32.mrf.mxu1  ;;  %v2609_v32 = vadd.f32 %v2608_v49, %v2580_v24 }
 0x864   :  { %v2530_v5 = vpop.f32.mrf.mxu2 }
 0x865   :  { %v2559_v34 = vpop.f32.mrf.mxu3  ;;  %v2531_v37 = vadd.f32 %v2530_v5, %v2502_v48 }
 0x867   :  { %v2560_v4 = vadd.f32 %v2559_v34, %v2531_v37 }
 0x869   :  { %v2611_v17 = vpop.f32.mrf.mxu0  ;;  %v2589_v12 = vadd.f32 %v2588_v9, %v2560_v4 }
 0x86a   :  { %v2612_v21 = vadd.f32 %v2611_v17, %v2583_v30  ;;  %v2698_v10 = vpop.f32.mrf.mxu1 }
 0x86d   :  { %v2637_v26 = vpop.f32.mrf.mxu2 }
 0x86e   :  { %v2666_v62 = vpop.f32.mrf.mxu3  ;;  %v2638_v38 = vadd.f32 %v2637_v26, %v2609_v32 }
 0x870   :  { %v2667_v39 = vadd.f32 %v2666_v62, %v2638_v38 }
 0x871   :  { %v2614_v50 = vpop.f32.mrf.mxu0 }
 0x872   :  { %v5367_v18 = vadd.f32 %v2695_v47, %v2667_v39  ;;  %v2615_v53 = vadd.f32 %v2614_v50, %v2586_v35  ;;  %v2701_v7 = vpop.f32.mrf.mxu1 }
 0x874   :  { %v2721_v22 = vmul.f32 %v5367_v18, %v5367_v18  ;;  %v2707_v51 = vsel %vm311_vm3, %v5367_v18, 0.0 }
 0x875   :  { %v2640_v19 = vpop.f32.mrf.mxu2 }
 0x876   :  { %v2669_v40 = vpop.f32.mrf.mxu3  ;;  %v2641_v45 = vadd.f32 %v2640_v19, %v2612_v21  ;;  %v2725_v44 = vsel %vm311_vm3, %v2721_v22, 0.0 }
 0x878   :  { %v2670_v33 = vadd.f32 %v2669_v40, %v2641_v45  ;;  %v2776_v40 = vld [vmem:[%s5604_s28 + $0x8] sm:$0xff] }
 0x879   :  { %v2617_v52 = vpop.f32.mrf.mxu0  ;;  %2807 = vmatpush.msra.mxu0 %v2776_v40 }
 0x87a   :  { %v5371_v16 = vadd.f32 %v2698_v10, %v2670_v33  ;;  %v2618_v49 = vadd.f32 %v2617_v52, %v2589_v12  ;;  %v2704_v24 = vpop.f32.mrf.mxu1 }
 0x87b   :  { %2808 = vmatpush.msra.mxu0 %v2775_v1 }
 0x87c   :  { %v2708_v27 = vsel %vm311_vm3, %v5371_v16, 0.0  ;;  %v2722_v36 = vmul.f32 %v5371_v16, %v5371_v16 }
 0x87d   :  { %v2709_v0 = vadd.f32 %v2708_v27, %v2707_v51  ;;  %v2643_v3 = vpop.f32.mrf.mxu2 }
 0x87e   :  { %v2672_v23 = vpop.f32.mrf.mxu3  ;;  %v2726_v55 = vsel %vm311_vm3, %v2722_v36, 0.0  ;;  %v2644_v8 = vadd.f32 %v2643_v3, %v2615_v53  ;;  %v2741_v53 = vld [vmem:[%s4170_s19] sm:$0x1]  ;;  %s3983_s19 = smov 12  }
 0x87f   :  { %v2727_v56 = vadd.f32 %v2726_v55, %v2725_v44  ;;  %v2754_v3 = vld [vmem:[%s4175_s14] sm:$0x1]  ;;  %s5606_s14 = sld [smem:[#allocation16_spill]] }
 0x880   :  { %v2673_v11 = vadd.f32 %v2672_v23, %v2644_v8 }
 0x882   :  { %v2702_v15 = vadd.f32 %v2701_v7, %v2673_v11 }
 0x884   :  { %v2710_v43 = vsel %vm311_vm3, %v2702_v15, 0.0  ;;  %v2723_v5 = vmul.f32 %v2702_v15, %v2702_v15 }
 0x885   :  { %v2711_v61 = vadd.f32 %v2710_v43, %v2709_v0  ;;  %v2646_v6 = vpop.f32.mrf.mxu2 }
 0x886   :  { %v2728_v28 = vsel %vm311_vm3, %v2723_v5, 0.0  ;;  %v2647_v34 = vadd.f32 %v2646_v6, %v2618_v49  ;;  %v2675_v2 = vpop.f32.mrf.mxu3 }
 0x887   :  { %v2729_v31 = vadd.f32 %v2728_v28, %v2727_v56 }
 0x888   :  { %v2676_v20 = vadd.f32 %v2675_v2, %v2647_v34 }
 0x88a   :  { %v2705_v47 = vadd.f32 %v2704_v24, %v2676_v20 }
 0x88c   :  { %v2712_v13 = vsel %vm311_vm3, %v2705_v47, 0.0  ;;  %v2724_v32 = vmul.f32 %v2705_v47, %v2705_v47 }
 0x88d   :  { %v2713_v17 = vadd.f32 %v2712_v13, %v2711_v61 }
 0x88e   :  { %v2730_v9 = vsel %vm311_vm3, %v2724_v32, 0.0 }
 0x88f   :  { %v2714_v26 = vrot.slane %v2713_v17, 4  ;;  %v2731_v62 = vadd.f32 %v2730_v9, %v2729_v31 }
 0x891   :  { %v2715_v29 = vadd.f32 %v2714_v26, %v2713_v17  ;;  %v2732_v60 = vrot.slane %v2731_v62, 4 }
 0x893   :  { %v2716_v54 = vrot.slane %v2715_v29, 2  ;;  %v2733_v38 = vadd.f32 %v2732_v60, %v2731_v62 }
 0x895   :  { %v2717_v14 = vadd.f32 %v2716_v54, %v2715_v29  ;;  %v2734_v46 = vrot.slane %v2733_v38, 2 }
 0x897   :  { %v2718_v41 = vrot.slane %v2717_v14, 1  ;;  %v2735_v30 = vadd.f32 %v2734_v46, %v2733_v38 }
 0x899   :  { %v2719_v39 = vadd.f32 %v2718_v41, %v2717_v14  ;;  %v2736_v21 = vrot.slane %v2735_v30, 1 }
 0x89b   :  { %v2720_v10 = vmul.f32 %v2719_v39, %v4273_v58  ;;  %v2737_v19 = vadd.f32 %v2736_v21, %v2735_v30 }
 0x89d   :  { %v2738_v25 = vmul.f32 %v2737_v19, %v4273_v58  ;;  %v2739_v45 = vmul.f32 %v2720_v10, %v2720_v10 }
 0x89f   :  { %v2740_v50 = vsub.f32 %v2738_v25, %v2739_v45 }
 0x8a1   :  { %v2742_v48 = vadd.f32 1e-05, %v2740_v50 }
 0x8a3   :  { %3904 = vrsqrt.f32 %v2742_v48  ;;  %vm2749_vm1 = vweird.f32 %v2742_v48 }
 0x8a9   :  { %v3905_v33 = vpop.eup %3904 }
 0x8aa   :  { %v2744_v37 = vmul.f32 %v3905_v33, %v2742_v48  ;;  %vm2750_vm15 = vweird.f32 %v3905_v33 }
 0x8ab   :  { %vm2751_vm5 = vmor %vm2749_vm1, %vm2750_vm15 }
 0x8ac   :  { %v2745_v22 = vmul.f32 %v3905_v33, %v2744_v37 }
 0x8ae   :  { %v2746_v35 = vmul.f32 0.5, %v2745_v22 }
 0x8b0   :  { %v2747_v51 = vsub.f32 1.5, %v2746_v35 }
 0x8b2   :  { %v2748_v27 = vmul.f32 %v3905_v33, %v2747_v51 }
 0x8b4   :  { %v2752_v36 = vsel %vm2751_vm5, %v3905_v33, %v2748_v27 }
 0x8b5   :  { %v2753_v0 = vmul.f32 %v2752_v36, %v2741_v53 }
 0x8b7   :  { %v2755_v23 = vmul.f32 %v2753_v0, %v2720_v10  ;;  %v2758_v4 = vperm.slane %v2753_v0, 0 }
 0x8b9   :  { %v2756_v44 = vsub.f32 %v2754_v3, %v2755_v23  ;;  %v2763_v55 = vmul.f32 %v2758_v4, %v2705_v47  ;;  %v2760_v8 = vmul.f32 %v2758_v4, %v5367_v18  ;;  %v2761_v7 = vmul.f32 %v2758_v4, %v5371_v16 }
 0x8ba   :  { %v2762_v56 = vmul.f32 %v2758_v4, %v2702_v15  ;;  %v3751_v15 = vld [vmem:[%s5605_s1] ss:$0 sm:$0xff] }
 0x8bb   :  { %v2765_v11 = vperm.slane %v2756_v44, 0 }
 0x8bd   :  { %v2767_v52 = vadd.f32 %v2765_v11, %v2760_v8  ;;  %v2768_v12 = vadd.f32 %v2765_v11, %v2761_v7  ;;  %v2769_v49 = vadd.f32 %v2765_v11, %v2762_v56  ;;  %v2770_v43 = vadd.f32 %v2765_v11, %v2763_v55  ;;  %v2856_v56 = vld [vmem:[%s5596_s3] sm:$0x1] }
 0x8bf   :  { %v2771_v5 = vmax.f32 %v2767_v52, 0.0  ;;  %v2772_v61 = vmax.f32 %v2768_v12, 0.0  ;;  %v2773_v6 = vmax.f32 %v2769_v49, 0.0  ;;  %v2774_v28 = vmax.f32 %v2770_v43, 0.0  ;;  %v2869_v49 = vld [vmem:[%s5597_s8] sm:$0x1] }
 0x8c1   :  { %3656 = vmatmul.msk.f32.vlgmr.msra.gmra.mxu0 %vm311_vm3, %v2771_v5 }
 0x8c9   :  { %3657 = vmatmul.msk.f32.gmra.mxu0 %vm311_vm3, %v2772_v61 }
 0x8d1   :  { %3658 = vmatmul.msk.f32.gmra.mxu0 %vm311_vm3, %v2773_v6 }
 0x8d9   :  { %3659 = vmatmul.msk.f32.gmra.mxu0 %vm311_vm3, %v2774_v28 }
 0x93e   :  { %v2810_v18 = vpop.f32.mrf.mxu0 }
 0x93f   :  { %v2811_v2 = vadd.f32 %v3751_v15, %v2810_v18 }
 0x941   :  { %v2836_v47 = vmul.f32 %v2811_v2, %v2811_v2  ;;  %v2822_v17 = vsel %vm867_vm4, %v2811_v2, 0.0 }
 0x943   :  { %v2840_v60 = vsel %vm867_vm4, %v2836_v47, 0.0 }
 0x946   :  { %v2813_v16 = vpop.f32.mrf.mxu0 }
 0x947   :  { %v2814_v34 = vadd.f32 %v3751_v15, %v2813_v16 }
 0x949   :  { %v2837_v24 = vmul.f32 %v2814_v34, %v2814_v34  ;;  %v2823_v13 = vsel %vm867_vm4, %v2814_v34, 0.0 }
 0x94a   :  { %v2824_v62 = vadd.f32 %v2823_v13, %v2822_v17 }
 0x94b   :  { %v2841_v9 = vsel %vm867_vm4, %v2837_v24, 0.0 }
 0x94c   :  { %v2842_v14 = vadd.f32 %v2841_v9, %v2840_v60 }
 0x94e   :  { %v2816_v31 = vpop.f32.mrf.mxu0 }
 0x94f   :  { %v2817_v20 = vadd.f32 %v3751_v15, %v2816_v31 }
 0x951   :  { %v2838_v32 = vmul.f32 %v2817_v20, %v2817_v20  ;;  %v2825_v26 = vsel %vm867_vm4, %v2817_v20, 0.0 }
 0x952   :  { %v2826_v46 = vadd.f32 %v2825_v26, %v2824_v62 }
 0x953   :  { %v2843_v54 = vsel %vm867_vm4, %v2838_v32, 0.0 }
 0x954   :  { %v2844_v39 = vadd.f32 %v2843_v54, %v2842_v14 }
 0x956   :  { %v2819_v29 = vpop.f32.mrf.mxu0 }
 0x957   :  { %v2820_v38 = vadd.f32 %v3751_v15, %v2819_v29 }
 0x959   :  { %v2827_v41 = vsel %vm867_vm4, %v2820_v38, 0.0  ;;  %v2839_v30 = vmul.f32 %v2820_v38, %v2820_v38 }
 0x95a   :  { %v2828_v21 = vadd.f32 %v2827_v41, %v2826_v46 }
 0x95b   :  { %v2845_v10 = vsel %vm867_vm4, %v2839_v30, 0.0 }
 0x95c   :  { %v2829_v19 = vrot.slane %v2828_v21, 4  ;;  %v2846_v40 = vadd.f32 %v2845_v10, %v2844_v39 }
 0x95e   :  { %v2830_v1 = vadd.f32 %v2829_v19, %v2828_v21  ;;  %v2847_v25 = vrot.slane %v2846_v40, 4 }
 0x960   :  { %v2831_v45 = vrot.slane %v2830_v1, 2  ;;  %v2848_v50 = vadd.f32 %v2847_v25, %v2846_v40 }
 0x962   :  { %v2832_v48 = vadd.f32 %v2831_v45, %v2830_v1  ;;  %v2849_v33 = vrot.slane %v2848_v50, 2  ;;  %v3752_v1 = vld [vmem:[%s5607_s2] ss:$0 sm:$0xff] }
 0x964   :  { %v2833_v37 = vrot.slane %v2832_v48, 1  ;;  %v2850_v22 = vadd.f32 %v2849_v33, %v2848_v50 }
 0x966   :  { %v2834_v35 = vadd.f32 %v2833_v37, %v2832_v48  ;;  %v2851_v51 = vrot.slane %v2850_v22, 1 }
 0x968   :  { %v2835_v53 = vmul.f32 %v2834_v35, %v4273_v58  ;;  %v2852_v27 = vadd.f32 %v2851_v51, %v2850_v22 }
 0x96a   :  { %v2853_v36 = vmul.f32 %v2852_v27, %v4273_v58  ;;  %v2854_v0 = vmul.f32 %v2835_v53, %v2835_v53 }
 0x96c   :  { %v2855_v3 = vsub.f32 %v2853_v36, %v2854_v0 }
 0x96e   :  { %v2857_v23 = vadd.f32 1e-05, %v2855_v3 }
 0x970   :  { %3906 = vrsqrt.f32 %v2857_v23  ;;  %vm2864_vm7 = vweird.f32 %v2857_v23 }
 0x976   :  { %v3907_v4 = vpop.eup %3906 }
 0x977   :  { %v2859_v44 = vmul.f32 %v3907_v4, %v2857_v23  ;;  %vm2865_vm6 = vweird.f32 %v3907_v4 }
 0x978   :  { %vm2866_vm10 = vmor %vm2864_vm7, %vm2865_vm6 }
 0x979   :  { %v2860_v55 = vmul.f32 %v3907_v4, %v2859_v44 }
 0x97b   :  { %v2861_v8 = vmul.f32 0.5, %v2860_v55 }
 0x97d   :  { %v2862_v7 = vsub.f32 1.5, %v2861_v8 }
 0x97f   :  { %v2863_v11 = vmul.f32 %v3907_v4, %v2862_v7 }
 0x981   :  { %v2867_v52 = vsel %vm2866_vm10, %v3907_v4, %v2863_v11 }
 0x982   :  { %v2868_v12 = vmul.f32 %v2867_v52, %v2856_v56 }
 0x984   :  { %v2870_v43 = vmul.f32 %v2868_v12, %v2835_v53  ;;  %v2873_v5 = vperm.slane %v2868_v12, 0 }
 0x986   :  { %v2871_v61 = vsub.f32 %v2869_v49, %v2870_v43  ;;  %v2878_v6 = vmul.f32 %v2873_v5, %v2820_v38  ;;  %v2877_v18 = vmul.f32 %v2873_v5, %v2817_v20  ;;  %v2876_v16 = vmul.f32 %v2873_v5, %v2814_v34  ;;  %v2941_v34 = vld [vmem:[%s5606_s14 + $0x10] sm:$0xff]  ;;  %v2939_v20 = vld [vmem:[%s5606_s14] sm:$0xff] }
 0x987   :  { %v2875_v15 = vmul.f32 %v2873_v5, %v2811_v2  ;;  %v2940_v2 = vld [vmem:[%s5606_s14 + $0x8] sm:$0xff]  ;;  %2971 = vmatpush.msrb.mxu3 %v2941_v34 }
 0x988   :  { %v2880_v28 = vperm.slane %v2871_v61, 0 }
 0x989   :  { %2972 = vmatpush.msrb.mxu3 %v2940_v2 }
 0x98a   :  { %v2885_v31 = vadd.f32 %v2880_v28, %v2878_v6  ;;  %v2884_v24 = vadd.f32 %v2880_v28, %v2877_v18  ;;  %v2883_v47 = vadd.f32 %v2880_v28, %v2876_v16  ;;  %v2882_v13 = vadd.f32 %v2880_v28, %v2875_v15 }
 0x98b   :  { %2973 = vmatpush.msrb.mxu3 %v2939_v20 }
 0x98c   :  { %v2889_v32 = vmax.f32 %v2885_v31, 0.0  ;;  %v2888_v17 = vmax.f32 %v2884_v24, 0.0  ;;  %v2887_v9 = vmax.f32 %v2883_v47, 0.0  ;;  %v2886_v26 = vmax.f32 %v2882_v13, 0.0 }
 0x98e   :  { %2902 = vmatpush.msrb.mxu2 %v2889_v32  ;;  %2927 = vrot.lane.b32.xlu1 %v2888_v17, %s3983_s19 }
 0x98f   :  { %2925 = vrot.lane.b32.xlu2 %v2887_v9, %s3983_s19  ;;  %2923 = vrot.lane.b32.xlu0 %v2886_v26, %s3983_s19 }
 0x990   :  { %2903 = vmatpush.msrb.mxu2 %v2888_v17 }
 0x992   :  { %2904 = vmatpush.msrb.mxu2 %v2887_v9 }
 0x994   :  { %2905 = vmatpush.msrb.mxu2 %v2886_v26 }
 0x995   :  { %3660 = vmatmul.msk.f32.vlgmr.msrb.gmra.mxu2 %vm166_vm0, %v4228_v59 }
 0x997   :  { %2929 = vrot.lane.b32.xlu0 %v2889_v32, %s3983_s19 }
 0x99d   :  { %3661 = vmatmul.msk.f32.gmra.mxu2 %vm166_vm0, %v4235_v63 }
 0x9a5   :  { %3662 = vmatmul.msk.f32.gmra.mxu2 %vm166_vm0, %v4216_v42 }
 0x9ad   :  { %3663 = vmatmul.msk.f32.gmra.mxu2 %vm166_vm0, %v4224_v57 }
 0x9e9   :  { %v2926_v54 = vpop.permute.xlu2 %2925 }
 0xa00   :  { %v2928_v46 = vpop.permute.xlu1 %2927 }
 0xa01   :  { %v2924_v62 = vpop.permute.xlu0 %2923 }
 0xa09   :  { %v2930_v39 = vpop.permute.xlu0 %2929 }
 0xa18   :  { %v2907_v29 = vpop.f32.mrf.mxu2 }
 0xa19   :  { %v2935_v60 = vsel %vm867_vm4, %v2907_v29, %v2924_v62 }
 0xa1a   :  { %3664 = vmatmul.msk.f32.vlgmr.msrb.gmra.mxu3 %vm531_vm9, %v2935_v60  ;;  %v3021_v60 = vld [vmem:[%s4150_s20] sm:$0x1]  ;;  %s5608_s20 = sld [smem:[#allocation18_spill]] }
 0xa20   :  { %v2910_v38 = vpop.f32.mrf.mxu2 }
 0xa21   :  { %v2936_v14 = vsel %vm867_vm4, %v2910_v38, %v2926_v54 }
 0xa22   :  { %3665 = vmatmul.msk.f32.gmra.mxu3 %vm531_vm9, %v2936_v14 }
 0xa28   :  { %v2913_v41 = vpop.f32.mrf.mxu2 }
 0xa29   :  { %v2937_v30 = vsel %vm867_vm4, %v2913_v41, %v2928_v46  ;;  %v3034_v46 = vld [vmem:[%s4155_s6] sm:$0x1]  ;;  %s5609_s6 = sld [smem:[#allocation19_spill]] }
 0xa2a   :  { %3666 = vmatmul.msk.f32.gmra.mxu3 %vm531_vm9, %v2937_v30 }
 0xa30   :  { %v2916_v21 = vpop.f32.mrf.mxu2 }
 0xa31   :  { %v2938_v10 = vsel %vm867_vm4, %v2916_v21, %v2930_v39 }
 0xa32   :  { %3667 = vmatmul.msk.f32.gmra.mxu3 %vm531_vm9, %v2938_v10 }
 0xa9d   :  { %v2975_v19 = vpop.f32.mrf.mxu3 }
 0xa9e   :  { %v2976_v50 = vadd.f32 %v3752_v1, %v2975_v19 }
 0xaa0   :  { %v3001_v37 = vmul.f32 %v2976_v50, %v2976_v50  ;;  %v2987_v51 = vsel %vm311_vm3, %v2976_v50, 0.0 }
 0xaa2   :  { %v3005_v3 = vsel %vm311_vm3, %v3001_v37, 0.0 }
 0xaa5   :  { %v2978_v40 = vpop.f32.mrf.mxu3 }
 0xaa6   :  { %v2979_v25 = vadd.f32 %v3752_v1, %v2978_v40 }
 0xaa8   :  { %v3002_v33 = vmul.f32 %v2979_v25, %v2979_v25  ;;  %v2988_v22 = vsel %vm311_vm3, %v2979_v25, 0.0 }
 0xaa9   :  { %v2989_v36 = vadd.f32 %v2988_v22, %v2987_v51 }
 0xaaa   :  { %v3006_v53 = vsel %vm311_vm3, %v3002_v33, 0.0 }
 0xaab   :  { %v3007_v44 = vadd.f32 %v3006_v53, %v3005_v3 }
 0xaad   :  { %v2981_v45 = vpop.f32.mrf.mxu3 }
 0xaae   :  { %v2982_v48 = vadd.f32 %v3752_v1, %v2981_v45 }
 0xab0   :  { %v3003_v35 = vmul.f32 %v2982_v48, %v2982_v48  ;;  %v2990_v27 = vsel %vm311_vm3, %v2982_v48, 0.0 }
 0xab1   :  { %v2991_v55 = vadd.f32 %v2990_v27, %v2989_v36  ;;  %v3104_v36 = vld [vmem:[%s5608_s20] sm:$0xff] }
 0xab2   :  { %v3008_v23 = vsel %vm311_vm3, %v3003_v35, 0.0 }
 0xab3   :  { %v3009_v56 = vadd.f32 %v3008_v23, %v3007_v44 }
 0xab5   :  { %v2984_v0 = vpop.f32.mrf.mxu3 }
 0xab6   :  { %v2985_v4 = vadd.f32 %v3752_v1, %v2984_v0 }
 0xab8   :  { %v2992_v8 = vsel %vm311_vm3, %v2985_v4, 0.0  ;;  %v3004_v7 = vmul.f32 %v2985_v4, %v2985_v4 }
 0xab9   :  { %v2993_v11 = vadd.f32 %v2992_v8, %v2991_v55 }
 0xaba   :  { %v3010_v52 = vsel %vm311_vm3, %v3004_v7, 0.0 }
 0xabb   :  { %v2994_v12 = vrot.slane %v2993_v11, 4  ;;  %v3011_v49 = vadd.f32 %v3010_v52, %v3009_v56 }
 0xabd   :  { %v2995_v43 = vadd.f32 %v2994_v12, %v2993_v11  ;;  %v3012_v5 = vrot.slane %v3011_v49, 4 }
 0xabf   :  { %v2996_v61 = vrot.slane %v2995_v43, 2  ;;  %v3013_v6 = vadd.f32 %v3012_v5, %v3011_v49  ;;  %v3753_v5 = vld [vmem:[%s5609_s6] ss:$0 sm:$0xff] }
 0xac1   :  { %v2997_v28 = vadd.f32 %v2996_v61, %v2995_v43  ;;  %v3014_v18 = vrot.slane %v3013_v6, 2 }
 0xac3   :  { %v2998_v16 = vrot.slane %v2997_v28, 1  ;;  %v3015_v15 = vadd.f32 %v3014_v18, %v3013_v6 }
 0xac5   :  { %v2999_v31 = vadd.f32 %v2998_v16, %v2997_v28  ;;  %v3016_v24 = vrot.slane %v3015_v15, 1 }
 0xac7   :  { %v3000_v47 = vmul.f32 %v2999_v31, %v4273_v58  ;;  %v3017_v13 = vadd.f32 %v3016_v24, %v3015_v15 }
 0xac9   :  { %v3018_v32 = vmul.f32 %v3017_v13, %v4273_v58  ;;  %v3019_v17 = vmul.f32 %v3000_v47, %v3000_v47 }
 0xacb   :  { %v3020_v9 = vsub.f32 %v3018_v32, %v3019_v17 }
 0xacd   :  { %v3022_v26 = vadd.f32 1e-05, %v3020_v9 }
 0xacf   :  { %3908 = vrsqrt.f32 %v3022_v26  ;;  %vm3029_vm11 = vweird.f32 %v3022_v26 }
 0xad5   :  { %v3909_v34 = vpop.eup %3908 }
 0xad6   :  { %v3024_v2 = vmul.f32 %v3909_v34, %v3022_v26  ;;  %vm3030_vm4 = vweird.f32 %v3909_v34 }
 0xad7   :  { %vm3031_vm12 = vmor %vm3029_vm11, %vm3030_vm4 }
 0xad8   :  { %v3025_v20 = vmul.f32 %v3909_v34, %v3024_v2 }
 0xada   :  { %v3026_v62 = vmul.f32 0.5, %v3025_v20 }
 0xadc   :  { %v3027_v29 = vsub.f32 1.5, %v3026_v62 }
 0xade   :  { %v3028_v54 = vmul.f32 %v3909_v34, %v3027_v29 }
 0xae0   :  { %v3032_v38 = vsel %vm3031_vm12, %v3909_v34, %v3028_v54 }
 0xae1   :  { %v3033_v14 = vmul.f32 %v3032_v38, %v3021_v60 }
 0xae3   :  { %v3035_v41 = vmul.f32 %v3033_v14, %v3000_v47  ;;  %v3038_v30 = vperm.slane %v3033_v14, 0 }
 0xae5   :  { %v3036_v39 = vsub.f32 %v3034_v46, %v3035_v41  ;;  %v3043_v21 = vmul.f32 %v3038_v30, %v2985_v4  ;;  %v3042_v19 = vmul.f32 %v3038_v30, %v2982_v48  ;;  %v3041_v40 = vmul.f32 %v3038_v30, %v2979_v25  ;;  %v3107_v25 = vld [vmem:[%s5608_s20 + $0x18] sm:$0xff]  ;;  %v3105_v48 = vld [vmem:[%s5608_s20 + $0x8] sm:$0xff] }
 0xae6   :  { %v3040_v1 = vmul.f32 %v3038_v30, %v2976_v50  ;;  %v3106_v50 = vld [vmem:[%s5608_s20 + $0x10] sm:$0xff]  ;;  %3136 = vmatpush.msrb.mxu0 %v3107_v25 }
 0xae7   :  { %v3045_v10 = vperm.slane %v3036_v39, 0 }
 0xae8   :  { %3137 = vmatpush.msrb.mxu0 %v3106_v50 }
 0xae9   :  { %v3050_v45 = vadd.f32 %v3045_v10, %v3043_v21  ;;  %v3049_v33 = vadd.f32 %v3045_v10, %v3042_v19  ;;  %v3048_v37 = vadd.f32 %v3045_v10, %v3041_v40  ;;  %v3047_v22 = vadd.f32 %v3045_v10, %v3040_v1 }
 0xaea   :  { %3138 = vmatpush.msrb.mxu0 %v3105_v48 }
 0xaeb   :  { %v3054_v35 = vmax.f32 %v3050_v45, 0.0  ;;  %v3053_v51 = vmax.f32 %v3049_v33, 0.0  ;;  %v3052_v53 = vmax.f32 %v3048_v37, 0.0  ;;  %v3051_v27 = vmax.f32 %v3047_v22, 0.0 }
 0xaec   :  { %3139 = vmatpush.msrb.mxu0 %v3104_v36 }
 0xaed   :  { %3067 = vmatpush.msrb.mxu1 %v3054_v35  ;;  %3092 = vrot.lane.b32.xlu0 %v3053_v51, %s3982_s21 }
 0xaee   :  { %3090 = vrot.lane.b32.xlu1 %v3052_v53, %s3982_s21  ;;  %3088 = vrot.lane.b32.xlu2 %v3051_v27, %s3982_s21 }
 0xaef   :  { %3068 = vmatpush.msrb.mxu1 %v3053_v51 }
 0xaf1   :  { %3069 = vmatpush.msrb.mxu1 %v3052_v53 }
 0xaf3   :  { %3070 = vmatpush.msrb.mxu1 %v3051_v27 }
 0xaf4   :  { %3668 = vmatmul.msk.f32.vlgmr.msrb.gmra.mxu1 %vm166_vm0, %v4228_v59 }
 0xaf6   :  { %3094 = vrot.lane.b32.xlu2 %v3054_v35, %s3982_s21 }
 0xafc   :  { %3669 = vmatmul.msk.f32.gmra.mxu1 %vm166_vm0, %v4235_v63 }
 0xb04   :  { %3670 = vmatmul.msk.f32.gmra.mxu1 %vm166_vm0, %v4216_v42 }
 0xb0c   :  { %3671 = vmatmul.msk.f32.gmra.mxu1 %vm166_vm0, %v4224_v57 }
 0xb48   :  { %v3089_v0 = vpop.permute.xlu2 %3088 }
 0xb50   :  { %v3095_v11 = vpop.permute.xlu2 %3094 }
 0xb5f   :  { %v3093_v8 = vpop.permute.xlu0 %3092 }
 0xb60   :  { %v3091_v4 = vpop.permute.xlu1 %3090 }
 0xb71   :  { %v3072_v3 = vpop.f32.mrf.mxu1 }
 0xb72   :  { %v3100_v23 = vsel %vm311_vm3, %v3072_v3, %v3089_v0 }
 0xb73   :  { %3672 = vmatmul.msk.f32.vlgmr.msrb.gmra.mxu0 %vm166_vm0, %v3100_v23  ;;  %v3187_v23 = vld [vmem:[%s4140_s4] sm:$0x1]  ;;  %s5610_s4 = sld [smem:[#allocation20_spill]] }
 0xb79   :  { %v3075_v44 = vpop.f32.mrf.mxu1 }
 0xb7a   :  { %v3101_v55 = vsel %vm311_vm3, %v3075_v44, %v3091_v4 }
 0xb7b   :  { %3673 = vmatmul.msk.f32.gmra.mxu0 %vm166_vm0, %v3101_v55 }
 0xb81   :  { %v3078_v7 = vpop.f32.mrf.mxu1 }
 0xb82   :  { %v3102_v56 = vsel %vm311_vm3, %v3078_v7, %v3093_v8  ;;  %v3200_v8 = vld [vmem:[%s4145_s13] sm:$0x1]  ;;  %s5611_s13 = sld [smem:[#allocation21_spill]] }
 0xb83   :  { %3674 = vmatmul.msk.f32.gmra.mxu0 %vm166_vm0, %v3102_v56 }
 0xb89   :  { %v3081_v52 = vpop.f32.mrf.mxu1 }
 0xb8a   :  { %v3103_v12 = vsel %vm311_vm3, %v3081_v52, %v3095_v11 }
 0xb8b   :  { %3675 = vmatmul.msk.f32.gmra.mxu0 %vm166_vm0, %v3103_v12 }
 0xbf0   :  { %v3141_v49 = vpop.f32.mrf.mxu0 }
 0xbf1   :  { %v3142_v28 = vadd.f32 %v3753_v5, %v3141_v49 }
 0xbf3   :  { %v3167_v15 = vmul.f32 %v3142_v28, %v3142_v28  ;;  %v3153_v47 = vsel %vm531_vm9, %v3142_v28, 0.0 }
 0xbf5   :  { %v3171_v26 = vsel %vm531_vm9, %v3167_v15, 0.0 }
 0xbf8   :  { %v3144_v43 = vpop.f32.mrf.mxu0 }
 0xbf9   :  { %v3145_v61 = vadd.f32 %v3753_v5, %v3144_v43 }
 0xbfb   :  { %v3168_v16 = vmul.f32 %v3145_v61, %v3145_v61  ;;  %v3154_v31 = vsel %vm531_vm9, %v3145_v61, 0.0 }
 0xbfc   :  { %v3155_v17 = vadd.f32 %v3154_v31, %v3153_v47 }
 0xbfd   :  { %v3172_v13 = vsel %vm531_vm9, %v3168_v16, 0.0 }
 0xbfe   :  { %v3173_v20 = vadd.f32 %v3172_v13, %v3171_v26  ;;  %v3270_v26 = vld [vmem:[%s5610_s4] sm:$0xff] }
 0xc00   :  { %v3147_v6 = vpop.f32.mrf.mxu0 }
 0xc01   :  { %v3148_v18 = vadd.f32 %v3753_v5, %v3147_v6 }
 0xc03   :  { %v3169_v24 = vmul.f32 %v3148_v18, %v3148_v18  ;;  %v3156_v32 = vsel %vm531_vm9, %v3148_v18, 0.0 }
 0xc04   :  { %v3157_v62 = vadd.f32 %v3156_v32, %v3155_v17  ;;  %v3272_v17 = vld [vmem:[%s5610_s4 + $0x10] sm:$0xff] }
 0xc05   :  { %v3174_v34 = vsel %vm531_vm9, %v3169_v24, 0.0 }
 0xc06   :  { %v3175_v54 = vadd.f32 %v3174_v34, %v3173_v20 }
 0xc08   :  { %v3150_v9 = vpop.f32.mrf.mxu0 }
 0xc09   :  { %v3151_v2 = vadd.f32 %v3753_v5, %v3150_v9  ;;  %v3271_v9 = vld [vmem:[%s5610_s4 + $0x8] sm:$0xff] }
 0xc0b   :  { %v3158_v29 = vsel %vm531_vm9, %v3151_v2, 0.0  ;;  %v3170_v60 = vmul.f32 %v3151_v2, %v3151_v2 }
 0xc0c   :  { %v3159_v38 = vadd.f32 %v3158_v29, %v3157_v62 }
 0xc0d   :  { %v3176_v14 = vsel %vm531_vm9, %v3170_v60, 0.0 }
 0xc0e   :  { %v3160_v46 = vrot.slane %v3159_v38, 4  ;;  %v3177_v41 = vadd.f32 %v3176_v14, %v3175_v54 }
 0xc10   :  { %v3161_v30 = vadd.f32 %v3160_v46, %v3159_v38  ;;  %v3178_v39 = vrot.slane %v3177_v41, 4 }
 0xc12   :  { %v3162_v21 = vrot.slane %v3161_v30, 2  ;;  %v3179_v10 = vadd.f32 %v3178_v39, %v3177_v41 }
 0xc14   :  { %v3163_v19 = vadd.f32 %v3162_v21, %v3161_v30  ;;  %v3180_v40 = vrot.slane %v3179_v10, 2 }
 0xc16   :  { %v3164_v1 = vrot.slane %v3163_v19, 1  ;;  %v3181_v45 = vadd.f32 %v3180_v40, %v3179_v10  ;;  %v3754_v10 = vld [vmem:[%s5611_s13] ss:$0 sm:$0xff] }
 0xc18   :  { %v3165_v33 = vadd.f32 %v3164_v1, %v3163_v19  ;;  %v3182_v37 = vrot.slane %v3181_v45, 1 }
 0xc1a   :  { %v3166_v22 = vmul.f32 %v3165_v33, %v4273_v58  ;;  %v3183_v35 = vadd.f32 %v3182_v37, %v3181_v45 }
 0xc1c   :  { %v3184_v51 = vmul.f32 %v3183_v35, %v4273_v58  ;;  %v3185_v53 = vmul.f32 %v3166_v22, %v3166_v22 }
 0xc1e   :  { %v3186_v27 = vsub.f32 %v3184_v51, %v3185_v53 }
 0xc20   :  { %v3188_v25 = vadd.f32 1e-05, %v3186_v27 }
 0xc22   :  { %3910 = vrsqrt.f32 %v3188_v25  ;;  %vm3195_vm14 = vweird.f32 %v3188_v25 }
 0xc28   :  { %v3911_v50 = vpop.eup %3910 }
 0xc29   :  { %v3190_v48 = vmul.f32 %v3911_v50, %v3188_v25  ;;  %vm3196_vm3 = vweird.f32 %v3911_v50 }
 0xc2a   :  { %vm3197_vm15 = vmor %vm3195_vm14, %vm3196_vm3 }
 0xc2b   :  { %v3191_v36 = vmul.f32 %v3911_v50, %v3190_v48 }
 0xc2d   :  { %v3192_v0 = vmul.f32 0.5, %v3191_v36 }
 0xc2f   :  { %v3193_v3 = vsub.f32 1.5, %v3192_v0 }
 0xc31   :  { %v3194_v4 = vmul.f32 %v3911_v50, %v3193_v3 }
 0xc33   :  { %v3198_v44 = vsel %vm3197_vm15, %v3911_v50, %v3194_v4 }
 0xc34   :  { %v3199_v55 = vmul.f32 %v3198_v44, %v3187_v23 }
 0xc36   :  { %v3201_v7 = vmul.f32 %v3199_v55, %v3166_v22  ;;  %v3204_v56 = vperm.slane %v3199_v55, 0 }
 0xc38   :  { %v3202_v11 = vsub.f32 %v3200_v8, %v3201_v7  ;;  %v3209_v52 = vmul.f32 %v3204_v56, %v3151_v2  ;;  %v3208_v49 = vmul.f32 %v3204_v56, %v3148_v18  ;;  %v3207_v43 = vmul.f32 %v3204_v56, %v3145_v61  ;;  %v3275_v61 = vld [vmem:[%s5610_s4 + $0x28] sm:$0xff]  ;;  %v3273_v18 = vld [vmem:[%s5610_s4 + $0x18] sm:$0xff] }
 0xc39   :  { %v3206_v5 = vmul.f32 %v3204_v56, %v3142_v28  ;;  %v3274_v28 = vld [vmem:[%s5610_s4 + $0x20] sm:$0xff]  ;;  %3302 = vmatpush.msra.mxu3 %v3275_v61 }
 0xc3a   :  { %v3211_v12 = vperm.slane %v3202_v11, 0 }
 0xc3b   :  { %3303 = vmatpush.msra.mxu3 %v3274_v28 }
 0xc3c   :  { %v3216_v6 = vadd.f32 %v3211_v12, %v3209_v52  ;;  %v3215_v16 = vadd.f32 %v3211_v12, %v3208_v49  ;;  %v3214_v15 = vadd.f32 %v3211_v12, %v3207_v43  ;;  %v3213_v31 = vadd.f32 %v3211_v12, %v3206_v5 }
 0xc3d   :  { %3304 = vmatpush.msra.mxu3 %v3273_v18 }
 0xc3e   :  { %v3220_v24 = vmax.f32 %v3216_v6, 0.0  ;;  %v3219_v47 = vmax.f32 %v3215_v16, 0.0  ;;  %v3218_v13 = vmax.f32 %v3214_v15, 0.0  ;;  %v3217_v32 = vmax.f32 %v3213_v31, 0.0 }
 0xc3f   :  { %3305 = vmatpush.msra.mxu3 %v3272_v17 }
 0xc40   :  { %3233 = vmatpush.msra.mxu2 %v3220_v24  ;;  %3258 = vrot.lane.b32.xlu2 %v3219_v47, %s3981_s9 }
 0xc41   :  { %3256 = vrot.lane.b32.xlu0 %v3218_v13, %s3981_s9  ;;  %3254 = vrot.lane.b32.xlu1 %v3217_v32, %s3981_s9 }
 0xc42   :  { %3234 = vmatpush.msra.mxu2 %v3219_v47  ;;  %3306 = vmatpush.msra.mxu3 %v3271_v9 }
 0xc44   :  { %3235 = vmatpush.msra.mxu2 %v3218_v13  ;;  %3307 = vmatpush.msra.mxu3 %v3270_v26 }
 0xc46   :  { %3236 = vmatpush.msra.mxu2 %v3217_v32 }
 0xc47   :  { %3676 = vmatmul.msk.f32.vlgmr.msra.gmra.mxu2 %vm166_vm0, %v4228_v59 }
 0xc49   :  { %3260 = vrot.lane.b32.xlu1 %v3220_v24, %s3981_s9 }
 0xc4f   :  { %3677 = vmatmul.msk.f32.gmra.mxu2 %vm166_vm0, %v4235_v63 }
 0xc57   :  { %3678 = vmatmul.msk.f32.gmra.mxu2 %vm166_vm0, %v4216_v42 }
 0xc5f   :  { %3679 = vmatmul.msk.f32.gmra.mxu2 %vm166_vm0, %v4224_v57 }
 0xc9a   :  { %v3259_v54 = vpop.permute.xlu2 %3258 }
 0xcb3   :  { %v3255_v34 = vpop.permute.xlu1 %3254  ;;  %v3257_v62 = vpop.permute.xlu0 %3256 }
 0xcbb   :  { %v3261_v46 = vpop.permute.xlu1 %3260 }
 0xcca   :  { %v3238_v2 = vpop.f32.mrf.mxu2 }
 0xccb   :  { %v3266_v20 = vsel %vm531_vm9, %v3238_v2, %v3255_v34 }
 0xccc   :  { %3680 = vmatmul.msk.f32.vlgmr.msra.gmra.mxu3 %vm659_vm13, %v3266_v20  ;;  %v3355_v20 = vld [vmem:[%s4130_s12] sm:$0x1]  ;;  %s5612_s12 = sld [smem:[#allocation22_spill]] }
 0xcd2   :  { %v3241_v29 = vpop.f32.mrf.mxu2 }
 0xcd3   :  { %v3267_v60 = vsel %vm531_vm9, %v3241_v29, %v3257_v62 }
 0xcd4   :  { %3681 = vmatmul.msk.f32.gmra.mxu3 %vm659_vm13, %v3267_v60 }
 0xcda   :  { %v3244_v38 = vpop.f32.mrf.mxu2 }
 0xcdb   :  { %v3268_v14 = vsel %vm531_vm9, %v3244_v38, %v3259_v54  ;;  %v3368_v54 = vld [vmem:[%s4135_s27] sm:$0x1]  ;;  %s3984_s27 = smov [#allocation2]  }
 0xcdc   :  { %3682 = vmatmul.msk.f32.gmra.mxu3 %vm659_vm13, %v3268_v14  ;;  %s3501_s7 = sshll.u32 %s3984_s27, 4  ;;  %s3502_s7 = int_to_ptr.vmem [resolvable:$true] %s3501_s7 }
 0xce2   :  { %v3247_v41 = vpop.f32.mrf.mxu2 }
 0xce3   :  { %v3269_v30 = vsel %vm531_vm9, %v3247_v41, %v3261_v46 }
 0xce4   :  { %3683 = vmatmul.msk.f32.gmra.mxu3 %vm659_vm13, %v3269_v30 }
 0xd4f   :  { %v3309_v39 = vpop.f32.mrf.mxu3 }
 0xd50   :  { %v3310_v1 = vadd.f32 %v3754_v10, %v3309_v39 }
 0xd52   :  { %v3335_v37 = vmul.f32 %v3310_v1, %v3310_v1  ;;  %v3321_v51 = vsel %vm166_vm0, %v3310_v1, 0.0 }
 0xd54   :  { %v3339_v48 = vsel %vm166_vm0, %v3335_v37, 0.0 }
 0xd57   :  { %v3312_v21 = vpop.f32.mrf.mxu3 }
 0xd58   :  { %v3313_v19 = vadd.f32 %v3754_v10, %v3312_v21 }
 0xd5a   :  { %v3336_v33 = vmul.f32 %v3313_v19, %v3313_v19  ;;  %v3322_v22 = vsel %vm166_vm0, %v3313_v19, 0.0 }
 0xd5b   :  { %v3323_v25 = vadd.f32 %v3322_v22, %v3321_v51 }
 0xd5c   :  { %v3340_v53 = vsel %vm166_vm0, %v3336_v33, 0.0 }
 0xd5d   :  { %v3341_v3 = vadd.f32 %v3340_v53, %v3339_v48 }
 0xd5f   :  { %v3315_v40 = vpop.f32.mrf.mxu3 }
 0xd60   :  { %v3316_v45 = vadd.f32 %v3754_v10, %v3315_v40 }
 0xd62   :  { %v3337_v35 = vmul.f32 %v3316_v45, %v3316_v45  ;;  %v3324_v27 = vsel %vm166_vm0, %v3316_v45, 0.0 }
 0xd63   :  { %v3325_v23 = vadd.f32 %v3324_v27, %v3323_v25  ;;  %v3442_v27 = vld [vmem:[%s5612_s12 + $0x20] sm:$0xff]  ;;  %v3440_v25 = vld [vmem:[%s5612_s12 + $0x10] sm:$0xff] }
 0xd64   :  { %v3342_v36 = vsel %vm166_vm0, %v3337_v35, 0.0 }
 0xd65   :  { %v3343_v55 = vadd.f32 %v3342_v36, %v3341_v3 }
 0xd67   :  { %v3318_v50 = vpop.f32.mrf.mxu3 }
 0xd68   :  { %v3319_v0 = vadd.f32 %v3754_v10, %v3318_v50  ;;  %v3439_v50 = vld [vmem:[%s5612_s12 + $0x8] sm:$0xff] }
 0xd6a   :  { %v3326_v4 = vsel %vm166_vm0, %v3319_v0, 0.0  ;;  %v3338_v44 = vmul.f32 %v3319_v0, %v3319_v0 }
 0xd6b   :  { %v3327_v8 = vadd.f32 %v3326_v4, %v3325_v23 }
 0xd6c   :  { %v3344_v7 = vsel %vm166_vm0, %v3338_v44, 0.0 }
 0xd6d   :  { %v3328_v56 = vrot.slane %v3327_v8, 4  ;;  %v3345_v11 = vadd.f32 %v3344_v7, %v3343_v55 }
 0xd6f   :  { %v3329_v52 = vadd.f32 %v3328_v56, %v3327_v8  ;;  %v3346_v12 = vrot.slane %v3345_v11, 4 }
 0xd71   :  { %v3330_v49 = vrot.slane %v3329_v52, 2  ;;  %v3347_v43 = vadd.f32 %v3346_v12, %v3345_v11 }
 0xd73   :  { %v3331_v5 = vadd.f32 %v3330_v49, %v3329_v52  ;;  %v3348_v6 = vrot.slane %v3347_v43, 2 }
 0xd75   :  { %v3332_v16 = vrot.slane %v3331_v5, 1  ;;  %v3349_v15 = vadd.f32 %v3348_v6, %v3347_v43 }
 0xd77   :  { %v3333_v31 = vadd.f32 %v3332_v16, %v3331_v5  ;;  %v3350_v24 = vrot.slane %v3349_v15, 1 }
 0xd79   :  { %v3334_v47 = vmul.f32 %v3333_v31, %v4273_v58  ;;  %v3351_v13 = vadd.f32 %v3350_v24, %v3349_v15 }
 0xd7b   :  { %v3352_v32 = vmul.f32 %v3351_v13, %v4273_v58  ;;  %v3353_v61 = vmul.f32 %v3334_v47, %v3334_v47 }
 0xd7d   :  { %v3354_v28 = vsub.f32 %v3352_v32, %v3353_v61 }
 0xd7f   :  { %v3356_v18 = vadd.f32 1e-05, %v3354_v28 }
 0xd81   :  { %3912 = vrsqrt.f32 %v3356_v18  ;;  %vm3363_vm13 = vweird.f32 %v3356_v18 }
 0xd87   :  { %v3913_v17 = vpop.eup %3912 }
 0xd88   :  { %v3358_v9 = vmul.f32 %v3913_v17, %v3356_v18  ;;  %vm3364_vm9 = vweird.f32 %v3913_v17 }
 0xd89   :  { %vm3365_vm1 = vmor %vm3363_vm13, %vm3364_vm9 }
 0xd8a   :  { %v3359_v26 = vmul.f32 %v3913_v17, %v3358_v9 }
 0xd8c   :  { %v3360_v34 = vmul.f32 0.5, %v3359_v26 }
 0xd8e   :  { %v3361_v2 = vsub.f32 1.5, %v3360_v34 }
 0xd90   :  { %v3362_v62 = vmul.f32 %v3913_v17, %v3361_v2 }
 0xd92   :  { %v3366_v29 = vsel %vm3365_vm1, %v3913_v17, %v3362_v62 }
 0xd93   :  { %v3367_v60 = vmul.f32 %v3366_v29, %v3355_v20 }
 0xd95   :  { %v3369_v38 = vmul.f32 %v3367_v60, %v3334_v47  ;;  %v3372_v58 = vperm.slane %v3367_v60, 0 }
 0xd97   :  { %v3370_v14 = vsub.f32 %v3368_v54, %v3369_v38  ;;  %v3377_v46 = vmul.f32 %v3372_v58, %v3319_v0  ;;  %v3376_v30 = vmul.f32 %v3372_v58, %v3316_v45  ;;  %v3375_v39 = vmul.f32 %v3372_v58, %v3313_v19  ;;  %v3445_v19 = vld [vmem:[%s5612_s12 + $0x38] sm:$0xff]  ;;  %v3443_v45 = vld [vmem:[%s5612_s12 + $0x28] sm:$0xff] }
 0xd98   :  { %v3374_v21 = vmul.f32 %v3372_v58, %v3310_v1  ;;  %v3444_v1 = vld [vmem:[%s5612_s12 + $0x30] sm:$0xff]  ;;  %3470 = vmatpush.msra.mxu0 %v3445_v19 }
 0xd99   :  { %v3379_v41 = vperm.slane %v3370_v14, 0 }
 0xd9a   :  { %3471 = vmatpush.msra.mxu0 %v3444_v1 }
 0xd9b   :  { %v3384_v10 = vadd.f32 %v3379_v41, %v3377_v46  ;;  %v3383_v40 = vadd.f32 %v3379_v41, %v3376_v30  ;;  %v3382_v33 = vadd.f32 %v3379_v41, %v3375_v39  ;;  %v3381_v37 = vadd.f32 %v3379_v41, %v3374_v21 }
 0xd9c   :  { %3472 = vmatpush.msra.mxu0 %v3443_v45 }
 0xd9d   :  { %v3388_v22 = vmax.f32 %v3384_v10, 0.0  ;;  %v3387_v35 = vmax.f32 %v3383_v40, 0.0  ;;  %v3386_v51 = vmax.f32 %v3382_v33, 0.0  ;;  %v3385_v53 = vmax.f32 %v3381_v37, 0.0 }
 0xd9e   :  { %3473 = vmatpush.msra.mxu0 %v3442_v27 }
 0xd9f   :  { %3401 = vmatpush.msra.mxu1 %v3388_v22  ;;  %3426 = vrot.lane.b32.xlu1 %v3387_v35, %s3980_s5 }
 0xda0   :  { %3424 = vrot.lane.b32.xlu2 %v3386_v51, %s3980_s5  ;;  %3422 = vrot.lane.b32.xlu0 %v3385_v53, %s3980_s5 }
 0xda1   :  { %3402 = vmatpush.msra.mxu1 %v3387_v35 }
 0xda3   :  { %3403 = vmatpush.msra.mxu1 %v3386_v51 }
 0xda5   :  { %3404 = vmatpush.msra.mxu1 %v3385_v53 }
 0xda6   :  { %3684 = vmatmul.msk.f32.vlgmr.msra.gmra.mxu1 %vm166_vm0, %v4228_v59  ;;  %v3441_v59 = vld [vmem:[%s5612_s12 + $0x18] sm:$0xff] }
 0xda7   :  { %3474 = vmatpush.msra.mxu0 %v3441_v59 }
 0xda8   :  { %3428 = vrot.lane.b32.xlu0 %v3388_v22, %s3980_s5  ;;  %s3930_s5 = scalar_lea.hbm %s4185_s24, 512 }
 0xda9   :  { %3475 = vmatpush.msra.mxu0 %v3440_v25  ;;  %p3932_p2 = scmp.lt.s32.totalorder %s3930_s5, %s3928_s0 }
 0xdab   :  { %3476 = vmatpush.msra.mxu0 %v3439_v50  ;;  %p3933_p3 = por %p3932_p2, %p3931_p1 }
 0xdad   :  { %p3934_p4 = pnand %p3933_p3, %p3929_p0 }
 0xdae   :  { %3685 = vmatmul.msk.f32.gmra.mxu1 %vm166_vm0, %v4235_v63  ;;  %v3438_v63 = vld [vmem:[%s5612_s12] sm:$0xff] }
 0xdaf   :  { %3477 = vmatpush.msra.mxu0 %v3438_v63 }
 0xdb6   :  { %3686 = vmatmul.msk.f32.gmra.mxu1 %vm166_vm0, %v4216_v42 }
 0xdbe   :  { %3687 = vmatmul.msk.f32.gmra.mxu1 %vm166_vm0, %v4224_v57 }
 0xdfa   :  { %v3425_v36 = vpop.permute.xlu2 %3424 }
 0xe11   :  { %v3427_v23 = vpop.permute.xlu1 %3426 }
 0xe12   :  { %v3423_v42 = vpop.permute.xlu0 %3422 }
 0xe1a   :  { %v3429_v55 = vpop.permute.xlu0 %3428 }
 0xe23   :  { %v3406_v48 = vpop.f32.mrf.mxu1 }
 0xe24   :  { %v3434_v57 = vsel %vm166_vm0, %v3406_v48, %v3423_v42 }
 0xe25   :  { %3688 = vmatmul.msk.f32.vlgmr.msra.gmra.mxu0 %vm489_vm8, %v3434_v57 }
 0xe2b   :  { %v3409_v0 = vpop.f32.mrf.mxu1 }
 0xe2c   :  { %v3435_v3 = vsel %vm166_vm0, %v3409_v0, %v3425_v36 }
 0xe2d   :  { %3689 = vmatmul.msk.f32.gmra.mxu0 %vm489_vm8, %v3435_v3 }
 0xe33   :  { %v3412_v4 = vpop.f32.mrf.mxu1 }
 0xe34   :  { %v3436_v44 = vsel %vm166_vm0, %v3412_v4, %v3427_v23 }
 0xe35   :  { %3690 = vmatmul.msk.f32.gmra.mxu0 %vm489_vm8, %v3436_v44 }
 0xe3b   :  { %v3415_v8 = vpop.f32.mrf.mxu1 }
 0xe3c   :  { %v3437_v7 = vsel %vm166_vm0, %v3415_v8, %v3429_v55 }
 0xe3d   :  { %3691 = vmatmul.msk.f32.gmra.mxu0 %vm489_vm8, %v3437_v7 }
 0xe3e   :  { %3937 = shalt.err (!%p3934_p4)
}
 0xe3f   :  { %s3985_s9 = smov 2048   ;;  %s5613_s17 = sld [smem:[#allocation23_spill]] }
 0xe40   :  { %s3986_s21 = smov 128  }
 0xe41   :  { %3509 = dma.vmem_to_hbm [thread:$0]  %s3502_s7, 8192, %s3504_s10, [#allocation3], %s3985_s9, %s3985_s9, %s3986_s21  }
 0xe45   :  { %v3755_v56 = vld [vmem:[%s5613_s17] ss:$0 sm:$0xff] }
 0xea2   :  { %v3479_v11 = vpop.f32.mrf.mxu0 }
 0xea3   :  { %v3480_v52 = vadd.f32 %v3755_v56, %v3479_v11 }
 0xea5   :  { %3491 = vst.msk [vmem:[%s4180_s30] sm:$0xff] %vm300_vm2, %v3480_v52 }
 0xeaa   :  { %v3482_v12 = vpop.f32.mrf.mxu0 }
 0xeab   :  { %v3483_v49 = vadd.f32 %v3755_v56, %v3482_v12 }
 0xead   :  { %3492 = vst.msk [vmem:[%s4180_s30 + $0x8] sm:$0xff] %vm300_vm2, %v3483_v49 }
 0xeb2   :  { %v3485_v43 = vpop.f32.mrf.mxu0 }
 0xeb3   :  { %v3486_v5 = vadd.f32 %v3755_v56, %v3485_v43 }
 0xeb5   :  { %3493 = vst.msk [vmem:[%s4180_s30 + $0x10] sm:$0xff] %vm300_vm2, %v3486_v5 }
 0xeba   :  { %v3488_v6 = vpop.f32.mrf.mxu0 }
 0xebb   :  { %v3489_v16 = vadd.f32 %v3755_v56, %v3488_v6 }
 0xebd   :  { %3494 = vst.msk [vmem:[%s4180_s30 + $0x18] sm:$0xff] %vm300_vm2, %v3489_v16 }
 0xebe   :  { %3938 = dma.done.wait [#allocation3], 8192  }
 0xebf   :  { %3939 = vsyncadd [#allocation3], 4294959104 }
 0xec0   :  { %3516 = vsyncpa [#allocation3], 1 }

</bundles_post_ra>
